<compile_context>
chip_gen: v7x
topology: tpu7x:2x2x1
jax: 0.10.0
libtpu: 0.0.40
codegen_flags: <defaults>
</compile_context>

<pallas_src>
import functools
import math

import jax
import jax.numpy as jnp
from jax import lax
from jax.experimental import pallas as pl
from jax.experimental.pallas import tpu as pltpu

NUM_CLASSES = 7

_VMEM_LIMIT = 32 * 1024 * 1024  # safe scoped-VMEM budget on v5e/v6e/v7x


def _round_up(x, m):
    return ((x + m - 1) // m) * m


def _pick_tile(n, candidates=(512, 256, 128)):
    for c in candidates:
        if n % c == 0:
            return c
    return n  # small / odd extent: keep it as a single full-dim block


# ---------------------------------------------------------------------------
# Matmul kernel: y = out_scale * act(a @ b + bias) [+ residual]
# ---------------------------------------------------------------------------
def _matmul_kernel(*refs, act, out_scale, has_residual):
    if has_residual:
        a_ref, b_ref, bias_ref, res_ref, o_ref, acc_ref = refs
    else:
        a_ref, b_ref, bias_ref, o_ref, acc_ref = refs
        res_ref = None

    k = pl.program_id(2)

    @pl.when(k == 0)
    def _():
        acc_ref[...] = jnp.zeros_like(acc_ref)

    acc_ref[...] += jnp.dot(a_ref[...], b_ref[...],
                            preferred_element_type=jnp.float32)

    @pl.when(k == pl.num_programs(2) - 1)
    def _():
        y = acc_ref[...] + bias_ref[...]
        if act == "relu":
            y = jnp.maximum(y, 0.0)
        elif act == "silu":
            y = y * jax.nn.sigmoid(y)
        elif act == "glu":
            half = y.shape[-1] // 2
            y = y[:, :half] * jax.nn.sigmoid(y[:, half:])
        if out_scale != 1.0:
            y = y * out_scale
        if has_residual:
            y = y + res_ref[...].astype(jnp.float32)
        o_ref[...] = y.astype(o_ref.dtype)


def pallas_matmul(a, b, bias=None, act="none", residual=None, out_scale=1.0,
                  out_dtype=jnp.float32):
    """y = out_scale * act(a @ b + bias) + residual.

    a: (M, K), b: (K, N), bias: (N,), residual: (M, N) or None.
    act == "glu": output is y[:, :N//2] * sigmoid(y[:, N//2:]).
    Inputs are fed to the MXU in bf16; accumulation / bias / epilogue in f32.
    """
    M, K = a.shape
    K2, N = b.shape
    assert K == K2
    glu = act == "glu"
    assert not (glu and residual is not None)
    if glu:
        assert N % 256 == 0, "GLU fusion needs 128-aligned halves"

    if bias is None:
        bias = jnp.zeros((N,), jnp.float32)

    # N (lane) padded to a multiple of 128 -> unmasked, lane-dense stores.
    Np = _round_up(N, 128)
    if Np != N:
        b = jnp.pad(b, ((0, 0), (0, Np - N)))
        bias = jnp.pad(bias, (0, Np - N))
    # K padded only when large and misaligned; small K stays one full block.
    Kp = K if (K % 128 == 0 or K <= 512) else _round_up(K, 128)
    if Kp != K:
        a = jnp.pad(a, ((0, 0), (0, Kp - K)))
        b = jnp.pad(b, ((0, Kp - K), (0, 0)))
    # M always bounded so the activation block never blows VMEM (v7x: 64 MiB).
    if M <= 256:
        tm, Mp = M, M
    else:
        tm = 256
        Mp = _round_up(M, tm)
        if Mp != M:
            a = jnp.pad(a, ((0, Mp - M), (0, 0)))

    tn = Np if glu else _pick_tile(Np)
    tk = _pick_tile(Kp)
    n_out = Np // 2 if glu else Np
    tn_out = tn // 2 if glu else tn

    a = a.astype(jnp.bfloat16)
    b = b.astype(jnp.bfloat16)
    bias = bias.reshape(1, Np).astype(jnp.float32)

    in_specs = [
        pl.BlockSpec((tm, tk), lambda i, j, k: (i, k)),
        pl.BlockSpec((tk, tn), lambda i, j, k: (k, j)),
        pl.BlockSpec((1, tn), lambda i, j, k: (0, j)),
    ]
    inputs = [a, b, bias]

    has_residual = residual is not None
    if has_residual:
        res = residual.astype(jnp.float32)
        if res.shape != (Mp, n_out):
            res = jnp.pad(res, ((0, Mp - res.shape[0]),
                                (0, n_out - res.shape[1])))
        in_specs.append(pl.BlockSpec((tm, tn_out), lambda i, j, k: (i, j)))
        inputs.append(res)

    kernel = functools.partial(_matmul_kernel, act=act, out_scale=out_scale,
                               has_residual=has_residual)
    out = pl.pallas_call(
        kernel,
        out_shape=jax.ShapeDtypeStruct((Mp, n_out), out_dtype),
        grid=(Mp // tm, Np // tn, Kp // tk),
        in_specs=in_specs,
        out_specs=pl.BlockSpec((tm, tn_out), lambda i, j, k: (i, j)),
        scratch_shapes=[pltpu.VMEM((tm, tn), jnp.float32)],
        compiler_params=pltpu.CompilerParams(
            dimension_semantics=("parallel", "parallel", "arbitrary"),
            vmem_limit_bytes=_VMEM_LIMIT),
    )(*inputs)

    n_valid = N // 2 if glu else N
    if Mp != M or n_out != n_valid:
        out = out[:M, :n_valid]
    return out


# ---------------------------------------------------------------------------
# LayerNorm (row-tiled, parallel grid)
# ---------------------------------------------------------------------------
def _layernorm_kernel(x_ref, g_ref, b_ref, o_ref, *, eps):
    x = x_ref[...].astype(jnp.float32)
    mu = jnp.mean(x, axis=-1, keepdims=True)
    var = jnp.mean((x - mu) ** 2, axis=-1, keepdims=True)
    y = (x - mu) * lax.rsqrt(var + eps)
    o_ref[...] = (y * g_ref[...] + b_ref[...]).astype(o_ref.dtype)


def pallas_layernorm(x, gamma, beta, eps=1e-5, out_dtype=jnp.float32):
    N, D = x.shape
    if N <= 256:
        tm, Npad = N, N
    else:
        tm = 256
        Npad = _round_up(N, tm)
        if Npad != N:
            x = jnp.pad(x, ((0, Npad - N), (0, 0)))
    kernel = functools.partial(_layernorm_kernel, eps=eps)
    out = pl.pallas_call(
        kernel,
        out_shape=jax.ShapeDtypeStruct((Npad, D), out_dtype),
        grid=(Npad // tm,),
        in_specs=[
            pl.BlockSpec((tm, D), lambda i: (i, 0)),
            pl.BlockSpec((1, D), lambda i: (0, 0)),
            pl.BlockSpec((1, D), lambda i: (0, 0)),
        ],
        out_specs=pl.BlockSpec((tm, D), lambda i: (i, 0)),
        compiler_params=pltpu.CompilerParams(
            dimension_semantics=("parallel",),
            vmem_limit_bytes=_VMEM_LIMIT),
    )(x.astype(jnp.float32),
      gamma.reshape(1, D).astype(jnp.float32),
      beta.reshape(1, D).astype(jnp.float32))
    return out[:N] if Npad != N else out


# ---------------------------------------------------------------------------
# Multi-head attention (heads batched per grid step, bf16 MXU inputs)
# ---------------------------------------------------------------------------
def _attention_kernel(q_ref, k_ref, v_ref, o_ref, *, scale):
    q = q_ref[...]                                   # (hb, T, dh) bf16
    k = k_ref[...]
    v = v_ref[...]
    s = jnp.einsum("htd,hkd->htk", q, k,
                   preferred_element_type=jnp.float32) * scale
    m = jnp.max(s, axis=-1, keepdims=True)
    p = jnp.exp(s - m)
    p = p * pl.reciprocal(jnp.sum(p, axis=-1, keepdims=True), approx=True)
    o = jnp.einsum("htk,hkd->htd", p.astype(v.dtype), v,
                   preferred_element_type=jnp.float32)
    o_ref[...] = o.astype(o_ref.dtype)


def pallas_attention(q, k, v, scale, heads_per_block=8):
    """q, k, v: (B*H, T, dh); full (non-masked) softmax attention per head."""
    BH, T, dh = q.shape
    hb = min(heads_per_block, BH)
    while BH % hb:
        hb -= 1
    spec = pl.BlockSpec((hb, T, dh), lambda i: (i, 0, 0))
    kernel = functools.partial(_attention_kernel, scale=scale)
    return pl.pallas_call(
        kernel,
        out_shape=jax.ShapeDtypeStruct((BH, T, dh), jnp.bfloat16),
        grid=(BH // hb,),
        in_specs=[spec, spec, spec],
        out_specs=spec,
        compiler_params=pltpu.CompilerParams(
            dimension_semantics=("parallel",),
            vmem_limit_bytes=_VMEM_LIMIT),
    )(q.astype(jnp.bfloat16), k.astype(jnp.bfloat16), v.astype(jnp.bfloat16))


# ---------------------------------------------------------------------------
# Depthwise conv over T + BatchNorm1d(eval, folded) + SiLU  (per-batch grid)
# ---------------------------------------------------------------------------
def _dwconv_bn_silu_kernel(x_ref, w_ref, b_ref, sc_ref, sh_ref, o_ref, *, k, T):
    xp = x_ref[0].astype(jnp.float32)            # (T + k - 1, D)
    w = w_ref[...].astype(jnp.float32)           # (k, D)
    acc = xp[0:T, :] * w[0:1, :]
    # TODO(synk): swap the strided tap slices for pltpu.roll (XLU) once
    # sublane rotation of non-8-aligned windows is validated on all gens.
    for j in range(1, k):                        # static unrolled taps
        acc = acc + xp[j:j + T, :] * w[j:j + 1, :]
    acc = acc + b_ref[...]
    acc = acc * sc_ref[...] + sh_ref[...]        # BatchNorm1d (eval, folded)
    acc = acc * jax.nn.sigmoid(acc)              # SiLU
    o_ref[0] = acc.astype(o_ref.dtype)


def pallas_dwconv_bn_silu(x, w, b, bn_scale, bn_shift, out_dtype=jnp.bfloat16):
    """x: (B, T, D); depthwise conv over T (same padding) + BN(eval) + SiLU."""
    B, T, D = x.shape
    k = w.shape[0]
    assert k % 2 == 1
    pad = (k - 1) // 2
    Tp = T + 2 * pad
    xp = jnp.pad(x.astype(jnp.bfloat16), ((0, 0), (pad, pad), (0, 0)))
    kernel = functools.partial(_dwconv_bn_silu_kernel, k=k, T=T)
    return pl.pallas_call(
        kernel,
        out_shape=jax.ShapeDtypeStruct((B, T, D), out_dtype),
        grid=(B,),
        in_specs=[
            pl.BlockSpec((1, Tp, D), lambda i: (i, 0, 0)),
            pl.BlockSpec((k, D), lambda i: (0, 0)),
            pl.BlockSpec((1, D), lambda i: (0, 0)),
            pl.BlockSpec((1, D), lambda i: (0, 0)),
            pl.BlockSpec((1, D), lambda i: (0, 0)),
        ],
        out_specs=pl.BlockSpec((1, T, D), lambda i: (i, 0, 0)),
        compiler_params=pltpu.CompilerParams(
            dimension_semantics=("parallel",),
            vmem_limit_bytes=_VMEM_LIMIT),
    )(xp, w.astype(jnp.float32),
      b.reshape(1, D).astype(jnp.float32),
      bn_scale.reshape(1, D).astype(jnp.float32),
      bn_shift.reshape(1, D).astype(jnp.float32))


# ---------------------------------------------------------------------------
# Model forward (JAX glue around the Pallas kernels)
# ---------------------------------------------------------------------------
# TODO(synk): BaseCNN is not defined in the reference snippet; a minimal
# conv3x3(pad=1)+ReLU -> global-avg-pool -> Linear stand-in producing
# d_model/2 features per frame is used (the forward only requires that shape).
def base_cnn_forward(x, p):
    """x: (N, C, H, W) NCHW -> (N, feat_dim)."""
    N, C, H, W = x.shape
    kh = kw = 3
    # TODO(synk): im2col is still materialized in HBM glue (9x a frame); for a
    # real BaseCNN move the patch gather in-kernel or use lax.conv.
    xp = jnp.pad(x, ((0, 0), (0, 0), (1, 1), (1, 1)))
    cols = [xp[:, :, di:di + H, dj:dj + W]
            for di in range(kh) for dj in range(kw)]
    patches = jnp.stack(cols, axis=2)                      # (N, C, 9, H, W)
    patches = patches.transpose(0, 3, 4, 1, 2).reshape(N * H * W, C * kh * kw)
    patches = patches.astype(jnp.bfloat16)
    y = pallas_matmul(patches, p["conv_w"], p["conv_b"], act="relu")
    y = y.reshape(N, H * W, -1).mean(axis=1)               # global avg pool
    return pallas_matmul(y, p["fc_w"], p["fc_b"])          # (N, feat_dim)


def ffn_forward(x2d, p):
    """Returns 0.5 * FFN(LN(x)) + x  (residual + half-step scale fused)."""
    y = pallas_layernorm(x2d, p["ln_g"], p["ln_b"], out_dtype=jnp.bfloat16)
    h = pallas_matmul(y, p["w1"], p["b1"], act="silu", out_dtype=jnp.bfloat16)
    return pallas_matmul(h, p["w2"], p["b2"], residual=x2d, out_scale=0.5)


def mhsa_forward(x, p, num_heads):
    """Returns MHSA(LN(x)) + x  (residual fused into the out projection)."""
    B, T, D = x.shape
    dh = D // num_heads
    x2d = x.reshape(B * T, D)
    y = pallas_layernorm(x2d, p["ln_g"], p["ln_b"], out_dtype=jnp.bfloat16)
    qkv = pallas_matmul(y, p["in_w"], p["in_b"], out_dtype=jnp.bfloat16)
    qkv = qkv.reshape(B, T, 3, num_heads, dh)
    q = qkv[:, :, 0].transpose(0, 2, 1, 3).reshape(B * num_heads, T, dh)
    k = qkv[:, :, 1].transpose(0, 2, 1, 3).reshape(B * num_heads, T, dh)
    v = qkv[:, :, 2].transpose(0, 2, 1, 3).reshape(B * num_heads, T, dh)
    o = pallas_attention(q, k, v, scale=1.0 / math.sqrt(dh))
    o = o.reshape(B, num_heads, T, dh).transpose(0, 2, 1, 3).reshape(B * T, D)
    out = pallas_matmul(o, p["out_w"], p["out_b"], residual=x2d)
    return out.reshape(B, T, D)


def conv_module_forward(x, p):
    """Returns ConvModule(x) + x  (GLU + residual fused into matmuls)."""
    B, T, D = x.shape
    x2d = x.reshape(B * T, D)
    y = pallas_layernorm(x2d, p["ln_g"], p["ln_b"], out_dtype=jnp.bfloat16)
    y = pallas_matmul(y, p["pw1_w"], p["pw1_b"], act="glu",
                      out_dtype=jnp.bfloat16)              # (BT, D): GLU fused
    y = pallas_dwconv_bn_silu(y.reshape(B, T, D), p["dw_w"], p["dw_b"],
                              p["bn_scale"], p["bn_shift"])
    out = pallas_matmul(y.reshape(B * T, D), p["pw2_w"], p["pw2_b"],
                        residual=x2d)
    return out.reshape(B, T, D)


def conformer_layer_forward(x, p, num_heads):
    B, T, D = x.shape
    x = ffn_forward(x.reshape(B * T, D), p["ffn1"]).reshape(B, T, D)
    x = mhsa_forward(x, p["attn"], num_heads)
    x = conv_module_forward(x, p["conv"])
    x = ffn_forward(x.reshape(B * T, D), p["ffn2"]).reshape(B, T, D)
    return pallas_layernorm(x.reshape(B * T, D),
                            p["final_ln_g"], p["final_ln_b"]).reshape(B, T, D)


def conformer_vision_forward(g, r, params, *, num_heads):
    B, T, C, H, W = g.shape
    feats_g = base_cnn_forward(g.reshape(B * T, C, H, W),
                               params["cnn_g"]).reshape(B, T, -1)
    feats_r = base_cnn_forward(r.reshape(B * T, C, H, W),
                               params["cnn_r"]).reshape(B, T, -1)
    x = jnp.concatenate([feats_g, feats_r], axis=-1)       # (B, T, d_model)
    for lp in params["layers"]:
        x = conformer_layer_forward(x, lp, num_heads)
    return pallas_matmul(x[:, -1, :], params["cls_w"], params["cls_b"])


# ---------------------------------------------------------------------------
# Deterministic parameter init (weights pre-transposed to (K, N) and bf16)
# ---------------------------------------------------------------------------
def init_params(key, *, c_in, conv_ch, d_model, ffn_dim, num_layers, dw_kernel):
    keys = iter(jax.random.split(key, 256))

    def nrm(shape, scale=0.02):
        return scale * jax.random.normal(next(keys), shape, jnp.float32)

    def wmat(shape):  # torch-shaped (out, in) -> stored (in, out) bf16
        return nrm(shape).T.astype(jnp.bfloat16)

    def cnn_params(feat_dim):
        conv_w = nrm((conv_ch, c_in, 3, 3)).reshape(conv_ch, c_in * 9)
        return dict(
            conv_w=conv_w.T.astype(jnp.bfloat16),          # (C*9, Cout)
            conv_b=nrm((conv_ch,)),
            fc_w=wmat((feat_dim, conv_ch)),                # (Cout, feat_dim)
            fc_b=nrm((feat_dim,)),
        )

    def ffn_params():
        return dict(
            ln_g=jnp.ones((d_model,), jnp.float32),
            ln_b=jnp.zeros((d_model,), jnp.float32),
            w1=wmat((ffn_dim, d_model)), b1=nrm((ffn_dim,)),
            w2=wmat((d_model, ffn_dim)), b2=nrm((d_model,)),
        )

    def layer_params():
        bn_eps = 1e-5
        bn_gamma = jnp.ones((d_model,), jnp.float32)
        bn_beta = jnp.zeros((d_model,), jnp.float32)
        bn_mean = jnp.zeros((d_model,), jnp.float32)
        bn_var = jnp.ones((d_model,), jnp.float32)
        bn_scale = bn_gamma / jnp.sqrt(bn_var + bn_eps)
        bn_shift = bn_beta - bn_mean * bn_scale
        return dict(
            ffn1=ffn_params(),
            attn=dict(
                ln_g=jnp.ones((d_model,), jnp.float32),
                ln_b=jnp.zeros((d_model,), jnp.float32),
                in_w=wmat((3 * d_model, d_model)), in_b=nrm((3 * d_model,)),
                out_w=wmat((d_model, d_model)), out_b=nrm((d_model,)),
            ),
            conv=dict(
                ln_g=jnp.ones((d_model,), jnp.float32),
                ln_b=jnp.zeros((d_model,), jnp.float32),
                pw1_w=wmat((2 * d_model, d_model)), pw1_b=nrm((2 * d_model,)),
                dw_w=nrm((dw_kernel, d_model)), dw_b=nrm((d_model,)),
                bn_scale=bn_scale, bn_shift=bn_shift,
                pw2_w=wmat((d_model, d_model)), pw2_b=nrm((d_model,)),
            ),
            ffn2=ffn_params(),
            final_ln_g=jnp.ones((d_model,), jnp.float32),
            final_ln_b=jnp.zeros((d_model,), jnp.float32),
        )

    feat_dim = d_model // 2
    return dict(
        cnn_g=cnn_params(feat_dim),
        cnn_r=cnn_params(feat_dim),
        layers=[layer_params() for _ in range(num_layers)],
        cls_w=wmat((NUM_CLASSES, d_model)),
        cls_b=nrm((NUM_CLASSES,)),
    )


if __name__ == "__main__":
    # Small shapes consistent with the module's forward:
    # g, r: (B, T, C, H, W); d_model = 2 * per-CNN feature dim.
    B, T = 2, 8
    C, H, W = 3, 8, 8
    D_MODEL = 128
    NUM_HEADS = 4
    FFN_DIM = 256
    NUM_LAYERS = 2
    DW_KERNEL = 7   # (scaled down from 31 to fit the short demo sequence)

    key = jax.random.PRNGKey(0)
    kg, kr, kp = jax.random.split(key, 3)
    g = jax.random.normal(kg, (B, T, C, H, W), jnp.float32)
    r = jax.random.normal(kr, (B, T, C, H, W), jnp.float32)
    params = init_params(kp, c_in=C, conv_ch=8, d_model=D_MODEL,
                         ffn_dim=FFN_DIM, num_layers=NUM_LAYERS,
                         dw_kernel=DW_KERNEL)

    fwd = jax.jit(functools.partial(conformer_vision_forward,
                                    num_heads=NUM_HEADS))
    logits = fwd(g, r, params)
    jax.block_until_ready(logits)
    assert logits.shape == (B, NUM_CLASSES)
    print("KERNEL_OK")
</pallas_src>

<mosaic_0001>
module attributes {stable_mosaic.version = 11 : i64} {
  func.func @_matmul_kernel(%arg0: i32, %arg1: i32, %arg2: i32, %arg3: memref<256x27xbf16, #tpu.memory_space<vmem>>, %arg4: memref<27x128xbf16, #tpu.memory_space<vmem>>, %arg5: memref<1x128xf32, #tpu.memory_space<vmem>>, %arg6: memref<256x128xf32, #tpu.memory_space<vmem>>, %arg7: memref<256x128xf32, #tpu.memory_space<vmem>>) attributes {dimension_semantics = [#tpu.dimension_semantics<parallel>, #tpu.dimension_semantics<parallel>, #tpu.dimension_semantics<arbitrary>], iteration_bounds = array<i64: 4, 1, 1>, scalar_prefetch = 0 : i64, scratch_operands = 1 : i64, tpu.core_type = #tpu.core_type<tc>, window_params = [{transform_indices = @transform_0, window_bounds = array<i64: 256, 27>}, {transform_indices = @transform_1, window_bounds = array<i64: 27, 128>}, {transform_indices = @transform_2, window_bounds = array<i64: 1, 128>}, {transform_indices = @transform_3, window_bounds = array<i64: 256, 128>}]} {
    %c0_i32 = arith.constant 0 : i32
    %0 = arith.cmpi eq, %arg2, %c0_i32 : i32
    %1 = arith.extui %0 : i1 to i32
    %c0_i32_0 = arith.constant 0 : i32
    %2 = arith.cmpi ne, %1, %c0_i32_0 : i32
    scf.if %2 {
      %cst_10 = arith.constant 0.000000e+00 : f32
      %12 = vector.broadcast %cst_10 : f32 to vector<256x128xf32>
      %c0_11 = arith.constant 0 : index
      %c0_12 = arith.constant 0 : index
      %13 = vector.load %arg7[%c0_11, %c0_12] : memref<256x128xf32, #tpu.memory_space<vmem>>, vector<256x128xf32>
      tpu.vector_store %arg7[%c0_11, %c0_12], %12 {strides = array<i32>} : memref<256x128xf32, #tpu.memory_space<vmem>>, vector<256x128xf32>,
    } else {
    }
    %c0 = arith.constant 0 : index
    %c0_1 = arith.constant 0 : index
    %3 = vector.load %arg7[%c0, %c0_1] : memref<256x128xf32, #tpu.memory_space<vmem>>, vector<256x128xf32>
    %c0_2 = arith.constant 0 : index
    %c0_3 = arith.constant 0 : index
    %4 = vector.load %arg3[%c0_2, %c0_3] : memref<256x27xbf16, #tpu.memory_space<vmem>>, vector<256x27xbf16>
    %c0_4 = arith.constant 0 : index
    %c0_5 = arith.constant 0 : index
    %5 = vector.load %arg4[%c0_4, %c0_5] : memref<27x128xbf16, #tpu.memory_space<vmem>>, vector<27x128xbf16>
    %cst = arith.constant dense<0.000000e+00> : vector<256x128xf32>
    %6 = tpu.matmul %4, %5, %cst {dimension_numbers = #tpu.dot_dimension_numbers<[1], [0], [0], [1], [0, 0, 1, 1], [], []>} : vector<256x27xbf16>, vector<27x128xbf16>, vector<256x128xf32> -> vector<256x128xf32>
    %7 = arith.addf %3, %6 : vector<256x128xf32>
    %c0_6 = arith.constant 0 : index
    %c0_7 = arith.constant 0 : index
    %8 = vector.load %arg7[%c0_6, %c0_7] : memref<256x128xf32, #tpu.memory_space<vmem>>, vector<256x128xf32>
    tpu.vector_store %arg7[%c0_6, %c0_7], %7 {strides = array<i32>} : memref<256x128xf32, #tpu.memory_space<vmem>>, vector<256x128xf32>,
    %c0_i32_8 = arith.constant 0 : i32
    %9 = arith.cmpi eq, %arg2, %c0_i32_8 : i32
    %10 = arith.extui %9 : i1 to i32
    %c0_i32_9 = arith.constant 0 : i32
    %11 = arith.cmpi ne, %10, %c0_i32_9 : i32
    scf.if %11 {
      %c0_10 = arith.constant 0 : index
      %c0_11 = arith.constant 0 : index
      %12 = vector.load %arg7[%c0_10, %c0_11] : memref<256x128xf32, #tpu.memory_space<vmem>>, vector<256x128xf32>
      %c0_12 = arith.constant 0 : index
      %c0_13 = arith.constant 0 : index
      %13 = vector.load %arg5[%c0_12, %c0_13] : memref<1x128xf32, #tpu.memory_space<vmem>>, vector<1x128xf32>
      %14 = vector.broadcast %13 : vector<1x128xf32> to vector<256x128xf32>
      %15 = arith.addf %12, %14 : vector<256x128xf32>
      %cst_14 = arith.constant 0.000000e+00 : f32
      %16 = vector.broadcast %cst_14 : f32 to vector<256x128xf32>
      %17 = arith.maximumf %15, %16 : vector<256x128xf32>
      %c0_15 = arith.constant 0 : index
      %c0_16 = arith.constant 0 : index
      %18 = vector.load %arg6[%c0_15, %c0_16] : memref<256x128xf32, #tpu.memory_space<vmem>>, vector<256x128xf32>
      tpu.vector_store %arg6[%c0_15, %c0_16], %17 {strides = array<i32>} : memref<256x128xf32, #tpu.memory_space<vmem>>, vector<256x128xf32>,
    } else {
    }
    return
  }
  func.func @transform_0(%arg0: i32, %arg1: i32, %arg2: i32) -> (i32, i32) {
    %c0_i32 = arith.constant 0 : i32
    return %arg0, %arg2 : i32, i32
  }
  func.func @transform_1(%arg0: i32, %arg1: i32, %arg2: i32) -> (i32, i32) {
    %c0_i32 = arith.constant 0 : i32
    return %arg2, %arg1 : i32, i32
  }
  func.func @transform_2(%arg0: i32, %arg1: i32, %arg2: i32) -> (i32, i32) {
    %c0_i32 = arith.constant 0 : i32
    %c0_i32_0 = arith.constant 0 : i32
    return %c0_i32, %arg1 : i32, i32
  }
  func.func @transform_3(%arg0: i32, %arg1: i32, %arg2: i32) -> (i32, i32) {
    %c0_i32 = arith.constant 0 : i32
    return %arg0, %arg1 : i32, i32
  }
}

module attributes {stable_mosaic.version = 11 : i64} {
  func.func @_matmul_kernel(%arg0: i32, %arg1: i32, %arg2: i32, %arg3: memref<16x8xbf16, #tpu.memory_space<vmem>>, %arg4: memref<8x128xbf16, #tpu.memory_space<vmem>>, %arg5: memref<1x128xf32, #tpu.memory_space<vmem>>, %arg6: memref<16x128xf32, #tpu.memory_space<vmem>>, %arg7: memref<16x128xf32, #tpu.memory_space<vmem>>) attributes {dimension_semantics = [#tpu.dimension_semantics<parallel>, #tpu.dimension_semantics<parallel>, #tpu.dimension_semantics<arbitrary>], iteration_bounds = array<i64: 1, 1, 1>, scalar_prefetch = 0 : i64, scratch_operands = 1 : i64, tpu.core_type = #tpu.core_type<tc>, window_params = [{transform_indices = @transform_0, window_bounds = array<i64: 16, 8>}, {transform_indices = @transform_1, window_bounds = array<i64: 8, 128>}, {transform_indices = @transform_2, window_bounds = array<i64: 1, 128>}, {transform_indices = @transform_3, window_bounds = array<i64: 16, 128>}]} {
    %c0_i32 = arith.constant 0 : i32
    %0 = arith.cmpi eq, %arg2, %c0_i32 : i32
    %1 = arith.extui %0 : i1 to i32
    %c0_i32_0 = arith.constant 0 : i32
    %2 = arith.cmpi ne, %1, %c0_i32_0 : i32
    scf.if %2 {
      %cst_10 = arith.constant 0.000000e+00 : f32
      %12 = vector.broadcast %cst_10 : f32 to vector<16x128xf32>
      %c0_11 = arith.constant 0 : index
      %c0_12 = arith.constant 0 : index
      %13 = vector.load %arg7[%c0_11, %c0_12] : memref<16x128xf32, #tpu.memory_space<vmem>>, vector<16x128xf32>
      tpu.vector_store %arg7[%c0_11, %c0_12], %12 {strides = array<i32>} : memref<16x128xf32, #tpu.memory_space<vmem>>, vector<16x128xf32>,
    } else {
    }
    %c0 = arith.constant 0 : index
    %c0_1 = arith.constant 0 : index
    %3 = vector.load %arg7[%c0, %c0_1] : memref<16x128xf32, #tpu.memory_space<vmem>>, vector<16x128xf32>
    %c0_2 = arith.constant 0 : index
    %c0_3 = arith.constant 0 : index
    %4 = vector.load %arg3[%c0_2, %c0_3] : memref<16x8xbf16, #tpu.memory_space<vmem>>, vector<16x8xbf16>
    %c0_4 = arith.constant 0 : index
    %c0_5 = arith.constant 0 : index
    %5 = vector.load %arg4[%c0_4, %c0_5] : memref<8x128xbf16, #tpu.memory_space<vmem>>, vector<8x128xbf16>
    %cst = arith.constant dense<0.000000e+00> : vector<16x128xf32>
    %6 = tpu.matmul %4, %5, %cst {dimension_numbers = #tpu.dot_dimension_numbers<[1], [0], [0], [1], [0, 0, 1, 1], [], []>} : vector<16x8xbf16>, vector<8x128xbf16>, vector<16x128xf32> -> vector<16x128xf32>
    %7 = arith.addf %3, %6 : vector<16x128xf32>
    %c0_6 = arith.constant 0 : index
    %c0_7 = arith.constant 0 : index
    %8 = vector.load %arg7[%c0_6, %c0_7] : memref<16x128xf32, #tpu.memory_space<vmem>>, vector<16x128xf32>
    tpu.vector_store %arg7[%c0_6, %c0_7], %7 {strides = array<i32>} : memref<16x128xf32, #tpu.memory_space<vmem>>, vector<16x128xf32>,
    %c0_i32_8 = arith.constant 0 : i32
    %9 = arith.cmpi eq, %arg2, %c0_i32_8 : i32
    %10 = arith.extui %9 : i1 to i32
    %c0_i32_9 = arith.constant 0 : i32
    %11 = arith.cmpi ne, %10, %c0_i32_9 : i32
    scf.if %11 {
      %c0_10 = arith.constant 0 : index
      %c0_11 = arith.constant 0 : index
      %12 = vector.load %arg7[%c0_10, %c0_11] : memref<16x128xf32, #tpu.memory_space<vmem>>, vector<16x128xf32>
      %c0_12 = arith.constant 0 : index
      %c0_13 = arith.constant 0 : index
      %13 = vector.load %arg5[%c0_12, %c0_13] : memref<1x128xf32, #tpu.memory_space<vmem>>, vector<1x128xf32>
      %14 = vector.broadcast %13 : vector<1x128xf32> to vector<16x128xf32>
      %15 = arith.addf %12, %14 : vector<16x128xf32>
      %c0_14 = arith.constant 0 : index
      %c0_15 = arith.constant 0 : index
      %16 = vector.load %arg6[%c0_14, %c0_15] : memref<16x128xf32, #tpu.memory_space<vmem>>, vector<16x128xf32>
      tpu.vector_store %arg6[%c0_14, %c0_15], %15 {strides = array<i32>} : memref<16x128xf32, #tpu.memory_space<vmem>>, vector<16x128xf32>,
    } else {
    }
    return
  }
  func.func @transform_0(%arg0: i32, %arg1: i32, %arg2: i32) -> (i32, i32) {
    %c0_i32 = arith.constant 0 : i32
    return %arg0, %arg2 : i32, i32
  }
  func.func @transform_1(%arg0: i32, %arg1: i32, %arg2: i32) -> (i32, i32) {
    %c0_i32 = arith.constant 0 : i32
    return %arg2, %arg1 : i32, i32
  }
  func.func @transform_2(%arg0: i32, %arg1: i32, %arg2: i32) -> (i32, i32) {
    %c0_i32 = arith.constant 0 : i32
    %c0_i32_0 = arith.constant 0 : i32
    return %c0_i32, %arg1 : i32, i32
  }
  func.func @transform_3(%arg0: i32, %arg1: i32, %arg2: i32) -> (i32, i32) {
    %c0_i32 = arith.constant 0 : i32
    return %arg0, %arg1 : i32, i32
  }
}

module attributes {stable_mosaic.version = 11 : i64} {
  func.func @_layernorm_kernel(%arg0: i32, %arg1: memref<16x128xf32, #tpu.memory_space<vmem>>, %arg2: memref<1x128xf32, #tpu.memory_space<vmem>>, %arg3: memref<1x128xf32, #tpu.memory_space<vmem>>, %arg4: memref<16x128xbf16, #tpu.memory_space<vmem>>) attributes {dimension_semantics = [#tpu.dimension_semantics<parallel>], iteration_bounds = array<i64: 1>, scalar_prefetch = 0 : i64, scratch_operands = 0 : i64, tpu.core_type = #tpu.core_type<tc>, window_params = [{transform_indices = @transform_0, window_bounds = array<i64: 16, 128>}, {pipeline_mode = #tpu.pipeline_mode<synchronous>, transform_indices = @transform_1, window_bounds = array<i64: 1, 128>}, {pipeline_mode = #tpu.pipeline_mode<synchronous>, transform_indices = @transform_2, window_bounds = array<i64: 1, 128>}, {transform_indices = @transform_3, window_bounds = array<i64: 16, 128>}]} {
    %c0 = arith.constant 0 : index
    %c0_0 = arith.constant 0 : index
    %0 = vector.load %arg1[%c0, %c0_0] : memref<16x128xf32, #tpu.memory_space<vmem>>, vector<16x128xf32>
    %cst = arith.constant dense<0.000000e+00> : vector<16xf32>
    %1 = vector.multi_reduction <add>, %0, %cst [1] : vector<16x128xf32> to vector<16xf32>
    %2 = vector.shape_cast %1 : vector<16xf32> to vector<16x1xf32>
    %cst_1 = arith.constant 1.280000e+02 : f32
    %3 = vector.broadcast %cst_1 : f32 to vector<16x1xf32>
    %4 = arith.divf %2, %3 : vector<16x1xf32>
    %5 = vector.broadcast %4 : vector<16x1xf32> to vector<16x128xf32>
    %6 = arith.subf %0, %5 : vector<16x128xf32>
    %7 = arith.mulf %6, %6 : vector<16x128xf32>
    %cst_2 = arith.constant dense<0.000000e+00> : vector<16xf32>
    %8 = vector.multi_reduction <add>, %7, %cst_2 [1] : vector<16x128xf32> to vector<16xf32>
    %9 = vector.shape_cast %8 : vector<16xf32> to vector<16x1xf32>
    %cst_3 = arith.constant 1.280000e+02 : f32
    %10 = vector.broadcast %cst_3 : f32 to vector<16x1xf32>
    %11 = arith.divf %9, %10 : vector<16x1xf32>
    %12 = vector.broadcast %4 : vector<16x1xf32> to vector<16x128xf32>
    %13 = arith.subf %0, %12 : vector<16x128xf32>
    %cst_4 = arith.constant 9.99999974E-6 : f32
    %14 = vector.broadcast %cst_4 : f32 to vector<16x1xf32>
    %15 = arith.addf %11, %14 : vector<16x1xf32>
    %16 = math.rsqrt %15 : vector<16x1xf32>
    %17 = vector.broadcast %16 : vector<16x1xf32> to vector<16x128xf32>
    %18 = arith.mulf %13, %17 : vector<16x128xf32>
    %c0_5 = arith.constant 0 : index
    %c0_6 = arith.constant 0 : index
    %19 = vector.load %arg2[%c0_5, %c0_6] : memref<1x128xf32, #tpu.memory_space<vmem>>, vector<1x128xf32>
    %20 = vector.broadcast %19 : vector<1x128xf32> to vector<16x128xf32>
    %21 = arith.mulf %18, %20 : vector<16x128xf32>
    %c0_7 = arith.constant 0 : index
    %c0_8 = arith.constant 0 : index
    %22 = vector.load %arg3[%c0_7, %c0_8] : memref<1x128xf32, #tpu.memory_space<vmem>>, vector<1x128xf32>
    %23 = vector.broadcast %22 : vector<1x128xf32> to vector<16x128xf32>
    %24 = arith.addf %21, %23 : vector<16x128xf32>
    %25 = arith.truncf %24 : vector<16x128xf32> to vector<16x128xbf16>
    %c0_9 = arith.constant 0 : index
    %c0_10 = arith.constant 0 : index
    %26 = vector.load %arg4[%c0_9, %c0_10] : memref<16x128xbf16, #tpu.memory_space<vmem>>, vector<16x128xbf16>
    tpu.vector_store %arg4[%c0_9, %c0_10], %25 {strides = array<i32>} : memref<16x128xbf16, #tpu.memory_space<vmem>>, vector<16x128xbf16>,
    return
  }
  func.func @transform_0(%arg0: i32) -> (i32, i32) {
    %c0_i32 = arith.constant 0 : i32
    %c0_i32_0 = arith.constant 0 : i32
    return %arg0, %c0_i32 : i32, i32
  }
  func.func @transform_1(%arg0: i32) -> (i32, i32) {
    %c0_i32 = arith.constant 0 : i32
    %c0_i32_0 = arith.constant 0 : i32
    %c0_i32_1 = arith.constant 0 : i32
    return %c0_i32, %c0_i32_0 : i32, i32
  }
  func.func @transform_2(%arg0: i32) -> (i32, i32) {
    %c0_i32 = arith.constant 0 : i32
    %c0_i32_0 = arith.constant 0 : i32
    %c0_i32_1 = arith.constant 0 : i32
    return %c0_i32, %c0_i32_0 : i32, i32
  }
  func.func @transform_3(%arg0: i32) -> (i32, i32) {
    %c0_i32 = arith.constant 0 : i32
    %c0_i32_0 = arith.constant 0 : i32
    return %arg0, %c0_i32 : i32, i32
  }
}

module attributes {stable_mosaic.version = 11 : i64} {
  func.func @_matmul_kernel(%arg0: i32, %arg1: i32, %arg2: i32, %arg3: memref<16x128xbf16, #tpu.memory_space<vmem>>, %arg4: memref<128x256xbf16, #tpu.memory_space<vmem>>, %arg5: memref<1x256xf32, #tpu.memory_space<vmem>>, %arg6: memref<16x256xbf16, #tpu.memory_space<vmem>>, %arg7: memref<16x256xf32, #tpu.memory_space<vmem>>) attributes {dimension_semantics = [#tpu.dimension_semantics<parallel>, #tpu.dimension_semantics<parallel>, #tpu.dimension_semantics<arbitrary>], iteration_bounds = array<i64: 1, 1, 1>, scalar_prefetch = 0 : i64, scratch_operands = 1 : i64, tpu.core_type = #tpu.core_type<tc>, window_params = [{transform_indices = @transform_0, window_bounds = array<i64: 16, 128>}, {transform_indices = @transform_1, window_bounds = array<i64: 128, 256>}, {transform_indices = @transform_2, window_bounds = array<i64: 1, 256>}, {transform_indices = @transform_3, window_bounds = array<i64: 16, 256>}]} {
    %c0_i32 = arith.constant 0 : i32
    %0 = arith.cmpi eq, %arg2, %c0_i32 : i32
    %1 = arith.extui %0 : i1 to i32
    %c0_i32_0 = arith.constant 0 : i32
    %2 = arith.cmpi ne, %1, %c0_i32_0 : i32
    scf.if %2 {
      %cst_10 = arith.constant 0.000000e+00 : f32
      %12 = vector.broadcast %cst_10 : f32 to vector<16x256xf32>
      %c0_11 = arith.constant 0 : index
      %c0_12 = arith.constant 0 : index
      %13 = vector.load %arg7[%c0_11, %c0_12] : memref<16x256xf32, #tpu.memory_space<vmem>>, vector<16x256xf32>
      tpu.vector_store %arg7[%c0_11, %c0_12], %12 {strides = array<i32>} : memref<16x256xf32, #tpu.memory_space<vmem>>, vector<16x256xf32>,
    } else {
    }
    %c0 = arith.constant 0 : index
    %c0_1 = arith.constant 0 : index
    %3 = vector.load %arg7[%c0, %c0_1] : memref<16x256xf32, #tpu.memory_space<vmem>>, vector<16x256xf32>
    %c0_2 = arith.constant 0 : index
    %c0_3 = arith.constant 0 : index
    %4 = vector.load %arg3[%c0_2, %c0_3] : memref<16x128xbf16, #tpu.memory_space<vmem>>, vector<16x128xbf16>
    %c0_4 = arith.constant 0 : index
    %c0_5 = arith.constant 0 : index
    %5 = vector.load %arg4[%c0_4, %c0_5] : memref<128x256xbf16, #tpu.memory_space<vmem>>, vector<128x256xbf16>
    %cst = arith.constant dense<0.000000e+00> : vector<16x256xf32>
    %6 = tpu.matmul %4, %5, %cst {dimension_numbers = #tpu.dot_dimension_numbers<[1], [0], [0], [1], [0, 0, 1, 1], [], []>} : vector<16x128xbf16>, vector<128x256xbf16>, vector<16x256xf32> -> vector<16x256xf32>
    %7 = arith.addf %3, %6 : vector<16x256xf32>
    %c0_6 = arith.constant 0 : index
    %c0_7 = arith.constant 0 : index
    %8 = vector.load %arg7[%c0_6, %c0_7] : memref<16x256xf32, #tpu.memory_space<vmem>>, vector<16x256xf32>
    tpu.vector_store %arg7[%c0_6, %c0_7], %7 {strides = array<i32>} : memref<16x256xf32, #tpu.memory_space<vmem>>, vector<16x256xf32>,
    %c0_i32_8 = arith.constant 0 : i32
    %9 = arith.cmpi eq, %arg2, %c0_i32_8 : i32
    %10 = arith.extui %9 : i1 to i32
    %c0_i32_9 = arith.constant 0 : i32
    %11 = arith.cmpi ne, %10, %c0_i32_9 : i32
    scf.if %11 {
      %c0_10 = arith.constant 0 : index
      %c0_11 = arith.constant 0 : index
      %12 = vector.load %arg7[%c0_10, %c0_11] : memref<16x256xf32, #tpu.memory_space<vmem>>, vector<16x256xf32>
      %c0_12 = arith.constant 0 : index
      %c0_13 = arith.constant 0 : index
      %13 = vector.load %arg5[%c0_12, %c0_13] : memref<1x256xf32, #tpu.memory_space<vmem>>, vector<1x256xf32>
      %14 = vector.broadcast %13 : vector<1x256xf32> to vector<16x256xf32>
      %15 = arith.addf %12, %14 : vector<16x256xf32>
      %16 = arith.negf %15 : vector<16x256xf32>
      %17 = math.exp %16 : vector<16x256xf32>
      %cst_14 = arith.constant 1.000000e+00 : f32
      %18 = vector.broadcast %cst_14 : f32 to vector<16x256xf32>
      %19 = arith.addf %18, %17 : vector<16x256xf32>
      %20 = arith.divf %18, %19 : vector<16x256xf32>
      %21 = arith.mulf %15, %20 : vector<16x256xf32>
      %22 = arith.truncf %21 : vector<16x256xf32> to vector<16x256xbf16>
      %c0_15 = arith.constant 0 : index
      %c0_16 = arith.constant 0 : index
      %23 = vector.load %arg6[%c0_15, %c0_16] : memref<16x256xbf16, #tpu.memory_space<vmem>>, vector<16x256xbf16>
      tpu.vector_store %arg6[%c0_15, %c0_16], %22 {strides = array<i32>} : memref<16x256xbf16, #tpu.memory_space<vmem>>, vector<16x256xbf16>,
    } else {
    }
    return
  }
  func.func @transform_0(%arg0: i32, %arg1: i32, %arg2: i32) -> (i32, i32) {
    %c0_i32 = arith.constant 0 : i32
    return %arg0, %arg2 : i32, i32
  }
  func.func @transform_1(%arg0: i32, %arg1: i32, %arg2: i32) -> (i32, i32) {
    %c0_i32 = arith.constant 0 : i32
    return %arg2, %arg1 : i32, i32
  }
  func.func @transform_2(%arg0: i32, %arg1: i32, %arg2: i32) -> (i32, i32) {
    %c0_i32 = arith.constant 0 : i32
    %c0_i32_0 = arith.constant 0 : i32
    return %c0_i32, %arg1 : i32, i32
  }
  func.func @transform_3(%arg0: i32, %arg1: i32, %arg2: i32) -> (i32, i32) {
    %c0_i32 = arith.constant 0 : i32
    return %arg0, %arg1 : i32, i32
  }
}

module attributes {stable_mosaic.version = 11 : i64} {
  func.func @_matmul_kernel(%arg0: i32, %arg1: i32, %arg2: i32, %arg3: memref<16x256xbf16, #tpu.memory_space<vmem>>, %arg4: memref<256x128xbf16, #tpu.memory_space<vmem>>, %arg5: memref<1x128xf32, #tpu.memory_space<vmem>>, %arg6: memref<16x128xf32, #tpu.memory_space<vmem>>, %arg7: memref<16x128xf32, #tpu.memory_space<vmem>>, %arg8: memref<16x128xf32, #tpu.memory_space<vmem>>) attributes {dimension_semantics = [#tpu.dimension_semantics<parallel>, #tpu.dimension_semantics<parallel>, #tpu.dimension_semantics<arbitrary>], iteration_bounds = array<i64: 1, 1, 1>, scalar_prefetch = 0 : i64, scratch_operands = 1 : i64, tpu.core_type = #tpu.core_type<tc>, window_params = [{transform_indices = @transform_0, window_bounds = array<i64: 16, 256>}, {transform_indices = @transform_1, window_bounds = array<i64: 256, 128>}, {transform_indices = @transform_2, window_bounds = array<i64: 1, 128>}, {transform_indices = @transform_3, window_bounds = array<i64: 16, 128>}, {transform_indices = @transform_4, window_bounds = array<i64: 16, 128>}]} {
    %c0_i32 = arith.constant 0 : i32
    %0 = arith.cmpi eq, %arg2, %c0_i32 : i32
    %1 = arith.extui %0 : i1 to i32
    %c0_i32_0 = arith.constant 0 : i32
    %2 = arith.cmpi ne, %1, %c0_i32_0 : i32
    scf.if %2 {
      %cst_10 = arith.constant 0.000000e+00 : f32
      %12 = vector.broadcast %cst_10 : f32 to vector<16x128xf32>
      %c0_11 = arith.constant 0 : index
      %c0_12 = arith.constant 0 : index
      %13 = vector.load %arg8[%c0_11, %c0_12] : memref<16x128xf32, #tpu.memory_space<vmem>>, vector<16x128xf32>
      tpu.vector_store %arg8[%c0_11, %c0_12], %12 {strides = array<i32>} : memref<16x128xf32, #tpu.memory_space<vmem>>, vector<16x128xf32>,
    } else {
    }
    %c0 = arith.constant 0 : index
    %c0_1 = arith.constant 0 : index
    %3 = vector.load %arg8[%c0, %c0_1] : memref<16x128xf32, #tpu.memory_space<vmem>>, vector<16x128xf32>
    %c0_2 = arith.constant 0 : index
    %c0_3 = arith.constant 0 : index
    %4 = vector.load %arg3[%c0_2, %c0_3] : memref<16x256xbf16, #tpu.memory_space<vmem>>, vector<16x256xbf16>
    %c0_4 = arith.constant 0 : index
    %c0_5 = arith.constant 0 : index
    %5 = vector.load %arg4[%c0_4, %c0_5] : memref<256x128xbf16, #tpu.memory_space<vmem>>, vector<256x128xbf16>
    %cst = arith.constant dense<0.000000e+00> : vector<16x128xf32>
    %6 = tpu.matmul %4, %5, %cst {dimension_numbers = #tpu.dot_dimension_numbers<[1], [0], [0], [1], [0, 0, 1, 1], [], []>} : vector<16x256xbf16>, vector<256x128xbf16>, vector<16x128xf32> -> vector<16x128xf32>
    %7 = arith.addf %3, %6 : vector<16x128xf32>
    %c0_6 = arith.constant 0 : index
    %c0_7 = arith.constant 0 : index
    %8 = vector.load %arg8[%c0_6, %c0_7] : memref<16x128xf32, #tpu.memory_space<vmem>>, vector<16x128xf32>
    tpu.vector_store %arg8[%c0_6, %c0_7], %7 {strides = array<i32>} : memref<16x128xf32, #tpu.memory_space<vmem>>, vector<16x128xf32>,
    %c0_i32_8 = arith.constant 0 : i32
    %9 = arith.cmpi eq, %arg2, %c0_i32_8 : i32
    %10 = arith.extui %9 : i1 to i32
    %c0_i32_9 = arith.constant 0 : i32
    %11 = arith.cmpi ne, %10, %c0_i32_9 : i32
    scf.if %11 {
      %c0_10 = arith.constant 0 : index
      %c0_11 = arith.constant 0 : index
      %12 = vector.load %arg8[%c0_10, %c0_11] : memref<16x128xf32, #tpu.memory_space<vmem>>, vector<16x128xf32>
      %c0_12 = arith.constant 0 : index
      %c0_13 = arith.constant 0 : index
      %13 = vector.load %arg5[%c0_12, %c0_13] : memref<1x128xf32, #tpu.memory_space<vmem>>, vector<1x128xf32>
      %14 = vector.broadcast %13 : vector<1x128xf32> to vector<16x128xf32>
      %15 = arith.addf %12, %14 : vector<16x128xf32>
      %cst_14 = arith.constant 5.000000e-01 : f32
      %16 = vector.broadcast %cst_14 : f32 to vector<16x128xf32>
      %17 = arith.mulf %15, %16 : vector<16x128xf32>
      %c0_15 = arith.constant 0 : index
      %c0_16 = arith.constant 0 : index
      %18 = vector.load %arg6[%c0_15, %c0_16] : memref<16x128xf32, #tpu.memory_space<vmem>>, vector<16x128xf32>
      %19 = arith.addf %17, %18 : vector<16x128xf32>
      %c0_17 = arith.constant 0 : index
      %c0_18 = arith.constant 0 : index
      %20 = vector.load %arg7[%c0_17, %c0_18] : memref<16x128xf32, #tpu.memory_space<vmem>>, vector<16x128xf32>
      tpu.vector_store %arg7[%c0_17, %c0_18], %19 {strides = array<i32>} : memref<16x128xf32, #tpu.memory_space<vmem>>, vector<16x128xf32>,
    } else {
    }
    return
  }
  func.func @transform_0(%arg0: i32, %arg1: i32, %arg2: i32) -> (i32, i32) {
    %c0_i32 = arith.constant 0 : i32
    return %arg0, %arg2 : i32, i32
  }
  func.func @transform_1(%arg0: i32, %arg1: i32, %arg2: i32) -> (i32, i32) {
    %c0_i32 = arith.constant 0 : i32
    return %arg2, %arg1 : i32, i32
  }
  func.func @transform_2(%arg0: i32, %arg1: i32, %arg2: i32) -> (i32, i32) {
    %c0_i32 = arith.constant 0 : i32
    %c0_i32_0 = arith.constant 0 : i32
    return %c0_i32, %arg1 : i32, i32
  }
  func.func @transform_3(%arg0: i32, %arg1: i32, %arg2: i32) -> (i32, i32) {
    %c0_i32 = arith.constant 0 : i32
    return %arg0, %arg1 : i32, i32
  }
  func.func @transform_4(%arg0: i32, %arg1: i32, %arg2: i32) -> (i32, i32) {
    %c0_i32 = arith.constant 0 : i32
    return %arg0, %arg1 : i32, i32
  }
}

module attributes {stable_mosaic.version = 11 : i64} {
  func.func @_matmul_kernel(%arg0: i32, %arg1: i32, %arg2: i32, %arg3: memref<16x128xbf16, #tpu.memory_space<vmem>>, %arg4: memref<128x128xbf16, #tpu.memory_space<vmem>>, %arg5: memref<1x128xf32, #tpu.memory_space<vmem>>, %arg6: memref<16x128xbf16, #tpu.memory_space<vmem>>, %arg7: memref<16x128xf32, #tpu.memory_space<vmem>>) attributes {dimension_semantics = [#tpu.dimension_semantics<parallel>, #tpu.dimension_semantics<parallel>, #tpu.dimension_semantics<arbitrary>], iteration_bounds = array<i64: 1, 3, 1>, scalar_prefetch = 0 : i64, scratch_operands = 1 : i64, tpu.core_type = #tpu.core_type<tc>, window_params = [{transform_indices = @transform_0, window_bounds = array<i64: 16, 128>}, {transform_indices = @transform_1, window_bounds = array<i64: 128, 128>}, {transform_indices = @transform_2, window_bounds = array<i64: 1, 128>}, {transform_indices = @transform_3, window_bounds = array<i64: 16, 128>}]} {
    %c0_i32 = arith.constant 0 : i32
    %0 = arith.cmpi eq, %arg2, %c0_i32 : i32
    %1 = arith.extui %0 : i1 to i32
    %c0_i32_0 = arith.constant 0 : i32
    %2 = arith.cmpi ne, %1, %c0_i32_0 : i32
    scf.if %2 {
      %cst_10 = arith.constant 0.000000e+00 : f32
      %12 = vector.broadcast %cst_10 : f32 to vector<16x128xf32>
      %c0_11 = arith.constant 0 : index
      %c0_12 = arith.constant 0 : index
      %13 = vector.load %arg7[%c0_11, %c0_12] : memref<16x128xf32, #tpu.memory_space<vmem>>, vector<16x128xf32>
      tpu.vector_store %arg7[%c0_11, %c0_12], %12 {strides = array<i32>} : memref<16x128xf32, #tpu.memory_space<vmem>>, vector<16x128xf32>,
    } else {
    }
    %c0 = arith.constant 0 : index
    %c0_1 = arith.constant 0 : index
    %3 = vector.load %arg7[%c0, %c0_1] : memref<16x128xf32, #tpu.memory_space<vmem>>, vector<16x128xf32>
    %c0_2 = arith.constant 0 : index
    %c0_3 = arith.constant 0 : index
    %4 = vector.load %arg3[%c0_2, %c0_3] : memref<16x128xbf16, #tpu.memory_space<vmem>>, vector<16x128xbf16>
    %c0_4 = arith.constant 0 : index
    %c0_5 = arith.constant 0 : index
    %5 = vector.load %arg4[%c0_4, %c0_5] : memref<128x128xbf16, #tpu.memory_space<vmem>>, vector<128x128xbf16>
    %cst = arith.constant dense<0.000000e+00> : vector<16x128xf32>
    %6 = tpu.matmul %4, %5, %cst {dimension_numbers = #tpu.dot_dimension_numbers<[1], [0], [0], [1], [0, 0, 1, 1], [], []>} : vector<16x128xbf16>, vector<128x128xbf16>, vector<16x128xf32> -> vector<16x128xf32>
    %7 = arith.addf %3, %6 : vector<16x128xf32>
    %c0_6 = arith.constant 0 : index
    %c0_7 = arith.constant 0 : index
    %8 = vector.load %arg7[%c0_6, %c0_7] : memref<16x128xf32, #tpu.memory_space<vmem>>, vector<16x128xf32>
    tpu.vector_store %arg7[%c0_6, %c0_7], %7 {strides = array<i32>} : memref<16x128xf32, #tpu.memory_space<vmem>>, vector<16x128xf32>,
    %c0_i32_8 = arith.constant 0 : i32
    %9 = arith.cmpi eq, %arg2, %c0_i32_8 : i32
    %10 = arith.extui %9 : i1 to i32
    %c0_i32_9 = arith.constant 0 : i32
    %11 = arith.cmpi ne, %10, %c0_i32_9 : i32
    scf.if %11 {
      %c0_10 = arith.constant 0 : index
      %c0_11 = arith.constant 0 : index
      %12 = vector.load %arg7[%c0_10, %c0_11] : memref<16x128xf32, #tpu.memory_space<vmem>>, vector<16x128xf32>
      %c0_12 = arith.constant 0 : index
      %c0_13 = arith.constant 0 : index
      %13 = vector.load %arg5[%c0_12, %c0_13] : memref<1x128xf32, #tpu.memory_space<vmem>>, vector<1x128xf32>
      %14 = vector.broadcast %13 : vector<1x128xf32> to vector<16x128xf32>
      %15 = arith.addf %12, %14 : vector<16x128xf32>
      %16 = arith.truncf %15 : vector<16x128xf32> to vector<16x128xbf16>
      %c0_14 = arith.constant 0 : index
      %c0_15 = arith.constant 0 : index
      %17 = vector.load %arg6[%c0_14, %c0_15] : memref<16x128xbf16, #tpu.memory_space<vmem>>, vector<16x128xbf16>
      tpu.vector_store %arg6[%c0_14, %c0_15], %16 {strides = array<i32>} : memref<16x128xbf16, #tpu.memory_space<vmem>>, vector<16x128xbf16>,
    } else {
    }
    return
  }
  func.func @transform_0(%arg0: i32, %arg1: i32, %arg2: i32) -> (i32, i32) {
    %c0_i32 = arith.constant 0 : i32
    return %arg0, %arg2 : i32, i32
  }
  func.func @transform_1(%arg0: i32, %arg1: i32, %arg2: i32) -> (i32, i32) {
    %c0_i32 = arith.constant 0 : i32
    return %arg2, %arg1 : i32, i32
  }
  func.func @transform_2(%arg0: i32, %arg1: i32, %arg2: i32) -> (i32, i32) {
    %c0_i32 = arith.constant 0 : i32
    %c0_i32_0 = arith.constant 0 : i32
    return %c0_i32, %arg1 : i32, i32
  }
  func.func @transform_3(%arg0: i32, %arg1: i32, %arg2: i32) -> (i32, i32) {
    %c0_i32 = arith.constant 0 : i32
    return %arg0, %arg1 : i32, i32
  }
}

module attributes {stable_mosaic.version = 11 : i64} {
  func.func @_attention_kernel(%arg0: i32, %arg1: memref<8x8x32xbf16, #tpu.memory_space<vmem>>, %arg2: memref<8x8x32xbf16, #tpu.memory_space<vmem>>, %arg3: memref<8x8x32xbf16, #tpu.memory_space<vmem>>, %arg4: memref<8x8x32xbf16, #tpu.memory_space<vmem>>) attributes {dimension_semantics = [#tpu.dimension_semantics<parallel>], iteration_bounds = array<i64: 1>, scalar_prefetch = 0 : i64, scratch_operands = 0 : i64, tpu.core_type = #tpu.core_type<tc>, window_params = [{transform_indices = @transform_0, window_bounds = array<i64: 8, 8, 32>}, {transform_indices = @transform_1, window_bounds = array<i64: 8, 8, 32>}, {transform_indices = @transform_2, window_bounds = array<i64: 8, 8, 32>}, {transform_indices = @transform_3, window_bounds = array<i64: 8, 8, 32>}]} {
    %c0 = arith.constant 0 : index
    %c0_0 = arith.constant 0 : index
    %c0_1 = arith.constant 0 : index
    %0 = vector.load %arg1[%c0, %c0_0, %c0_1] : memref<8x8x32xbf16, #tpu.memory_space<vmem>>, vector<8x8x32xbf16>
    %c0_2 = arith.constant 0 : index
    %c0_3 = arith.constant 0 : index
    %c0_4 = arith.constant 0 : index
    %1 = vector.load %arg2[%c0_2, %c0_3, %c0_4] : memref<8x8x32xbf16, #tpu.memory_space<vmem>>, vector<8x8x32xbf16>
    %c0_5 = arith.constant 0 : index
    %c0_6 = arith.constant 0 : index
    %c0_7 = arith.constant 0 : index
    %2 = vector.load %arg3[%c0_5, %c0_6, %c0_7] : memref<8x8x32xbf16, #tpu.memory_space<vmem>>, vector<8x8x32xbf16>
    "tpu.trace_start"() <{level = 10 : i32, message = "htd,hkd->htk"}> : () -> ()
    %cst = arith.constant dense<0.000000e+00> : vector<8x8x8xf32>
    %3 = tpu.matmul %0, %1, %cst {dimension_numbers = #tpu.dot_dimension_numbers<[2], [2], [1], [1], [0, 0, 0, 1, 1, 1], [0], [0]>} : vector<8x8x32xbf16>, vector<8x8x32xbf16>, vector<8x8x8xf32> -> vector<8x8x8xf32>
    "tpu.trace_stop"() : () -> ()
    %cst_8 = arith.constant 0.176776692 : f32
    %4 = vector.broadcast %cst_8 : f32 to vector<8x8x8xf32>
    %5 = arith.mulf %3, %4 : vector<8x8x8xf32>
    %cst_9 = arith.constant dense<0xFF800000> : vector<8x8xf32>
    %6 = vector.multi_reduction <maximumf>, %5, %cst_9 [2] : vector<8x8x8xf32> to vector<8x8xf32>
    %7 = vector.shape_cast %6 : vector<8x8xf32> to vector<8x8x1xf32>
    %8 = vector.broadcast %7 : vector<8x8x1xf32> to vector<8x8x8xf32>
    %9 = arith.subf %5, %8 : vector<8x8x8xf32>
    %10 = math.exp %9 : vector<8x8x8xf32>
    %cst_10 = arith.constant dense<0.000000e+00> : vector<8x8xf32>
    %11 = vector.multi_reduction <add>, %10, %cst_10 [2] : vector<8x8x8xf32> to vector<8x8xf32>
    %12 = vector.shape_cast %11 : vector<8x8xf32> to vector<8x8x1xf32>
    %13 = tpu.reciprocal %12 {approx = true} : vector<8x8x1xf32> -> vector<8x8x1xf32>
    %14 = vector.broadcast %13 : vector<8x8x1xf32> to vector<8x8x8xf32>
    %15 = arith.mulf %10, %14 : vector<8x8x8xf32>
    %16 = arith.truncf %15 : vector<8x8x8xf32> to vector<8x8x8xbf16>
    "tpu.trace_start"() <{level = 10 : i32, message = "htk,hkd->htd"}> : () -> ()
    %cst_11 = arith.constant dense<0.000000e+00> : vector<8x8x32xf32>
    %17 = tpu.matmul %16, %2, %cst_11 {dimension_numbers = #tpu.dot_dimension_numbers<[2], [1], [1], [2], [0, 0, 0, 1, 1, 2], [0], [0]>} : vector<8x8x8xbf16>, vector<8x8x32xbf16>, vector<8x8x32xf32> -> vector<8x8x32xf32>
    "tpu.trace_stop"() : () -> ()
    %18 = arith.truncf %17 : vector<8x8x32xf32> to vector<8x8x32xbf16>
    %c0_12 = arith.constant 0 : index
    %c0_13 = arith.constant 0 : index
    %c0_14 = arith.constant 0 : index
    %19 = vector.load %arg4[%c0_12, %c0_13, %c0_14] : memref<8x8x32xbf16, #tpu.memory_space<vmem>>, vector<8x8x32xbf16>
    tpu.vector_store %arg4[%c0_12, %c0_13, %c0_14], %18 {strides = array<i32>} : memref<8x8x32xbf16, #tpu.memory_space<vmem>>, vector<8x8x32xbf16>,
    return
  }
  func.func @transform_0(%arg0: i32) -> (i32, i32, i32) {
    %c0_i32 = arith.constant 0 : i32
    %c0_i32_0 = arith.constant 0 : i32
    %c0_i32_1 = arith.constant 0 : i32
    return %arg0, %c0_i32, %c0_i32_0 : i32, i32, i32
  }
  func.func @transform_1(%arg0: i32) -> (i32, i32, i32) {
    %c0_i32 = arith.constant 0 : i32
    %c0_i32_0 = arith.constant 0 : i32
    %c0_i32_1 = arith.constant 0 : i32
    return %arg0, %c0_i32, %c0_i32_0 : i32, i32, i32
  }
  func.func @transform_2(%arg0: i32) -> (i32, i32, i32) {
    %c0_i32 = arith.constant 0 : i32
    %c0_i32_0 = arith.constant 0 : i32
    %c0_i32_1 = arith.constant 0 : i32
    return %arg0, %c0_i32, %c0_i32_0 : i32, i32, i32
  }
  func.func @transform_3(%arg0: i32) -> (i32, i32, i32) {
    %c0_i32 = arith.constant 0 : i32
    %c0_i32_0 = arith.constant 0 : i32
    %c0_i32_1 = arith.constant 0 : i32
    return %arg0, %c0_i32, %c0_i32_0 : i32, i32, i32
  }
}

module attributes {stable_mosaic.version = 11 : i64} {
  func.func @_matmul_kernel(%arg0: i32, %arg1: i32, %arg2: i32, %arg3: memref<16x128xbf16, #tpu.memory_space<vmem>>, %arg4: memref<128x128xbf16, #tpu.memory_space<vmem>>, %arg5: memref<1x128xf32, #tpu.memory_space<vmem>>, %arg6: memref<16x128xf32, #tpu.memory_space<vmem>>, %arg7: memref<16x128xf32, #tpu.memory_space<vmem>>, %arg8: memref<16x128xf32, #tpu.memory_space<vmem>>) attributes {dimension_semantics = [#tpu.dimension_semantics<parallel>, #tpu.dimension_semantics<parallel>, #tpu.dimension_semantics<arbitrary>], iteration_bounds = array<i64: 1, 1, 1>, scalar_prefetch = 0 : i64, scratch_operands = 1 : i64, tpu.core_type = #tpu.core_type<tc>, window_params = [{transform_indices = @transform_0, window_bounds = array<i64: 16, 128>}, {transform_indices = @transform_1, window_bounds = array<i64: 128, 128>}, {transform_indices = @transform_2, window_bounds = array<i64: 1, 128>}, {transform_indices = @transform_3, window_bounds = array<i64: 16, 128>}, {transform_indices = @transform_4, window_bounds = array<i64: 16, 128>}]} {
    %c0_i32 = arith.constant 0 : i32
    %0 = arith.cmpi eq, %arg2, %c0_i32 : i32
    %1 = arith.extui %0 : i1 to i32
    %c0_i32_0 = arith.constant 0 : i32
    %2 = arith.cmpi ne, %1, %c0_i32_0 : i32
    scf.if %2 {
      %cst_10 = arith.constant 0.000000e+00 : f32
      %12 = vector.broadcast %cst_10 : f32 to vector<16x128xf32>
      %c0_11 = arith.constant 0 : index
      %c0_12 = arith.constant 0 : index
      %13 = vector.load %arg8[%c0_11, %c0_12] : memref<16x128xf32, #tpu.memory_space<vmem>>, vector<16x128xf32>
      tpu.vector_store %arg8[%c0_11, %c0_12], %12 {strides = array<i32>} : memref<16x128xf32, #tpu.memory_space<vmem>>, vector<16x128xf32>,
    } else {
    }
    %c0 = arith.constant 0 : index
    %c0_1 = arith.constant 0 : index
    %3 = vector.load %arg8[%c0, %c0_1] : memref<16x128xf32, #tpu.memory_space<vmem>>, vector<16x128xf32>
    %c0_2 = arith.constant 0 : index
    %c0_3 = arith.constant 0 : index
    %4 = vector.load %arg3[%c0_2, %c0_3] : memref<16x128xbf16, #tpu.memory_space<vmem>>, vector<16x128xbf16>
    %c0_4 = arith.constant 0 : index
    %c0_5 = arith.constant 0 : index
    %5 = vector.load %arg4[%c0_4, %c0_5] : memref<128x128xbf16, #tpu.memory_space<vmem>>, vector<128x128xbf16>
    %cst = arith.constant dense<0.000000e+00> : vector<16x128xf32>
    %6 = tpu.matmul %4, %5, %cst {dimension_numbers = #tpu.dot_dimension_numbers<[1], [0], [0], [1], [0, 0, 1, 1], [], []>} : vector<16x128xbf16>, vector<128x128xbf16>, vector<16x128xf32> -> vector<16x128xf32>
    %7 = arith.addf %3, %6 : vector<16x128xf32>
    %c0_6 = arith.constant 0 : index
    %c0_7 = arith.constant 0 : index
    %8 = vector.load %arg8[%c0_6, %c0_7] : memref<16x128xf32, #tpu.memory_space<vmem>>, vector<16x128xf32>
    tpu.vector_store %arg8[%c0_6, %c0_7], %7 {strides = array<i32>} : memref<16x128xf32, #tpu.memory_space<vmem>>, vector<16x128xf32>,
    %c0_i32_8 = arith.constant 0 : i32
    %9 = arith.cmpi eq, %arg2, %c0_i32_8 : i32
    %10 = arith.extui %9 : i1 to i32
    %c0_i32_9 = arith.constant 0 : i32
    %11 = arith.cmpi ne, %10, %c0_i32_9 : i32
    scf.if %11 {
      %c0_10 = arith.constant 0 : index
      %c0_11 = arith.constant 0 : index
      %12 = vector.load %arg8[%c0_10, %c0_11] : memref<16x128xf32, #tpu.memory_space<vmem>>, vector<16x128xf32>
      %c0_12 = arith.constant 0 : index
      %c0_13 = arith.constant 0 : index
      %13 = vector.load %arg5[%c0_12, %c0_13] : memref<1x128xf32, #tpu.memory_space<vmem>>, vector<1x128xf32>
      %14 = vector.broadcast %13 : vector<1x128xf32> to vector<16x128xf32>
      %15 = arith.addf %12, %14 : vector<16x128xf32>
      %c0_14 = arith.constant 0 : index
      %c0_15 = arith.constant 0 : index
      %16 = vector.load %arg6[%c0_14, %c0_15] : memref<16x128xf32, #tpu.memory_space<vmem>>, vector<16x128xf32>
      %17 = arith.addf %15, %16 : vector<16x128xf32>
      %c0_16 = arith.constant 0 : index
      %c0_17 = arith.constant 0 : index
      %18 = vector.load %arg7[%c0_16, %c0_17] : memref<16x128xf32, #tpu.memory_space<vmem>>, vector<16x128xf32>
      tpu.vector_store %arg7[%c0_16, %c0_17], %17 {strides = array<i32>} : memref<16x128xf32, #tpu.memory_space<vmem>>, vector<16x128xf32>,
    } else {
    }
    return
  }
  func.func @transform_0(%arg0: i32, %arg1: i32, %arg2: i32) -> (i32, i32) {
    %c0_i32 = arith.constant 0 : i32
    return %arg0, %arg2 : i32, i32
  }
  func.func @transform_1(%arg0: i32, %arg1: i32, %arg2: i32) -> (i32, i32) {
    %c0_i32 = arith.constant 0 : i32
    return %arg2, %arg1 : i32, i32
  }
  func.func @transform_2(%arg0: i32, %arg1: i32, %arg2: i32) -> (i32, i32) {
    %c0_i32 = arith.constant 0 : i32
    %c0_i32_0 = arith.constant 0 : i32
    return %c0_i32, %arg1 : i32, i32
  }
  func.func @transform_3(%arg0: i32, %arg1: i32, %arg2: i32) -> (i32, i32) {
    %c0_i32 = arith.constant 0 : i32
    return %arg0, %arg1 : i32, i32
  }
  func.func @transform_4(%arg0: i32, %arg1: i32, %arg2: i32) -> (i32, i32) {
    %c0_i32 = arith.constant 0 : i32
    return %arg0, %arg1 : i32, i32
  }
}

module attributes {stable_mosaic.version = 11 : i64} {
  func.func @_matmul_kernel(%arg0: i32, %arg1: i32, %arg2: i32, %arg3: memref<16x128xbf16, #tpu.memory_space<vmem>>, %arg4: memref<128x256xbf16, #tpu.memory_space<vmem>>, %arg5: memref<1x256xf32, #tpu.memory_space<vmem>>, %arg6: memref<16x128xbf16, #tpu.memory_space<vmem>>, %arg7: memref<16x256xf32, #tpu.memory_space<vmem>>) attributes {dimension_semantics = [#tpu.dimension_semantics<parallel>, #tpu.dimension_semantics<parallel>, #tpu.dimension_semantics<arbitrary>], iteration_bounds = array<i64: 1, 1, 1>, scalar_prefetch = 0 : i64, scratch_operands = 1 : i64, tpu.core_type = #tpu.core_type<tc>, window_params = [{transform_indices = @transform_0, window_bounds = array<i64: 16, 128>}, {transform_indices = @transform_1, window_bounds = array<i64: 128, 256>}, {transform_indices = @transform_2, window_bounds = array<i64: 1, 256>}, {transform_indices = @transform_3, window_bounds = array<i64: 16, 128>}]} {
    %c0_i32 = arith.constant 0 : i32
    %0 = arith.cmpi eq, %arg2, %c0_i32 : i32
    %1 = arith.extui %0 : i1 to i32
    %c0_i32_0 = arith.constant 0 : i32
    %2 = arith.cmpi ne, %1, %c0_i32_0 : i32
    scf.if %2 {
      %cst_10 = arith.constant 0.000000e+00 : f32
      %12 = vector.broadcast %cst_10 : f32 to vector<16x256xf32>
      %c0_11 = arith.constant 0 : index
      %c0_12 = arith.constant 0 : index
      %13 = vector.load %arg7[%c0_11, %c0_12] : memref<16x256xf32, #tpu.memory_space<vmem>>, vector<16x256xf32>
      tpu.vector_store %arg7[%c0_11, %c0_12], %12 {strides = array<i32>} : memref<16x256xf32, #tpu.memory_space<vmem>>, vector<16x256xf32>,
    } else {
    }
    %c0 = arith.constant 0 : index
    %c0_1 = arith.constant 0 : index
    %3 = vector.load %arg7[%c0, %c0_1] : memref<16x256xf32, #tpu.memory_space<vmem>>, vector<16x256xf32>
    %c0_2 = arith.constant 0 : index
    %c0_3 = arith.constant 0 : index
    %4 = vector.load %arg3[%c0_2, %c0_3] : memref<16x128xbf16, #tpu.memory_space<vmem>>, vector<16x128xbf16>
    %c0_4 = arith.constant 0 : index
    %c0_5 = arith.constant 0 : index
    %5 = vector.load %arg4[%c0_4, %c0_5] : memref<128x256xbf16, #tpu.memory_space<vmem>>, vector<128x256xbf16>
    %cst = arith.constant dense<0.000000e+00> : vector<16x256xf32>
    %6 = tpu.matmul %4, %5, %cst {dimension_numbers = #tpu.dot_dimension_numbers<[1], [0], [0], [1], [0, 0, 1, 1], [], []>} : vector<16x128xbf16>, vector<128x256xbf16>, vector<16x256xf32> -> vector<16x256xf32>
    %7 = arith.addf %3, %6 : vector<16x256xf32>
    %c0_6 = arith.constant 0 : index
    %c0_7 = arith.constant 0 : index
    %8 = vector.load %arg7[%c0_6, %c0_7] : memref<16x256xf32, #tpu.memory_space<vmem>>, vector<16x256xf32>
    tpu.vector_store %arg7[%c0_6, %c0_7], %7 {strides = array<i32>} : memref<16x256xf32, #tpu.memory_space<vmem>>, vector<16x256xf32>,
    %c0_i32_8 = arith.constant 0 : i32
    %9 = arith.cmpi eq, %arg2, %c0_i32_8 : i32
    %10 = arith.extui %9 : i1 to i32
    %c0_i32_9 = arith.constant 0 : i32
    %11 = arith.cmpi ne, %10, %c0_i32_9 : i32
    scf.if %11 {
      %c0_10 = arith.constant 0 : index
      %c0_11 = arith.constant 0 : index
      %12 = vector.load %arg7[%c0_10, %c0_11] : memref<16x256xf32, #tpu.memory_space<vmem>>, vector<16x256xf32>
      %c0_12 = arith.constant 0 : index
      %c0_13 = arith.constant 0 : index
      %13 = vector.load %arg5[%c0_12, %c0_13] : memref<1x256xf32, #tpu.memory_space<vmem>>, vector<1x256xf32>
      %14 = vector.broadcast %13 : vector<1x256xf32> to vector<16x256xf32>
      %15 = arith.addf %12, %14 : vector<16x256xf32>
      %16 = vector.extract_strided_slice %15 {offsets = [0, 0], sizes = [16, 128], strides = [1, 1]} : vector<16x256xf32> to vector<16x128xf32>
      %17 = vector.extract_strided_slice %15 {offsets = [0, 128], sizes = [16, 128], strides = [1, 1]} : vector<16x256xf32> to vector<16x128xf32>
      %18 = arith.negf %17 : vector<16x128xf32>
      %19 = math.exp %18 : vector<16x128xf32>
      %cst_14 = arith.constant 1.000000e+00 : f32
      %20 = vector.broadcast %cst_14 : f32 to vector<16x128xf32>
      %21 = arith.addf %20, %19 : vector<16x128xf32>
      %22 = arith.divf %20, %21 : vector<16x128xf32>
      %23 = arith.mulf %16, %22 : vector<16x128xf32>
      %24 = arith.truncf %23 : vector<16x128xf32> to vector<16x128xbf16>
      %c0_15 = arith.constant 0 : index
      %c0_16 = arith.constant 0 : index
      %25 = vector.load %arg6[%c0_15, %c0_16] : memref<16x128xbf16, #tpu.memory_space<vmem>>, vector<16x128xbf16>
      tpu.vector_store %arg6[%c0_15, %c0_16], %24 {strides = array<i32>} : memref<16x128xbf16, #tpu.memory_space<vmem>>, vector<16x128xbf16>,
    } else {
    }
    return
  }
  func.func @transform_0(%arg0: i32, %arg1: i32, %arg2: i32) -> (i32, i32) {
    %c0_i32 = arith.constant 0 : i32
    return %arg0, %arg2 : i32, i32
  }
  func.func @transform_1(%arg0: i32, %arg1: i32, %arg2: i32) -> (i32, i32) {
    %c0_i32 = arith.constant 0 : i32
    return %arg2, %arg1 : i32, i32
  }
  func.func @transform_2(%arg0: i32, %arg1: i32, %arg2: i32) -> (i32, i32) {
    %c0_i32 = arith.constant 0 : i32
    %c0_i32_0 = arith.constant 0 : i32
    return %c0_i32, %arg1 : i32, i32
  }
  func.func @transform_3(%arg0: i32, %arg1: i32, %arg2: i32) -> (i32, i32) {
    %c0_i32 = arith.constant 0 : i32
    return %arg0, %arg1 : i32, i32
  }
}

module attributes {stable_mosaic.version = 11 : i64} {
  func.func @_dwconv_bn_silu_kernel(%arg0: i32, %arg1: memref<1x14x128xbf16, #tpu.memory_space<vmem>>, %arg2: memref<7x128xf32, #tpu.memory_space<vmem>>, %arg3: memref<1x128xf32, #tpu.memory_space<vmem>>, %arg4: memref<1x128xf32, #tpu.memory_space<vmem>>, %arg5: memref<1x128xf32, #tpu.memory_space<vmem>>, %arg6: memref<1x8x128xbf16, #tpu.memory_space<vmem>>) attributes {dimension_semantics = [#tpu.dimension_semantics<parallel>], iteration_bounds = array<i64: 2>, scalar_prefetch = 0 : i64, scratch_operands = 0 : i64, tpu.core_type = #tpu.core_type<tc>, window_params = [{transform_indices = @transform_0, window_bounds = array<i64: 1, 14, 128>}, {pipeline_mode = #tpu.pipeline_mode<synchronous>, transform_indices = @transform_1, window_bounds = array<i64: 7, 128>}, {pipeline_mode = #tpu.pipeline_mode<synchronous>, transform_indices = @transform_2, window_bounds = array<i64: 1, 128>}, {pipeline_mode = #tpu.pipeline_mode<synchronous>, transform_indices = @transform_3, window_bounds = array<i64: 1, 128>}, {pipeline_mode = #tpu.pipeline_mode<synchronous>, transform_indices = @transform_4, window_bounds = array<i64: 1, 128>}, {transform_indices = @transform_5, window_bounds = array<i64: 1, 8, 128>}]} {
    %c0 = arith.constant 0 : index
    %c0_0 = arith.constant 0 : index
    %c0_1 = arith.constant 0 : index
    %0 = vector.load %arg1[%c0, %c0_0, %c0_1] : memref<1x14x128xbf16, #tpu.memory_space<vmem>>, vector<1x14x128xbf16>
    %1 = vector.shape_cast %0 : vector<1x14x128xbf16> to vector<14x128xbf16>
    %2 = arith.extf %1 : vector<14x128xbf16> to vector<14x128xf32>
    %c0_2 = arith.constant 0 : index
    %c0_3 = arith.constant 0 : index
    %3 = vector.load %arg2[%c0_2, %c0_3] : memref<7x128xf32, #tpu.memory_space<vmem>>, vector<7x128xf32>
    %4 = vector.extract_strided_slice %2 {offsets = [0, 0], sizes = [8, 128], strides = [1, 1]} : vector<14x128xf32> to vector<8x128xf32>
    %5 = vector.extract_strided_slice %3 {offsets = [0, 0], sizes = [1, 128], strides = [1, 1]} : vector<7x128xf32> to vector<1x128xf32>
    %6 = vector.broadcast %5 : vector<1x128xf32> to vector<8x128xf32>
    %7 = arith.mulf %4, %6 : vector<8x128xf32>
    %8 = vector.extract_strided_slice %2 {offsets = [1, 0], sizes = [8, 128], strides = [1, 1]} : vector<14x128xf32> to vector<8x128xf32>
    %9 = vector.extract_strided_slice %3 {offsets = [1, 0], sizes = [1, 128], strides = [1, 1]} : vector<7x128xf32> to vector<1x128xf32>
    %10 = vector.broadcast %9 : vector<1x128xf32> to vector<8x128xf32>
    %11 = arith.mulf %8, %10 : vector<8x128xf32>
    %12 = arith.addf %7, %11 : vector<8x128xf32>
    %13 = vector.extract_strided_slice %2 {offsets = [2, 0], sizes = [8, 128], strides = [1, 1]} : vector<14x128xf32> to vector<8x128xf32>
    %14 = vector.extract_strided_slice %3 {offsets = [2, 0], sizes = [1, 128], strides = [1, 1]} : vector<7x128xf32> to vector<1x128xf32>
    %15 = vector.broadcast %14 : vector<1x128xf32> to vector<8x128xf32>
    %16 = arith.mulf %13, %15 : vector<8x128xf32>
    %17 = arith.addf %12, %16 : vector<8x128xf32>
    %18 = vector.extract_strided_slice %2 {offsets = [3, 0], sizes = [8, 128], strides = [1, 1]} : vector<14x128xf32> to vector<8x128xf32>
    %19 = vector.extract_strided_slice %3 {offsets = [3, 0], sizes = [1, 128], strides = [1, 1]} : vector<7x128xf32> to vector<1x128xf32>
    %20 = vector.broadcast %19 : vector<1x128xf32> to vector<8x128xf32>
    %21 = arith.mulf %18, %20 : vector<8x128xf32>
    %22 = arith.addf %17, %21 : vector<8x128xf32>
    %23 = vector.extract_strided_slice %2 {offsets = [4, 0], sizes = [8, 128], strides = [1, 1]} : vector<14x128xf32> to vector<8x128xf32>
    %24 = vector.extract_strided_slice %3 {offsets = [4, 0], sizes = [1, 128], strides = [1, 1]} : vector<7x128xf32> to vector<1x128xf32>
    %25 = vector.broadcast %24 : vector<1x128xf32> to vector<8x128xf32>
    %26 = arith.mulf %23, %25 : vector<8x128xf32>
    %27 = arith.addf %22, %26 : vector<8x128xf32>
    %28 = vector.extract_strided_slice %2 {offsets = [5, 0], sizes = [8, 128], strides = [1, 1]} : vector<14x128xf32> to vector<8x128xf32>
    %29 = vector.extract_strided_slice %3 {offsets = [5, 0], sizes = [1, 128], strides = [1, 1]} : vector<7x128xf32> to vector<1x128xf32>
    %30 = vector.broadcast %29 : vector<1x128xf32> to vector<8x128xf32>
    %31 = arith.mulf %28, %30 : vector<8x128xf32>
    %32 = arith.addf %27, %31 : vector<8x128xf32>
    %33 = vector.extract_strided_slice %2 {offsets = [6, 0], sizes = [8, 128], strides = [1, 1]} : vector<14x128xf32> to vector<8x128xf32>
    %34 = vector.extract_strided_slice %3 {offsets = [6, 0], sizes = [1, 128], strides = [1, 1]} : vector<7x128xf32> to vector<1x128xf32>
    %35 = vector.broadcast %34 : vector<1x128xf32> to vector<8x128xf32>
    %36 = arith.mulf %33, %35 : vector<8x128xf32>
    %37 = arith.addf %32, %36 : vector<8x128xf32>
    %c0_4 = arith.constant 0 : index
    %c0_5 = arith.constant 0 : index
    %38 = vector.load %arg3[%c0_4, %c0_5] : memref<1x128xf32, #tpu.memory_space<vmem>>, vector<1x128xf32>
    %39 = vector.broadcast %38 : vector<1x128xf32> to vector<8x128xf32>
    %40 = arith.addf %37, %39 : vector<8x128xf32>
    %c0_6 = arith.constant 0 : index
    %c0_7 = arith.constant 0 : index
    %41 = vector.load %arg4[%c0_6, %c0_7] : memref<1x128xf32, #tpu.memory_space<vmem>>, vector<1x128xf32>
    %42 = vector.broadcast %41 : vector<1x128xf32> to vector<8x128xf32>
    %43 = arith.mulf %40, %42 : vector<8x128xf32>
    %c0_8 = arith.constant 0 : index
    %c0_9 = arith.constant 0 : index
    %44 = vector.load %arg5[%c0_8, %c0_9] : memref<1x128xf32, #tpu.memory_space<vmem>>, vector<1x128xf32>
    %45 = vector.broadcast %44 : vector<1x128xf32> to vector<8x128xf32>
    %46 = arith.addf %43, %45 : vector<8x128xf32>
    %47 = arith.negf %46 : vector<8x128xf32>
    %48 = math.exp %47 : vector<8x128xf32>
    %cst = arith.constant 1.000000e+00 : f32
    %49 = vector.broadcast %cst : f32 to vector<8x128xf32>
    %50 = arith.addf %49, %48 : vector<8x128xf32>
    %51 = arith.divf %49, %50 : vector<8x128xf32>
    %52 = arith.mulf %46, %51 : vector<8x128xf32>
    %53 = arith.truncf %52 : vector<8x128xf32> to vector<8x128xbf16>
    %c0_10 = arith.constant 0 : index
    %c0_11 = arith.constant 0 : index
    %c0_12 = arith.constant 0 : index
    %54 = vector.load %arg6[%c0_10, %c0_11, %c0_12] : memref<1x8x128xbf16, #tpu.memory_space<vmem>>, vector<1x8x128xbf16>
    %55 = vector.shape_cast %54 : vector<1x8x128xbf16> to vector<8x128xbf16>
    %56 = vector.shape_cast %53 : vector<8x128xbf16> to vector<1x8x128xbf16>
    tpu.vector_store %arg6[%c0_10, %c0_11, %c0_12], %56 {strides = array<i32>} : memref<1x8x128xbf16, #tpu.memory_space<vmem>>, vector<1x8x128xbf16>,
    return
  }
  func.func @transform_0(%arg0: i32) -> (i32, i32, i32) {
    %c0_i32 = arith.constant 0 : i32
    %c0_i32_0 = arith.constant 0 : i32
    %c0_i32_1 = arith.constant 0 : i32
    return %arg0, %c0_i32, %c0_i32_0 : i32, i32, i32
  }
  func.func @transform_1(%arg0: i32) -> (i32, i32) {
    %c0_i32 = arith.constant 0 : i32
    %c0_i32_0 = arith.constant 0 : i32
    %c0_i32_1 = arith.constant 0 : i32
    return %c0_i32, %c0_i32_0 : i32, i32
  }
  func.func @transform_2(%arg0: i32) -> (i32, i32) {
    %c0_i32 = arith.constant 0 : i32
    %c0_i32_0 = arith.constant 0 : i32
    %c0_i32_1 = arith.constant 0 : i32
    return %c0_i32, %c0_i32_0 : i32, i32
  }
  func.func @transform_3(%arg0: i32) -> (i32, i32) {
    %c0_i32 = arith.constant 0 : i32
    %c0_i32_0 = arith.constant 0 : i32
    %c0_i32_1 = arith.constant 0 : i32
    return %c0_i32, %c0_i32_0 : i32, i32
  }
  func.func @transform_4(%arg0: i32) -> (i32, i32) {
    %c0_i32 = arith.constant 0 : i32
    %c0_i32_0 = arith.constant 0 : i32
    %c0_i32_1 = arith.constant 0 : i32
    return %c0_i32, %c0_i32_0 : i32, i32
  }
  func.func @transform_5(%arg0: i32) -> (i32, i32, i32) {
    %c0_i32 = arith.constant 0 : i32
    %c0_i32_0 = arith.constant 0 : i32
    %c0_i32_1 = arith.constant 0 : i32
    return %arg0, %c0_i32, %c0_i32_0 : i32, i32, i32
  }
}

module attributes {stable_mosaic.version = 11 : i64} {
  func.func @_layernorm_kernel(%arg0: i32, %arg1: memref<16x128xf32, #tpu.memory_space<vmem>>, %arg2: memref<1x128xf32, #tpu.memory_space<vmem>>, %arg3: memref<1x128xf32, #tpu.memory_space<vmem>>, %arg4: memref<16x128xf32, #tpu.memory_space<vmem>>) attributes {dimension_semantics = [#tpu.dimension_semantics<parallel>], iteration_bounds = array<i64: 1>, scalar_prefetch = 0 : i64, scratch_operands = 0 : i64, tpu.core_type = #tpu.core_type<tc>, window_params = [{transform_indices = @transform_0, window_bounds = array<i64: 16, 128>}, {pipeline_mode = #tpu.pipeline_mode<synchronous>, transform_indices = @transform_1, window_bounds = array<i64: 1, 128>}, {pipeline_mode = #tpu.pipeline_mode<synchronous>, transform_indices = @transform_2, window_bounds = array<i64: 1, 128>}, {transform_indices = @transform_3, window_bounds = array<i64: 16, 128>}]} {
    %c0 = arith.constant 0 : index
    %c0_0 = arith.constant 0 : index
    %0 = vector.load %arg1[%c0, %c0_0] : memref<16x128xf32, #tpu.memory_space<vmem>>, vector<16x128xf32>
    %cst = arith.constant dense<0.000000e+00> : vector<16xf32>
    %1 = vector.multi_reduction <add>, %0, %cst [1] : vector<16x128xf32> to vector<16xf32>
    %2 = vector.shape_cast %1 : vector<16xf32> to vector<16x1xf32>
    %cst_1 = arith.constant 1.280000e+02 : f32
    %3 = vector.broadcast %cst_1 : f32 to vector<16x1xf32>
    %4 = arith.divf %2, %3 : vector<16x1xf32>
    %5 = vector.broadcast %4 : vector<16x1xf32> to vector<16x128xf32>
    %6 = arith.subf %0, %5 : vector<16x128xf32>
    %7 = arith.mulf %6, %6 : vector<16x128xf32>
    %cst_2 = arith.constant dense<0.000000e+00> : vector<16xf32>
    %8 = vector.multi_reduction <add>, %7, %cst_2 [1] : vector<16x128xf32> to vector<16xf32>
    %9 = vector.shape_cast %8 : vector<16xf32> to vector<16x1xf32>
    %cst_3 = arith.constant 1.280000e+02 : f32
    %10 = vector.broadcast %cst_3 : f32 to vector<16x1xf32>
    %11 = arith.divf %9, %10 : vector<16x1xf32>
    %12 = vector.broadcast %4 : vector<16x1xf32> to vector<16x128xf32>
    %13 = arith.subf %0, %12 : vector<16x128xf32>
    %cst_4 = arith.constant 9.99999974E-6 : f32
    %14 = vector.broadcast %cst_4 : f32 to vector<16x1xf32>
    %15 = arith.addf %11, %14 : vector<16x1xf32>
    %16 = math.rsqrt %15 : vector<16x1xf32>
    %17 = vector.broadcast %16 : vector<16x1xf32> to vector<16x128xf32>
    %18 = arith.mulf %13, %17 : vector<16x128xf32>
    %c0_5 = arith.constant 0 : index
    %c0_6 = arith.constant 0 : index
    %19 = vector.load %arg2[%c0_5, %c0_6] : memref<1x128xf32, #tpu.memory_space<vmem>>, vector<1x128xf32>
    %20 = vector.broadcast %19 : vector<1x128xf32> to vector<16x128xf32>
    %21 = arith.mulf %18, %20 : vector<16x128xf32>
    %c0_7 = arith.constant 0 : index
    %c0_8 = arith.constant 0 : index
    %22 = vector.load %arg3[%c0_7, %c0_8] : memref<1x128xf32, #tpu.memory_space<vmem>>, vector<1x128xf32>
    %23 = vector.broadcast %22 : vector<1x128xf32> to vector<16x128xf32>
    %24 = arith.addf %21, %23 : vector<16x128xf32>
    %c0_9 = arith.constant 0 : index
    %c0_10 = arith.constant 0 : index
    %25 = vector.load %arg4[%c0_9, %c0_10] : memref<16x128xf32, #tpu.memory_space<vmem>>, vector<16x128xf32>
    tpu.vector_store %arg4[%c0_9, %c0_10], %24 {strides = array<i32>} : memref<16x128xf32, #tpu.memory_space<vmem>>, vector<16x128xf32>,
    return
  }
  func.func @transform_0(%arg0: i32) -> (i32, i32) {
    %c0_i32 = arith.constant 0 : i32
    %c0_i32_0 = arith.constant 0 : i32
    return %arg0, %c0_i32 : i32, i32
  }
  func.func @transform_1(%arg0: i32) -> (i32, i32) {
    %c0_i32 = arith.constant 0 : i32
    %c0_i32_0 = arith.constant 0 : i32
    %c0_i32_1 = arith.constant 0 : i32
    return %c0_i32, %c0_i32_0 : i32, i32
  }
  func.func @transform_2(%arg0: i32) -> (i32, i32) {
    %c0_i32 = arith.constant 0 : i32
    %c0_i32_0 = arith.constant 0 : i32
    %c0_i32_1 = arith.constant 0 : i32
    return %c0_i32, %c0_i32_0 : i32, i32
  }
  func.func @transform_3(%arg0: i32) -> (i32, i32) {
    %c0_i32 = arith.constant 0 : i32
    %c0_i32_0 = arith.constant 0 : i32
    return %arg0, %c0_i32 : i32, i32
  }
}

module attributes {stable_mosaic.version = 11 : i64} {
  func.func @_matmul_kernel(%arg0: i32, %arg1: i32, %arg2: i32, %arg3: memref<2x128xbf16, #tpu.memory_space<vmem>>, %arg4: memref<128x128xbf16, #tpu.memory_space<vmem>>, %arg5: memref<1x128xf32, #tpu.memory_space<vmem>>, %arg6: memref<2x128xf32, #tpu.memory_space<vmem>>, %arg7: memref<2x128xf32, #tpu.memory_space<vmem>>) attributes {dimension_semantics = [#tpu.dimension_semantics<parallel>, #tpu.dimension_semantics<parallel>, #tpu.dimension_semantics<arbitrary>], iteration_bounds = array<i64: 1, 1, 1>, scalar_prefetch = 0 : i64, scratch_operands = 1 : i64, tpu.core_type = #tpu.core_type<tc>, window_params = [{transform_indices = @transform_0, window_bounds = array<i64: 2, 128>}, {transform_indices = @transform_1, window_bounds = array<i64: 128, 128>}, {transform_indices = @transform_2, window_bounds = array<i64: 1, 128>}, {transform_indices = @transform_3, window_bounds = array<i64: 2, 128>}]} {
    %c0_i32 = arith.constant 0 : i32
    %0 = arith.cmpi eq, %arg2, %c0_i32 : i32
    %1 = arith.extui %0 : i1 to i32
    %c0_i32_0 = arith.constant 0 : i32
    %2 = arith.cmpi ne, %1, %c0_i32_0 : i32
    scf.if %2 {
      %cst_10 = arith.constant 0.000000e+00 : f32
      %12 = vector.broadcast %cst_10 : f32 to vector<2x128xf32>
      %c0_11 = arith.constant 0 : index
      %c0_12 = arith.constant 0 : index
      %13 = vector.load %arg7[%c0_11, %c0_12] : memref<2x128xf32, #tpu.memory_space<vmem>>, vector<2x128xf32>
      tpu.vector_store %arg7[%c0_11, %c0_12], %12 {strides = array<i32>} : memref<2x128xf32, #tpu.memory_space<vmem>>, vector<2x128xf32>,
    } else {
    }
    %c0 = arith.constant 0 : index
    %c0_1 = arith.constant 0 : index
    %3 = vector.load %arg7[%c0, %c0_1] : memref<2x128xf32, #tpu.memory_space<vmem>>, vector<2x128xf32>
    %c0_2 = arith.constant 0 : index
    %c0_3 = arith.constant 0 : index
    %4 = vector.load %arg3[%c0_2, %c0_3] : memref<2x128xbf16, #tpu.memory_space<vmem>>, vector<2x128xbf16>
    %c0_4 = arith.constant 0 : index
    %c0_5 = arith.constant 0 : index
    %5 = vector.load %arg4[%c0_4, %c0_5] : memref<128x128xbf16, #tpu.memory_space<vmem>>, vector<128x128xbf16>
    %cst = arith.constant dense<0.000000e+00> : vector<2x128xf32>
    %6 = tpu.matmul %4, %5, %cst {dimension_numbers = #tpu.dot_dimension_numbers<[1], [0], [0], [1], [0, 0, 1, 1], [], []>} : vector<2x128xbf16>, vector<128x128xbf16>, vector<2x128xf32> -> vector<2x128xf32>
    %7 = arith.addf %3, %6 : vector<2x128xf32>
    %c0_6 = arith.constant 0 : index
    %c0_7 = arith.constant 0 : index
    %8 = vector.load %arg7[%c0_6, %c0_7] : memref<2x128xf32, #tpu.memory_space<vmem>>, vector<2x128xf32>
    tpu.vector_store %arg7[%c0_6, %c0_7], %7 {strides = array<i32>} : memref<2x128xf32, #tpu.memory_space<vmem>>, vector<2x128xf32>,
    %c0_i32_8 = arith.constant 0 : i32
    %9 = arith.cmpi eq, %arg2, %c0_i32_8 : i32
    %10 = arith.extui %9 : i1 to i32
    %c0_i32_9 = arith.constant 0 : i32
    %11 = arith.cmpi ne, %10, %c0_i32_9 : i32
    scf.if %11 {
      %c0_10 = arith.constant 0 : index
      %c0_11 = arith.constant 0 : index
      %12 = vector.load %arg7[%c0_10, %c0_11] : memref<2x128xf32, #tpu.memory_space<vmem>>, vector<2x128xf32>
      %c0_12 = arith.constant 0 : index
      %c0_13 = arith.constant 0 : index
      %13 = vector.load %arg5[%c0_12, %c0_13] : memref<1x128xf32, #tpu.memory_space<vmem>>, vector<1x128xf32>
      %14 = vector.broadcast %13 : vector<1x128xf32> to vector<2x128xf32>
      %15 = arith.addf %12, %14 : vector<2x128xf32>
      %c0_14 = arith.constant 0 : index
      %c0_15 = arith.constant 0 : index
      %16 = vector.load %arg6[%c0_14, %c0_15] : memref<2x128xf32, #tpu.memory_space<vmem>>, vector<2x128xf32>
      tpu.vector_store %arg6[%c0_14, %c0_15], %15 {strides = array<i32>} : memref<2x128xf32, #tpu.memory_space<vmem>>, vector<2x128xf32>,
    } else {
    }
    return
  }
  func.func @transform_0(%arg0: i32, %arg1: i32, %arg2: i32) -> (i32, i32) {
    %c0_i32 = arith.constant 0 : i32
    return %arg0, %arg2 : i32, i32
  }
  func.func @transform_1(%arg0: i32, %arg1: i32, %arg2: i32) -> (i32, i32) {
    %c0_i32 = arith.constant 0 : i32
    return %arg2, %arg1 : i32, i32
  }
  func.func @transform_2(%arg0: i32, %arg1: i32, %arg2: i32) -> (i32, i32) {
    %c0_i32 = arith.constant 0 : i32
    %c0_i32_0 = arith.constant 0 : i32
    return %c0_i32, %arg1 : i32, i32
  }
  func.func @transform_3(%arg0: i32, %arg1: i32, %arg2: i32) -> (i32, i32) {
    %c0_i32 = arith.constant 0 : i32
    return %arg0, %arg1 : i32, i32
  }
}

</mosaic_0001>

<bundles_post_ra>
// kernel: conformer_vision_forward.35
= control target key start
LH: loop header
LB: loop body
LE: loop exit
PB: predicated region body
PF: predicated region fallthrough
CT: control target
= control target key end

     0   :  { %s1179_s12 = smov 0   ;;  %s1181_s13 = smov 0   ;;  %s1327_s0 = inlined_call_operand.vmem [shape: bf16[1024,27], index: 0, kind: input, shape index: {}]   ;;  %s1328_s1 = inlined_call_operand.vmem [shape: bf16[27,128], index: 1, kind: input, shape index: {}]   ;;  %s1329_s2 = inlined_call_operand.vmem [shape: f32[1,128], index: 2, kind: input, shape index: {}]   ;;  %s1330_s3 = inlined_call_operand.vmem [shape: f32[1024,128], index: 3, kind: output, shape index: {}]  }
   0x1   :  { %s1183_s14 = smov 0  }
   0x2 LB: > { %s32_s15 = sadd.s32 1, %s1152_s13  ;;  %p991_p0 = scmp.ge.s32.totalorder %s1156_s14, 1  ;;  %s1156_s14 = sphi %s1183_s14, %s13_s14   ;;  %s1152_s13 = sphi %s1181_s13, %s1332_s13   ;;  %s1148_s12 = sphi %s1179_s12, %s1331_s12  }
   0x3   : > { %p34_p1 = scmp.ge.s32.totalorder %s32_s15, 4  ;;  %p188_p2 = scmp.lt.s32.totalorder %s1156_s14, 5 }
   0x5   : > { %s1334_s15 = smov (%p34_p1, %s32_s15), 0  ;;  %p189_p3 = pnand %p991_p0, %p188_p2 }
   0x6   : > { %v1116_v0 = vld [vmem:[%s1328_s1] sm:$0xff] (!%p189_p3)   ;;  %vm504_vm0 = vcmask (!%p189_p3), 1044480   ;;  %v1117_v1 = vld [vmem:[%s1328_s1 + $0x8] sm:$0x3f] (!%p189_p3)   ;;  %vm505_vm1 = vcmask (!%p189_p3), 1045504   ;;  %s992_s20 = sshll.u32 (!%p189_p3), %s1148_s12, 5 }
   0x7   : > { %192 = sbr.rel (%p189_p3) target bundleno = 264 (0x108), region = 32  ;;  %1051 = vmatprep.subr.bf16.mxu0 (!%p189_p3), %v1116_v0  ;;  %1087 = vmatprep.subr.bf16.mxu1 (!%p189_p3), %v1116_v0  ;;  %v1158_v2 = vmov (!%p189_p3), 65535   ;;  %p230_p4 = scmp.lt.s32.totalorder (!%p189_p3), %s992_s20, 127  ;;  %vm455_vm2 = vcmask (!%p189_p3), 220160   ;;  %v1246_v22 = vld [vmem:[%s1329_s2] ss:$0 sm:$0xff] (!%p189_p3) }
   0x8   : > { %1052 = vmatpush3.bf16.msra.mxu0 (!%p189_p3), %v1116_v0  ;;  %1089 = vmatpush3.bf16.msra.mxu1 (!%p189_p3), %v1116_v0  ;;  %v506_v3 = vsel (!%p189_p3), %vm504_vm0, 4294967295, %v1158_v2 }
   0x9   : > { %v507_v4 = vsel (!%p189_p3), %vm505_vm1, %v506_v3, 0 }
   0xa   : > { %v509_v5 = vand.u32 (!%p189_p3), %v1117_v1, %v507_v4 }
   0xc   : > { %1053 = vmatprep.subr.bf16.mxu0 (!%p189_p3), %v509_v5  ;;  %1088 = vmatprep.subr.bf16.mxu1 (!%p189_p3), %v509_v5 }
   0xd   : > { %1054 = vmatpush3.bf16.msra.mxu0 (!%p189_p3), %v509_v5  ;;  %1090 = vmatpush3.bf16.msra.mxu1 (!%p189_p3), %v509_v5 }
   0xe   : > { %s1336_s20 = smov (!%p230_p4, %s992_s20), 127 }
   0xf   : > { %s993_s21 = sshll.u32 %s1336_s20, 2  ;;  %s995_s27 = sshll.u32 %s1336_s20, 3 }
  0x10   : > { %s1209_s24 = scalar_lea.vmem %s1327_s0, %s993_s21  ;;  %s1253_s30 = scalar_lea.vmem %s1330_s3, %s995_s27 }
  0x11   : > { %v1118_v6 = vld [vmem:[%s1209_s24] sm:$0xff]   ;;  %v1120_v8 = vld [vmem:[%s1209_s24 + $0x8] sm:$0xff]   ;;  %v1122_v10 = vld [vmem:[%s1209_s24 + $0x10] sm:$0xff]  }
  0x12   : > { %v1119_v7 = vld [vmem:[%s1209_s24 + $0x40] sm:$0xff]   ;;  %1055 = vmatprep.mubr.msk.bf16.mxu0 %vm455_vm2, %v1118_v6  ;;  %v1121_v9 = vld [vmem:[%s1209_s24 + $0x48] sm:$0xff]   ;;  %v1123_v11 = vld [vmem:[%s1209_s24 + $0x50] sm:$0xff]  }
  0x13   : > { %1071 = vmatprep.mubr.msk.bf16.mxu1 %vm455_vm2, %v1119_v7  ;;  %1056 = vmatmul.mubr.msk.bf16.vlgmr.msra.gmra.mrb[0].mxu0 %vm455_vm2, %v1120_v8  ;;  %v1124_v12 = vld [vmem:[%s1209_s24 + $0x18] sm:$0xff]   ;;  %v1126_v14 = vld [vmem:[%s1209_s24 + $0x20] sm:$0xff]   ;;  %v1128_v16 = vld [vmem:[%s1209_s24 + $0x28] sm:$0xff]  }
  0x14   : > { %1072 = vmatmul.mubr.msk.bf16.vlgmr.msra.gmra.mrb[0].mxu1 %vm455_vm2, %v1121_v9  ;;  %1059 = vmatprep.mubr.msk.bf16.mxu0 %vm455_vm2, %v1122_v10  ;;  %v1125_v13 = vld [vmem:[%s1209_s24 + $0x58] sm:$0xff]   ;;  %v1127_v15 = vld [vmem:[%s1209_s24 + $0x60] sm:$0xff]   ;;  %v1129_v17 = vld [vmem:[%s1209_s24 + $0x68] sm:$0xff]  }
  0x15   : > { %1075 = vmatprep.mubr.msk.bf16.mxu1 %vm455_vm2, %v1123_v11  ;;  %v1130_v18 = vld [vmem:[%s1209_s24 + $0x30] sm:$0xff]   ;;  %v1132_v20 = vld [vmem:[%s1209_s24 + $0x38] sm:$0xff]  }
  0x16   : > { %v1131_v19 = vld [vmem:[%s1209_s24 + $0x70] sm:$0xff]   ;;  %v1133_v21 = vld [vmem:[%s1209_s24 + $0x78] sm:$0xff]  }
  0x1b   : > { %1060 = vmatmul.mubr.msk.bf16.gmra.mrb[4].mxu0 %vm455_vm2, %v1124_v12 }
  0x1c   : > { %1076 = vmatmul.mubr.msk.bf16.gmra.mrb[4].mxu1 %vm455_vm2, %v1125_v13  ;;  %1063 = vmatprep.mubr.msk.bf16.mxu0 %vm455_vm2, %v1126_v14 }
  0x1d   : > { %1079 = vmatprep.mubr.msk.bf16.mxu1 %vm455_vm2, %v1127_v15 }
  0x23   : > { %1064 = vmatmul.mubr.msk.bf16.gmra.mrb[8].mxu0 %vm455_vm2, %v1128_v16 }
  0x24   : > { %1080 = vmatmul.mubr.msk.bf16.gmra.mrb[8].mxu1 %vm455_vm2, %v1129_v17  ;;  %1067 = vmatprep.mubr.msk.bf16.mxu0 %vm455_vm2, %v1130_v18 }
  0x25   : > { %1083 = vmatprep.mubr.msk.bf16.mxu1 %vm455_vm2, %v1131_v19 }
  0x2b   : > { %1068 = vmatmul.mubr.msk.bf16.gmra.mrb[12].mxu0 %vm455_vm2, %v1132_v20 }
  0x2c   : > { %1084 = vmatmul.mubr.msk.bf16.gmra.mrb[12].mxu1 %vm455_vm2, %v1133_v21 }
  0xe6   : > { %v1057_v23 = vpop.f32.mrb[0].mxu0 }
  0xe7   : > { %v780_v24 = vadd.f32 %v1057_v23, %v1246_v22  ;;  %v1073_v25 = vpop.f32.mrb[0].mxu1  ;;  %v545_v26 = vpop.f32.mrb[1].mxu0 }
  0xe8   : > { %v796_v27 = vadd.f32 %v1073_v25, %v1246_v22  ;;  %v778_v28 = vadd.f32 %v1246_v22, %v545_v26  ;;  %v609_v29 = vpop.f32.mrb[1].mxu1  ;;  %v1058_v30 = vpop.f32.mrb[2].mxu0 }
  0xe9   : > { %v812_v31 = vmax.f32 %v780_v24, 0.0  ;;  %v794_v32 = vadd.f32 %v1246_v22, %v609_v29  ;;  %v781_v33 = vadd.f32 %v1058_v30, %v1246_v22  ;;  %v1074_v34 = vpop.f32.mrb[2].mxu1  ;;  %v548_v35 = vpop.f32.mrb[3].mxu0 }
  0xea   : > { %v828_v36 = vmax.f32 %v796_v27, 0.0  ;;  %v810_v37 = vmax.f32 %v778_v28, 0.0  ;;  %v797_v38 = vadd.f32 %v1074_v34, %v1246_v22  ;;  %v779_v39 = vadd.f32 %v1246_v22, %v548_v35  ;;  %v612_v40 = vpop.f32.mrb[3].mxu1 }
  0xeb   : > { %844 = vst [vmem:[%s1253_s30 + $0x10] sm:$0xff] %v812_v31  ;;  %v826_v41 = vmax.f32 %v794_v32, 0.0  ;;  %v813_v42 = vmax.f32 %v781_v33, 0.0  ;;  %v795_v43 = vadd.f32 %v1246_v22, %v612_v40 }
  0xec   : > { %860 = vst [vmem:[%s1253_s30 + $0x90] sm:$0xff] %v828_v36  ;;  %842 = vst [vmem:[%s1253_s30] sm:$0xff] %v810_v37  ;;  %v829_v44 = vmax.f32 %v797_v38, 0.0  ;;  %v811_v45 = vmax.f32 %v779_v39, 0.0 }
  0xed   : > { %858 = vst [vmem:[%s1253_s30 + $0x80] sm:$0xff] %v826_v41  ;;  %845 = vst [vmem:[%s1253_s30 + $0x18] sm:$0xff] %v813_v42  ;;  %v827_v46 = vmax.f32 %v795_v43, 0.0 }
  0xee   : > { %861 = vst [vmem:[%s1253_s30 + $0x98] sm:$0xff] %v829_v44  ;;  %843 = vst [vmem:[%s1253_s30 + $0x8] sm:$0xff] %v811_v45  ;;  %v1061_v47 = vpop.f32.mrb[4].mxu0 }
  0xef   : > { %859 = vst [vmem:[%s1253_s30 + $0x88] sm:$0xff] %v827_v46  ;;  %v784_v48 = vadd.f32 %v1061_v47, %v1246_v22  ;;  %v1077_v49 = vpop.f32.mrb[4].mxu1  ;;  %v561_v50 = vpop.f32.mrb[5].mxu0 }
  0xf0   : > { %v800_v51 = vadd.f32 %v1077_v49, %v1246_v22  ;;  %v782_v52 = vadd.f32 %v1246_v22, %v561_v50  ;;  %v625_v53 = vpop.f32.mrb[5].mxu1  ;;  %v1062_v54 = vpop.f32.mrb[6].mxu0 }
  0xf1   : > { %v816_v55 = vmax.f32 %v784_v48, 0.0  ;;  %v798_v56 = vadd.f32 %v1246_v22, %v625_v53  ;;  %v785_v57 = vadd.f32 %v1062_v54, %v1246_v22  ;;  %v1078_v58 = vpop.f32.mrb[6].mxu1  ;;  %v564_v59 = vpop.f32.mrb[7].mxu0 }
  0xf2   : > { %v832_v60 = vmax.f32 %v800_v51, 0.0  ;;  %v814_v61 = vmax.f32 %v782_v52, 0.0  ;;  %v801_v62 = vadd.f32 %v1078_v58, %v1246_v22  ;;  %v783_v63 = vadd.f32 %v1246_v22, %v564_v59  ;;  %v628_v0 = vpop.f32.mrb[7].mxu1 }
  0xf3   : > { %848 = vst [vmem:[%s1253_s30 + $0x30] sm:$0xff] %v816_v55  ;;  %v830_v1 = vmax.f32 %v798_v56, 0.0  ;;  %v817_v2 = vmax.f32 %v785_v57, 0.0  ;;  %v799_v3 = vadd.f32 %v1246_v22, %v628_v0 }
  0xf4   : > { %864 = vst [vmem:[%s1253_s30 + $0xb0] sm:$0xff] %v832_v60  ;;  %846 = vst [vmem:[%s1253_s30 + $0x20] sm:$0xff] %v814_v61  ;;  %v833_v4 = vmax.f32 %v801_v62, 0.0  ;;  %v815_v5 = vmax.f32 %v783_v63, 0.0 }
  0xf5   : > { %862 = vst [vmem:[%s1253_s30 + $0xa0] sm:$0xff] %v830_v1  ;;  %849 = vst [vmem:[%s1253_s30 + $0x38] sm:$0xff] %v817_v2  ;;  %v831_v6 = vmax.f32 %v799_v3, 0.0 }
  0xf6   : > { %865 = vst [vmem:[%s1253_s30 + $0xb8] sm:$0xff] %v833_v4  ;;  %847 = vst [vmem:[%s1253_s30 + $0x28] sm:$0xff] %v815_v5  ;;  %v1065_v7 = vpop.f32.mrb[8].mxu0 }
  0xf7   : > { %863 = vst [vmem:[%s1253_s30 + $0xa8] sm:$0xff] %v831_v6  ;;  %v788_v8 = vadd.f32 %v1065_v7, %v1246_v22  ;;  %v1081_v9 = vpop.f32.mrb[8].mxu1  ;;  %v577_v10 = vpop.f32.mrb[9].mxu0 }
  0xf8   : > { %v804_v11 = vadd.f32 %v1081_v9, %v1246_v22  ;;  %v786_v12 = vadd.f32 %v1246_v22, %v577_v10  ;;  %v641_v13 = vpop.f32.mrb[9].mxu1  ;;  %v1066_v14 = vpop.f32.mrb[10].mxu0 }
  0xf9   : > { %v820_v15 = vmax.f32 %v788_v8, 0.0  ;;  %v802_v16 = vadd.f32 %v1246_v22, %v641_v13  ;;  %v789_v17 = vadd.f32 %v1066_v14, %v1246_v22  ;;  %v1082_v18 = vpop.f32.mrb[10].mxu1  ;;  %v580_v19 = vpop.f32.mrb[11].mxu0 }
  0xfa   : > { %v836_v20 = vmax.f32 %v804_v11, 0.0  ;;  %v818_v21 = vmax.f32 %v786_v12, 0.0  ;;  %v805_v23 = vadd.f32 %v1082_v18, %v1246_v22  ;;  %v787_v24 = vadd.f32 %v1246_v22, %v580_v19  ;;  %v644_v25 = vpop.f32.mrb[11].mxu1 }
  0xfb   : > { %852 = vst [vmem:[%s1253_s30 + $0x50] sm:$0xff] %v820_v15  ;;  %v834_v26 = vmax.f32 %v802_v16, 0.0  ;;  %v821_v27 = vmax.f32 %v789_v17, 0.0  ;;  %v803_v28 = vadd.f32 %v1246_v22, %v644_v25 }
  0xfc   : > { %868 = vst [vmem:[%s1253_s30 + $0xd0] sm:$0xff] %v836_v20  ;;  %850 = vst [vmem:[%s1253_s30 + $0x40] sm:$0xff] %v818_v21  ;;  %v837_v29 = vmax.f32 %v805_v23, 0.0  ;;  %v819_v30 = vmax.f32 %v787_v24, 0.0 }
  0xfd   : > { %866 = vst [vmem:[%s1253_s30 + $0xc0] sm:$0xff] %v834_v26  ;;  %853 = vst [vmem:[%s1253_s30 + $0x58] sm:$0xff] %v821_v27  ;;  %v835_v31 = vmax.f32 %v803_v28, 0.0 }
  0xfe   : > { %869 = vst [vmem:[%s1253_s30 + $0xd8] sm:$0xff] %v837_v29  ;;  %851 = vst [vmem:[%s1253_s30 + $0x48] sm:$0xff] %v819_v30  ;;  %v1069_v32 = vpop.f32.mrb[12].mxu0 }
  0xff   : > { %867 = vst [vmem:[%s1253_s30 + $0xc8] sm:$0xff] %v835_v31  ;;  %v792_v33 = vadd.f32 %v1069_v32, %v1246_v22  ;;  %v1085_v34 = vpop.f32.mrb[12].mxu1  ;;  %v593_v35 = vpop.f32.mrb[13].mxu0 }
 0x100   : > { %v808_v36 = vadd.f32 %v1085_v34, %v1246_v22  ;;  %v790_v37 = vadd.f32 %v1246_v22, %v593_v35  ;;  %v657_v38 = vpop.f32.mrb[13].mxu1  ;;  %v1070_v39 = vpop.f32.mrb[14].mxu0 }
 0x101   : > { %v824_v40 = vmax.f32 %v792_v33, 0.0  ;;  %v806_v41 = vadd.f32 %v1246_v22, %v657_v38  ;;  %v793_v42 = vadd.f32 %v1070_v39, %v1246_v22  ;;  %v1086_v43 = vpop.f32.mrb[14].mxu1  ;;  %v596_v44 = vpop.f32.mrb[15].mxu0 }
 0x102   : > { %v840_v45 = vmax.f32 %v808_v36, 0.0  ;;  %v822_v46 = vmax.f32 %v790_v37, 0.0  ;;  %v809_v47 = vadd.f32 %v1086_v43, %v1246_v22  ;;  %v791_v48 = vadd.f32 %v1246_v22, %v596_v44  ;;  %v660_v49 = vpop.f32.mrb[15].mxu1 }
 0x103   : > { %856 = vst [vmem:[%s1253_s30 + $0x70] sm:$0xff] %v824_v40  ;;  %v838_v50 = vmax.f32 %v806_v41, 0.0  ;;  %v825_v51 = vmax.f32 %v793_v42, 0.0  ;;  %v807_v52 = vadd.f32 %v1246_v22, %v660_v49 }
 0x104   : > { %872 = vst [vmem:[%s1253_s30 + $0xf0] sm:$0xff] %v840_v45  ;;  %854 = vst [vmem:[%s1253_s30 + $0x60] sm:$0xff] %v822_v46  ;;  %v841_v53 = vmax.f32 %v809_v47, 0.0  ;;  %v823_v54 = vmax.f32 %v791_v48, 0.0 }
 0x105   : > { %870 = vst [vmem:[%s1253_s30 + $0xe0] sm:$0xff] %v838_v50  ;;  %857 = vst [vmem:[%s1253_s30 + $0x78] sm:$0xff] %v825_v51  ;;  %v839_v55 = vmax.f32 %v807_v52, 0.0 }
 0x106   : > { %873 = vst [vmem:[%s1253_s30 + $0xf8] sm:$0xff] %v841_v53  ;;  %855 = vst [vmem:[%s1253_s30 + $0x68] sm:$0xff] %v823_v54 }
 0x107   : > { %871 = vst [vmem:[%s1253_s30 + $0xe8] sm:$0xff] %v839_v55 }
 0x108 PF: > { %s13_s14 = sadd.s32 1, %s1156_s14   ;;  %s1331_s12 = smov %s1152_s13 }
 0x109   : > { %p10_p5 = scmp.ge.s32.totalorder %s13_s14, 6   ;;  %s1332_s13 = smov %s1334_s15 }
 0x10b   :  { %12 = sbr.rel (!%p10_p5) target bundleno = 2 (0x2), region = 76 }

// kernel: conformer_vision_forward.36
= control target key start
LH: loop header
LB: loop body
LE: loop exit
PB: predicated region body
PF: predicated region fallthrough
CT: control target
= control target key end

     0   :  { %vm35_vm0 = vcmask 1043456   ;;  %v118_v0 = vmov 0.0   ;;  %vm119_vm1 = vmmov 0   ;;  %vm31_vm2 = vcmask 64512   ;;  %s155_s1 = inlined_call_operand.vmem [shape: bf16[8,128], index: 1, kind: input, shape index: {}]   ;;  %s156_s0 = inlined_call_operand.vmem [shape: bf16[16,8], index: 0, kind: input, shape index: {}]   ;;  %s157_s2 = inlined_call_operand.vmem [shape: f32[1,128], index: 2, kind: input, shape index: {}]   ;;  %s158_s3 = inlined_call_operand.vmem [shape: f32[16,128], index: 3, kind: output, shape index: {}]  }
   0x1   :  { %109 = vmatprep.subr.bf16.mxu0 %v118_v0  ;;  %v25_v1 = vld [vmem:[%s155_s1] sm:$0xf]  ;;  %111 = vmatprep.mubr.msk.bf16.mxu0 %vm119_vm1, %v118_v0 }
   0x2   :  { %v37_v2 = vsel %vm35_vm0, %v25_v1, 0  ;;  %v117_v3 = vld [vmem:[%s156_s0] sm:$0xff]  }
   0x3   :  { %110 = vmatpush3.bf16.msra.mxu0 %v37_v2  ;;  %v106_v4 = vld [vmem:[%s157_s2] ss:$0 sm:$0xff] }
   0x6   :  { %112 = vmatmul.mubr.msk.bf16.vlgmr.msra.gmra.mrb[0].mxu0 %vm31_vm2, %v117_v3 }
  0xd9   :  { %v73_v5 = vpop.f32.mrb[0].mxu0 }
  0xda   :  { %v96_v6 = vadd.f32 %v106_v4, %v73_v5  ;;  %v113_v7 = vpop.f32.mrb[1].mxu0 }
  0xdb   :  { %v76_v8 = vpop.f32.mrb[2].mxu0 }
  0xdc   :  { %98 = vst [vmem:[%s158_s3] sm:$0xff] %v96_v6  ;;  %v97_v9 = vadd.f32 %v106_v4, %v76_v8  ;;  %v114_v10 = vpop.f32.mrb[3].mxu0 }
  0xde   :  { %99 = vst [vmem:[%s158_s3 + $0x8] sm:$0xff] %v97_v9 }

// kernel: conformer_vision_forward.39
= control target key start
LH: loop header
LB: loop body
LE: loop exit
PB: predicated region body
PF: predicated region fallthrough
CT: control target
= control target key end

     0   :  { %s121_s0 = inlined_call_operand.vmem [shape: f32[16,128], index: 0, kind: input, shape index: {}]   ;;  %s122_s1 = inlined_call_operand.vmem [shape: f32[1,128], index: 1, kind: input, shape index: {}]   ;;  %s123_s2 = inlined_call_operand.vmem [shape: f32[1,128], index: 2, kind: input, shape index: {}]   ;;  %s124_s3 = inlined_call_operand.vmem [shape: bf16[16,128], index: 3, kind: output, shape index: {}]  }
   0x1   :  { %v14_v0 = vld [vmem:[%s121_s0] sm:$0xff]  ;;  %v15_v1 = vld [vmem:[%s121_s0 + $0x8] sm:$0xff] }
   0x2   :  { %16 = vadd.xlane.f32.xlu0 %v14_v0  ;;  %v71_v18 = vld [vmem:[%s122_s1] ss:$0 sm:$0xff] }
   0x3   :  { %v72_v22 = vld [vmem:[%s123_s2] ss:$0 sm:$0xff] }
   0x6   :  { %18 = vadd.xlane.f32.xlu0 %v15_v1 }
  0x8f   :  { %v17_v2 = vpop.xlane.xlu0 %16 }
  0x90   :  { %v21_v3 = vmul.f32 0.0078125, %v17_v2 }
  0x92   :  { %v23_v4 = vsub.f32 %v14_v0, %v21_v3 }
  0x93   :  { %v19_v5 = vpop.xlane.xlu0 %18 }
  0x94   :  { %v22_v6 = vmul.f32 0.0078125, %v19_v5  ;;  %v25_v7 = vmul.f32 %v23_v4, %v23_v4 }
  0x96   :  { %v24_v8 = vsub.f32 %v15_v1, %v22_v6  ;;  %27 = vadd.xlane.f32.xlu1 %v25_v7 }
  0x98   :  { %v26_v9 = vmul.f32 %v24_v8, %v24_v8 }
  0x9a   :  { %29 = vadd.xlane.f32.xlu1 %v26_v9 }
 0x123   :  { %v28_v10 = vpop.xlane.xlu1 %27 }
 0x124   :  { %v31_v11 = vmul.f32 0.0078125, %v28_v10 }
 0x126   :  { %v33_v12 = vadd.f32 1e-05, %v31_v11 }
 0x127   :  { %v30_v13 = vpop.xlane.xlu1 %29 }
 0x128   :  { %82 = vrsqrt.f32 %v33_v12  ;;  %v32_v14 = vmul.f32 0.0078125, %v30_v13 }
 0x12a   :  { %v34_v15 = vadd.f32 1e-05, %v32_v14 }
 0x12c   :  { %84 = vrsqrt.f32 %v34_v15 }
 0x132   :  { %v83_v16 = vpop.eup %82 }
 0x133   :  { %v37_v17 = vmul.f32 %v83_v16, %v23_v4 }
 0x135   :  { %v46_v20 = vmul.f32 %v71_v18, %v37_v17 }
 0x136   :  { %v85_v19 = vpop.eup %84 }
 0x137   :  { %v38_v21 = vmul.f32 %v85_v19, %v24_v8  ;;  %v55_v24 = vadd.f32 %v72_v22, %v46_v20 }
 0x139   :  { %v47_v23 = vmul.f32 %v71_v18, %v38_v21 }
 0x13b   :  { %v56_v25 = vadd.f32 %v72_v22, %v47_v23 }
 0x13d   :  { %v80_v26 = vpack.c.bf16 %v56_v25, %v55_v24 }
 0x13f   :  { %81 = vst [vmem:[%s124_s3] sm:$0xff] %v80_v26  }

// kernel: conformer_vision_forward.40
= control target key start
LH: loop header
LB: loop body
LE: loop exit
PB: predicated region body
PF: predicated region fallthrough
CT: control target
= control target key end

     0   :  { %v318_v1 = vmov 0   ;;  %v191_v18 = vlaneseq  ;;  %s399_s1 = inlined_call_operand.vmem [shape: bf16[128,256], index: 1, kind: input, shape index: {}]   ;;  %s400_s0 = inlined_call_operand.vmem [shape: bf16[16,128], index: 0, kind: input, shape index: {}]   ;;  %s401_s2 = inlined_call_operand.vmem [shape: f32[1,256], index: 2, kind: input, shape index: {}]   ;;  %s402_s3 = inlined_call_operand.vmem [shape: bf16[16,256], index: 3, kind: output, shape index: {}]  }
   0x1   :  { %v277_v0 = vld [vmem:[%s399_s1 + $0x4] ss:$8 sps:$4 sm:$0xff]   ;;  %163 = vmatprep.mubr.bf16.mxu0 %v318_v1  ;;  %v279_v2 = vld [vmem:[%s399_s1] ss:$8 sps:$4 sm:$0xff]   ;;  %v280_v3 = vld [vmem:[%s399_s1 + $0x14] ss:$8 sps:$4 sm:$0xff]  }
   0x2   :  { %131 = vmatprep.subr.bf16.mxu0 %v277_v0  ;;  %v282_v4 = vld [vmem:[%s399_s1 + $0x10] ss:$8 sps:$4 sm:$0xff]   ;;  %v283_v5 = vld [vmem:[%s399_s1 + $0x24] ss:$8 sps:$4 sm:$0xff]   ;;  %v285_v6 = vld [vmem:[%s399_s1 + $0x20] ss:$8 sps:$4 sm:$0xff]  }
   0x3   :  { %132 = vmatpush1.bf16.msra.mxu0 %v279_v2  ;;  %v286_v7 = vld [vmem:[%s399_s1 + $0x34] ss:$8 sps:$4 sm:$0xff]   ;;  %v288_v8 = vld [vmem:[%s399_s1 + $0x30] ss:$8 sps:$4 sm:$0xff]   ;;  %v289_v9 = vld [vmem:[%s399_s1 + $0x44] ss:$8 sps:$4 sm:$0xff]  }
   0x4   :  { %133 = vmatprep.subr.bf16.mxu0 %v280_v3  ;;  %v291_v10 = vld [vmem:[%s399_s1 + $0x40] ss:$8 sps:$4 sm:$0xff]   ;;  %v292_v11 = vld [vmem:[%s399_s1 + $0x54] ss:$8 sps:$4 sm:$0xff]   ;;  %v294_v12 = vld [vmem:[%s399_s1 + $0x50] ss:$8 sps:$4 sm:$0xff]  }
   0x5   :  { %v295_v13 = vld [vmem:[%s399_s1 + $0x64] ss:$8 sps:$4 sm:$0xff]   ;;  %v297_v14 = vld [vmem:[%s399_s1 + $0x60] ss:$8 sps:$4 sm:$0xff]   ;;  %v298_v15 = vld [vmem:[%s399_s1 + $0x74] ss:$8 sps:$4 sm:$0xff]  }
   0x6   :  { %v300_v16 = vld [vmem:[%s399_s1 + $0x70] ss:$8 sps:$4 sm:$0xff]   ;;  %v301_v17 = vld [vmem:[%s400_s0] sm:$0xff]   ;;  %v192_v19 = vshrl.u32 %v191_v18, 7 }
   0x7   :  { %134 = vmatpush1.bf16.msra.mxu0 %v282_v4  ;;  %v189_v21 = vld [vmem:[%s401_s2] sm:$0x3] }
   0x8   :  { %135 = vmatprep.subr.bf16.mxu0 %v283_v5  ;;  %v193_v20 = vsub.s32 0, %v192_v19  ;;  %v197_v22 = vsub.s32 1, %v192_v19 }
   0xa   :  { %v194_v23 = vrot.slane %v189_v21, %v193_v20  ;;  %v198_v24 = vrot.slane %v189_v21, %v197_v22 }
   0xb   :  { %136 = vmatpush1.bf16.msra.mxu0 %v285_v6 }
   0xc   :  { %137 = vmatprep.subr.bf16.mxu0 %v286_v7 }
   0xf   :  { %138 = vmatpush1.bf16.msra.mxu0 %v288_v8 }
  0x10   :  { %139 = vmatprep.subr.bf16.mxu0 %v289_v9 }
  0x13   :  { %140 = vmatpush1.bf16.msra.mxu0 %v291_v10 }
  0x14   :  { %141 = vmatprep.subr.bf16.mxu0 %v292_v11 }
  0x17   :  { %142 = vmatpush1.bf16.msra.mxu0 %v294_v12 }
  0x18   :  { %143 = vmatprep.subr.bf16.mxu0 %v295_v13 }
  0x1b   :  { %144 = vmatpush1.bf16.msra.mxu0 %v297_v14 }
  0x1c   :  { %145 = vmatprep.subr.bf16.mxu0 %v298_v15 }
  0x1f   :  { %146 = vmatpush1.bf16.msra.mxu0 %v300_v16 }
  0x22   :  { %164 = vmatmul.mubr.bf16.vlgmr.msra.gmra.mrb[0].mxu0 %v301_v17 }
  0xf5   :  { %v165_v25 = vpop.f32.mrb[0].mxu0 }
  0xf6   :  { %v201_v26 = vadd.f32 %v194_v23, %v165_v25  ;;  %v167_v27 = vpop.f32.mrb[1].mxu0 }
  0xf7   :  { %v202_v28 = vadd.f32 %v198_v24, %v167_v27  ;;  %v169_v29 = vpop.f32.mrb[2].mxu0 }
  0xf8   :  { %v268_v30 = vmul.f32 -1.442695, %v201_v26  ;;  %v203_v31 = vadd.f32 %v194_v23, %v169_v29  ;;  %v171_v32 = vpop.f32.mrb[3].mxu0 }
  0xf9   :  { %v269_v33 = vmul.f32 -1.442695, %v202_v28  ;;  %v204_v34 = vadd.f32 %v198_v24, %v171_v32 }
  0xfa   :  { %302 = vpow2.f32 %v268_v30  ;;  %v270_v35 = vmul.f32 -1.442695, %v203_v31 }
  0xfb   :  { %304 = vpow2.f32 %v269_v33  ;;  %v271_v36 = vmul.f32 -1.442695, %v204_v34 }
  0xfc   :  { %306 = vpow2.f32 %v270_v35 }
  0xfd   :  { %308 = vpow2.f32 %v271_v36 }
 0x104   :  { %v303_v37 = vpop.eup %302 }
 0x105   :  { %v305_v38 = vpop.eup %304  ;;  %v217_v39 = vadd.f32 1.0, %v303_v37 }
 0x106   :  { %v307_v40 = vpop.eup %306  ;;  %v218_v41 = vadd.f32 1.0, %v305_v38 }
 0x107   :  { %v309_v42 = vpop.eup %308  ;;  %310 = vrcp.f32 %v217_v39  ;;  %v219_v43 = vadd.f32 1.0, %v307_v40 }
 0x108   :  { %312 = vrcp.f32 %v218_v41  ;;  %v220_v44 = vadd.f32 1.0, %v309_v42 }
 0x109   :  { %314 = vrcp.f32 %v219_v43 }
 0x10a   :  { %316 = vrcp.f32 %v220_v44 }
 0x111   :  { %v311_v45 = vpop.eup %310 }
 0x112   :  { %v313_v46 = vpop.eup %312  ;;  %v229_v47 = vmul.f32 %v311_v45, %v201_v26 }
 0x113   :  { %v315_v48 = vpop.eup %314  ;;  %v230_v49 = vmul.f32 %v313_v46, %v202_v28 }
 0x114   :  { %v317_v50 = vpop.eup %316  ;;  %v231_v51 = vmul.f32 %v315_v48, %v203_v31 }
 0x115   :  { %v274_v52 = vpack.c.bf16 %v230_v49, %v229_v47  ;;  %v232_v53 = vmul.f32 %v317_v50, %v204_v34 }
 0x117   :  { %245 = vst [vmem:[%s402_s3] sm:$0xff] %v274_v52  ;;  %v275_v54 = vpack.c.bf16 %v232_v53, %v231_v51 }
 0x119   :  { %246 = vst [vmem:[%s402_s3 + $0x8] sm:$0xff] %v275_v54 }

// kernel: conformer_vision_forward.41
= control target key start
LH: loop header
LB: loop body
LE: loop exit
PB: predicated region body
PF: predicated region fallthrough
CT: control target
= control target key end

     0   :  { %s391_s1 = inlined_call_operand.vmem [shape: bf16[256,128], index: 1, kind: input, shape index: {}]   ;;  %s392_s0 = inlined_call_operand.vmem [shape: bf16[16,256], index: 0, kind: input, shape index: {}]   ;;  %s393_s2 = inlined_call_operand.vmem [shape: f32[1,128], index: 2, kind: input, shape index: {}]   ;;  %s394_s3 = inlined_call_operand.vmem [shape: f32[16,128], index: 3, kind: input, shape index: {}]   ;;  %s395_s4 = inlined_call_operand.vmem [shape: f32[16,128], index: 4, kind: output, shape index: {}]  }
   0x1   :  { %v278_v0 = vld [vmem:[%s391_s1 + $0x40] sm:$0xff]   ;;  %v280_v2 = vld [vmem:[%s391_s1 + $0x48] sm:$0xff]   ;;  %v282_v4 = vld [vmem:[%s391_s1 + $0x50] sm:$0xff]  }
   0x2   :  { %v279_v1 = vld [vmem:[%s391_s1] sm:$0xff]   ;;  %256 = vmatprep.subr.bf16.mxu0 %v278_v0  ;;  %v281_v3 = vld [vmem:[%s391_s1 + $0x8] sm:$0xff]   ;;  %v283_v5 = vld [vmem:[%s391_s1 + $0x10] sm:$0xff]  }
   0x3   :  { %257 = vmatpush3.bf16.msra.mxu0 %v279_v1  ;;  %v284_v6 = vld [vmem:[%s391_s1 + $0x58] sm:$0xff]   ;;  %v286_v8 = vld [vmem:[%s391_s1 + $0x60] sm:$0xff]   ;;  %v288_v10 = vld [vmem:[%s391_s1 + $0x68] sm:$0xff]  }
   0x4   :  { %258 = vmatprep.subr.bf16.mxu0 %v280_v2  ;;  %v285_v7 = vld [vmem:[%s391_s1 + $0x18] sm:$0xff]   ;;  %v287_v9 = vld [vmem:[%s391_s1 + $0x20] sm:$0xff]   ;;  %v289_v12 = vld [vmem:[%s391_s1 + $0x28] sm:$0xff]  }
   0x5   :  { %v296_v11 = vld [vmem:[%s392_s0 + $0x4] ss:$8 sps:$4 sm:$0xff]   ;;  %v290_v13 = vld [vmem:[%s391_s1 + $0x70] sm:$0xff]   ;;  %v292_v15 = vld [vmem:[%s391_s1 + $0x78] sm:$0xff]  }
   0x6   :  { %198 = vmatprep.mubr.bf16.mxu0 %v296_v11  ;;  %v291_v14 = vld [vmem:[%s391_s1 + $0x30] sm:$0xff]   ;;  %v293_v16 = vld [vmem:[%s391_s1 + $0x38] sm:$0xff]   ;;  %v294_v17 = vld [vmem:[%s392_s0] ss:$8 sps:$4 sm:$0xff]  }
   0x7   :  { %259 = vmatpush3.bf16.msra.mxu0 %v281_v3  ;;  %v255_v20 = vld [vmem:[%s393_s2] ss:$0 sm:$0xff]  ;;  %v228_v29 = vld [vmem:[%s394_s3 + $0x8] sm:$0xff] }
   0x8   :  { %260 = vmatprep.subr.bf16.mxu0 %v282_v4  ;;  %v227_v26 = vld [vmem:[%s394_s3] sm:$0xff] }
   0xb   :  { %261 = vmatpush3.bf16.msra.mxu0 %v283_v5 }
   0xc   :  { %262 = vmatprep.subr.bf16.mxu0 %v284_v6 }
   0xf   :  { %263 = vmatpush3.bf16.msra.mxu0 %v285_v7 }
  0x10   :  { %264 = vmatprep.subr.bf16.mxu0 %v286_v8 }
  0x13   :  { %265 = vmatpush3.bf16.msra.mxu0 %v287_v9 }
  0x14   :  { %266 = vmatprep.subr.bf16.mxu0 %v288_v10 }
  0x17   :  { %267 = vmatpush3.bf16.msra.mxu0 %v289_v12 }
  0x18   :  { %268 = vmatprep.subr.bf16.mxu0 %v290_v13 }
  0x1b   :  { %269 = vmatpush3.bf16.msra.mxu0 %v291_v14 }
  0x1c   :  { %270 = vmatprep.subr.bf16.mxu0 %v292_v15 }
  0x1f   :  { %271 = vmatpush3.bf16.msra.mxu0 %v293_v16 }
  0x22   :  { %199 = vmatmul.mubr.bf16.vlgmr.msra.gmra.mrb[0].mxu0 %v294_v17 }
  0xf5   :  { %v272_v18 = vpop.f32.mrb[0].mxu0 }
  0xf6   :  { %v273_v19 = vpop.f32.mrb[1].mxu0 }
  0xf7   :  { %v274_v21 = vadd.f32 %v273_v19, %v272_v18  ;;  %v275_v22 = vpop.f32.mrb[2].mxu0 }
  0xf8   :  { %v276_v23 = vpop.f32.mrb[3].mxu0 }
  0xf9   :  { %v223_v24 = vadd.f32 %v274_v21, %v255_v20  ;;  %v277_v25 = vadd.f32 %v276_v23, %v275_v22 }
  0xfb   :  { %v225_v27 = vmul.f32 0.5, %v223_v24  ;;  %v224_v28 = vadd.f32 %v277_v25, %v255_v20 }
  0xfd   :  { %v229_v30 = vadd.f32 %v227_v26, %v225_v27  ;;  %v226_v31 = vmul.f32 0.5, %v224_v28 }
  0xff   :  { %231 = vst [vmem:[%s395_s4] sm:$0xff] %v229_v30  ;;  %v230_v32 = vadd.f32 %v228_v29, %v226_v31 }
 0x101   :  { %232 = vst [vmem:[%s395_s4 + $0x8] sm:$0xff] %v230_v32 }

// kernel: conformer_vision_forward.43
= control target key start
LH: loop header
LB: loop body
LE: loop exit
PB: predicated region body
PF: predicated region fallthrough
CT: control target
= control target key end

     0   :  { %s820_s12 = smov 0   ;;  %s822_s13 = smov 0   ;;  %s922_s0 = inlined_call_operand.vmem [shape: bf16[16,128], index: 0, kind: input, shape index: {}]   ;;  %s923_s1 = inlined_call_operand.vmem [shape: bf16[128,384], index: 1, kind: input, shape index: {}]   ;;  %s924_s2 = inlined_call_operand.vmem [shape: f32[1,384], index: 2, kind: input, shape index: {}]   ;;  %s925_s3 = inlined_call_operand.vmem [shape: bf16[16,384], index: 3, kind: output, shape index: {}]  }
   0x1   :  { %s824_s14 = smov 0   ;;  %s826_s15 = smov 0  }
   0x2   :  { %s828_s16 = smov 0  }
   0x3 LB: > { %s28_s17 = sadd.s32 1, %s792_s15  ;;  %s645_s18 = sadd.s32 4294967295, %s796_s16   ;;  %s796_s16 = sphi %s828_s16, %s13_s16   ;;  %s792_s15 = sphi %s826_s15, %s930_s15   ;;  %s788_s14 = sphi %s824_s14, %s929_s14   ;;  %s784_s13 = sphi %s822_s13, %s928_s13   ;;  %s780_s12 = sphi %s820_s12, %s927_s12  }
   0x4   : > { %p30_p0 = scmp.ge.s32.totalorder %s28_s17, 3  ;;  %p76_p1 = scmp.ne.s32.totalorder %s784_s13, %s780_s12 }
   0x5   : > { %p77_p2 = scmp.eq.s32.totalorder %s796_s16, 0  ;;  %p134_p4 = scmp.eq.s32.totalorder %s645_s18, 2 }
   0x6   : > { %s932_s17 = smov (%p30_p0, %s28_s17), 0  ;;  %s69_s20 = sadd.s32 1, %s784_s13 }
   0x7   : > { %p78_p3 = por %p77_p2, %p76_p1  ;;  %s65_s19 = ssub.s32 %s792_s15, %s932_s17 }
   0x8   : > { %p67_p5 = scmp.eq.s32.totalorder %s65_s19, 0  ;;  %p855_p6 = por %p134_p4, %p76_p1 }
   0x9   : > { %p649_p7 = scmp.ge.s32.totalorder %s796_s16, 3 }
   0xa   : > { %s860_s22 = scalar_select %p67_p5, %s784_s13, %s69_s20  }
   0xb   : > { %168 = sbr.rel (%p649_p7) target bundleno = 32 (0x20), region = 20 }
  0x12   : > { %171 = sbr.rel (!%p78_p3) target bundleno = 32 (0x20), region = 24  ;;  %s173_s23 = sand.u32 (%p78_p3), 1, %s784_s13  }
  0x13   : > { %s651_s24 = sshll.u32 (%p78_p3), %s792_s15, 2  ;;  %s650_s25 = sshll.u32 (%p78_p3), %s173_s23, 6 }
  0x14   : > { %s868_s28 = scalar_lea.vmem (%p78_p3), %s923_s1, %s651_s24  ;;  %s175_s29 = scalar_lea.vmem (%p78_p3), [#allocation3], %s650_s25 }
  0x15   : > { %v196_v0 = vld [vmem:[%s868_s28] sm:$0xf] (%p78_p3)  ;;  %v198_v1 = vld [vmem:[%s868_s28 + $0xc] sm:$0xf] (%p78_p3)  ;;  %v200_v2 = vld [vmem:[%s868_s28 + $0x18] sm:$0xf] (%p78_p3) }
  0x16   : > { %197 = vst [vmem:[%s175_s29] sm:$0xf] (%p78_p3), %v196_v0  ;;  %199 = vst [vmem:[%s175_s29 + $0x4] sm:$0xf] (%p78_p3), %v198_v1  ;;  %v202_v3 = vld [vmem:[%s868_s28 + $0x24] sm:$0xf] (%p78_p3) }
  0x17   : > { %v204_v4 = vld [vmem:[%s868_s28 + $0x30] sm:$0xf] (%p78_p3)  ;;  %201 = vst [vmem:[%s175_s29 + $0x8] sm:$0xf] (%p78_p3), %v200_v2  ;;  %203 = vst [vmem:[%s175_s29 + $0xc] sm:$0xf] (%p78_p3), %v202_v3 }
  0x18   : > { %205 = vst [vmem:[%s175_s29 + $0x10] sm:$0xf] (%p78_p3), %v204_v4  ;;  %v206_v5 = vld [vmem:[%s868_s28 + $0x3c] sm:$0xf] (%p78_p3)  ;;  %v208_v6 = vld [vmem:[%s868_s28 + $0x48] sm:$0xf] (%p78_p3) }
  0x19   : > { %v210_v7 = vld [vmem:[%s868_s28 + $0x54] sm:$0xf]  ;;  %207 = vst [vmem:[%s175_s29 + $0x14] sm:$0xf] %v206_v5  ;;  %209 = vst [vmem:[%s175_s29 + $0x18] sm:$0xf] %v208_v6 }
  0x1a   : > { %211 = vst [vmem:[%s175_s29 + $0x1c] sm:$0xf] %v210_v7  ;;  %v212_v8 = vld [vmem:[%s868_s28 + $0x60] sm:$0xf]  ;;  %v214_v9 = vld [vmem:[%s868_s28 + $0x6c] sm:$0xf] }
  0x1b   : > { %v216_v10 = vld [vmem:[%s868_s28 + $0x78] sm:$0xf]  ;;  %213 = vst [vmem:[%s175_s29 + $0x20] sm:$0xf] %v212_v8  ;;  %215 = vst [vmem:[%s175_s29 + $0x24] sm:$0xf] %v214_v9 }
  0x1c   : > { %217 = vst [vmem:[%s175_s29 + $0x28] sm:$0xf] %v216_v10  ;;  %v218_v11 = vld [vmem:[%s868_s28 + $0x84] sm:$0xf]  ;;  %v220_v12 = vld [vmem:[%s868_s28 + $0x90] sm:$0xf] }
  0x1d   : > { %v222_v13 = vld [vmem:[%s868_s28 + $0x9c] sm:$0xf]  ;;  %219 = vst [vmem:[%s175_s29 + $0x2c] sm:$0xf] %v218_v11  ;;  %221 = vst [vmem:[%s175_s29 + $0x30] sm:$0xf] %v220_v12 }
  0x1e   : > { %223 = vst [vmem:[%s175_s29 + $0x34] sm:$0xf] %v222_v13  ;;  %v224_v14 = vld [vmem:[%s868_s28 + $0xa8] sm:$0xf]  ;;  %v226_v15 = vld [vmem:[%s868_s28 + $0xb4] sm:$0xf] }
  0x1f   : > { %225 = vst [vmem:[%s175_s29 + $0x38] sm:$0xf] %v224_v14  ;;  %227 = vst [vmem:[%s175_s29 + $0x3c] sm:$0xf] %v226_v15 }
  0x20 PF: > { %p652_p8 = scmp.ge.s32.totalorder %s796_s16, 1  ;;  %p287_p9 = scmp.lt.s32.totalorder %s796_s16, 4 }
  0x22   : > { %p288_p10 = pnand %p652_p8, %p287_p9 }
  0x23   : > { %s294_s30 = sand.u32 (!%p288_p10), 1, %s780_s12   ;;  %v798_v16 = vmov (!%p288_p10), 0.0   ;;  %vm799_vm0 = vmmov (!%p288_p10), 0   ;;  %v757_v25 = vld [vmem:[%s922_s0] sm:$0xff] (!%p288_p10)   ;;  %p337_p11 = scmp.lt.s32.totalorder (!%p288_p10), %s788_s14, 2 }
  0x24   : > { %291 = sbr.rel (%p288_p10) target bundleno = 297 (0x129), region = 69  ;;  %687 = vmatprep.subr.bf16.mxu0 (!%p288_p10), %v798_v16  ;;  %s653_s4 = sshll.u32 (!%p288_p10), %s294_s30, 6  ;;  %703 = vmatprep.mubr.msk.bf16.mxu0 (!%p288_p10), %vm799_vm0, %v798_v16 }
  0x25   : > { %s296_s5 = scalar_lea.vmem (!%p288_p10), [#allocation3], %s653_s4  ;;  %s654_s18 = sshll.u32 (!%p288_p10), %s294_s30, 3 }
  0x26   : > { %v749_v17 = vld [vmem:[%s296_s5] sm:$0xff] (!%p288_p10)   ;;  %v750_v18 = vld [vmem:[%s296_s5 + $0x8] sm:$0xff] (!%p288_p10)   ;;  %v751_v19 = vld [vmem:[%s296_s5 + $0x10] sm:$0xff] (!%p288_p10)   ;;  %s326_s19 = scalar_lea.vmem (!%p288_p10), [#allocation4], %s654_s18 }
  0x27   : > { %688 = vmatpush3.bf16.msra.mxu0 (!%p288_p10), %v749_v17  ;;  %v752_v20 = vld [vmem:[%s296_s5 + $0x18] sm:$0xff] (!%p288_p10)   ;;  %v753_v21 = vld [vmem:[%s296_s5 + $0x20] sm:$0xff] (!%p288_p10)   ;;  %v754_v22 = vld [vmem:[%s296_s5 + $0x28] sm:$0xff] (!%p288_p10)  }
  0x28   : > { %689 = vmatprep.subr.bf16.mxu0 (!%p288_p10), %v798_v16  ;;  %v755_v23 = vld [vmem:[%s296_s5 + $0x30] sm:$0xff] (!%p288_p10)   ;;  %v756_v24 = vld [vmem:[%s296_s5 + $0x38] sm:$0xff] (!%p288_p10)  }
  0x2b   : > { %690 = vmatpush3.bf16.msra.mxu0 %v750_v18  ;;  %s338_s8 = scalar_select %p337_p11, %s788_s14, 2 }
  0x2c   : > { %691 = vmatprep.subr.bf16.mxu0 %v798_v16  ;;  %s668_s20 = sshll.u32 (%p855_p6), %s788_s14, 2 }
  0x2d   : > { %s339_s11 = scalar_lea.vmem %s924_s2, %s338_s8  ;;  %s502_s25 = scalar_lea.vmem (%p855_p6), %s925_s3, %s668_s20 }
  0x2e   : > { %v664_v27 = vld [vmem:[%s339_s11] ss:$0 sm:$0xff] }
  0x2f   : > { %692 = vmatpush3.bf16.msra.mxu0 %v751_v19 }
  0x30   : > { %693 = vmatprep.subr.bf16.mxu0 %v798_v16 }
  0x33   : > { %694 = vmatpush3.bf16.msra.mxu0 %v752_v20 }
  0x34   : > { %695 = vmatprep.subr.bf16.mxu0 %v798_v16 }
  0x37   : > { %696 = vmatpush3.bf16.msra.mxu0 %v753_v21 }
  0x38   : > { %697 = vmatprep.subr.bf16.mxu0 %v798_v16 }
  0x3b   : > { %698 = vmatpush3.bf16.msra.mxu0 %v754_v22 }
  0x3c   : > { %699 = vmatprep.subr.bf16.mxu0 %v798_v16 }
  0x3f   : > { %700 = vmatpush3.bf16.msra.mxu0 %v755_v23 }
  0x40   : > { %701 = vmatprep.subr.bf16.mxu0 %v798_v16 }
  0x43   : > { %702 = vmatpush3.bf16.msra.mxu0 %v756_v24 }
  0x46   : > { %704 = vmatmul.mubr.bf16.vlgmr.msra.gmra.mrb[0].mxu0 %v757_v25 }
 0x119   : > { %v456_v26 = vpop.f32.mrb[0].mxu0 }
 0x11a   : > { %v705_v28 = vpop.f32.mrb[1].mxu0  ;;  %v479_v30 = vadd.f32 %v664_v27, %v456_v26  ;;  %497 = sbr.rel (!%p855_p6) target bundleno = 297 (0x129), region = 85 }
 0x11b   : > { %v459_v29 = vpop.f32.mrb[2].mxu0 }
 0x11c   : > { %v480_v31 = vadd.f32 %v664_v27, %v459_v29  ;;  %v706_v32 = vpop.f32.mrb[3].mxu0 }
 0x11e   : > { %v676_v33 = vpack.c.bf16 %v480_v31, %v479_v30 }
 0x120   : > { %677 = vst [vmem:[%s326_s19] sm:$0xff] %v676_v33  }
 0x127   : > { %v518_v34 = vld [vmem:[%s326_s19] sm:$0xf]  ;;  %v520_v35 = vld [vmem:[%s326_s19 + $0x4] sm:$0xf] }
 0x128   : > { %519 = vst [vmem:[%s502_s25] sm:$0xf] %v518_v34  ;;  %521 = vst [vmem:[%s502_s25 + $0xc] sm:$0xf] %v520_v35 }
 0x129 PF: > { %s13_s16 = sadd.s32 1, %s796_s16   ;;  %s927_s12 = smov %s784_s13 }
 0x12a   : > { %p10_p12 = scmp.ge.s32.totalorder %s13_s16, 5   ;;  %s928_s13 = smov %s860_s22 }
 0x12b   : > { %s929_s14 = smov %s792_s15  ;;  %s930_s15 = smov %s932_s17 }
 0x12c   :  { %12 = sbr.rel (!%p10_p12) target bundleno = 3 (0x3), region = 163 }

// kernel: conformer_vision_forward.45
= control target key start
LH: loop header
LB: loop body
LE: loop exit
PB: predicated region body
PF: predicated region fallthrough
CT: control target
= control target key end

     0   :  { %v217_v0 = vmov 0.0   ;;  %vm218_vm0 = vmmov 0   ;;  %s286_s1 = inlined_call_operand.vmem [shape: bf16[128,128], index: 1, kind: input, shape index: {}]   ;;  %s287_s0 = inlined_call_operand.vmem [shape: bf16[16,128], index: 0, kind: input, shape index: {}]   ;;  %s288_s2 = inlined_call_operand.vmem [shape: f32[1,128], index: 2, kind: input, shape index: {}]   ;;  %s289_s3 = inlined_call_operand.vmem [shape: f32[16,128], index: 3, kind: input, shape index: {}]   ;;  %s290_s4 = inlined_call_operand.vmem [shape: f32[16,128], index: 4, kind: output, shape index: {}]  }
   0x1   :  { %186 = vmatprep.subr.bf16.mxu0 %v217_v0  ;;  %v208_v1 = vld [vmem:[%s286_s1] sm:$0xff]   ;;  %202 = vmatprep.mubr.msk.bf16.mxu0 %vm218_vm0, %v217_v0  ;;  %v209_v2 = vld [vmem:[%s286_s1 + $0x8] sm:$0xff]   ;;  %v210_v3 = vld [vmem:[%s286_s1 + $0x10] sm:$0xff]  }
   0x2   :  { %187 = vmatpush3.bf16.msra.mxu0 %v208_v1  ;;  %v211_v4 = vld [vmem:[%s286_s1 + $0x18] sm:$0xff]   ;;  %v212_v5 = vld [vmem:[%s286_s1 + $0x20] sm:$0xff]   ;;  %v213_v6 = vld [vmem:[%s286_s1 + $0x28] sm:$0xff]  }
   0x3   :  { %188 = vmatprep.subr.bf16.mxu0 %v217_v0  ;;  %v214_v7 = vld [vmem:[%s286_s1 + $0x30] sm:$0xff]   ;;  %v215_v8 = vld [vmem:[%s286_s1 + $0x38] sm:$0xff]   ;;  %v216_v9 = vld [vmem:[%s287_s0] sm:$0xff]  }
   0x4   :  { %v176_v10 = vld [vmem:[%s288_s2] ss:$0 sm:$0xff]  ;;  %v158_v16 = vld [vmem:[%s289_s3 + $0x8] sm:$0xff] }
   0x5   :  { %v157_v12 = vld [vmem:[%s289_s3] sm:$0xff] }
   0x6   :  { %189 = vmatpush3.bf16.msra.mxu0 %v209_v2 }
   0x7   :  { %190 = vmatprep.subr.bf16.mxu0 %v217_v0 }
   0xa   :  { %191 = vmatpush3.bf16.msra.mxu0 %v210_v3 }
   0xb   :  { %192 = vmatprep.subr.bf16.mxu0 %v217_v0 }
   0xe   :  { %193 = vmatpush3.bf16.msra.mxu0 %v211_v4 }
   0xf   :  { %194 = vmatprep.subr.bf16.mxu0 %v217_v0 }
  0x12   :  { %195 = vmatpush3.bf16.msra.mxu0 %v212_v5 }
  0x13   :  { %196 = vmatprep.subr.bf16.mxu0 %v217_v0 }
  0x16   :  { %197 = vmatpush3.bf16.msra.mxu0 %v213_v6 }
  0x17   :  { %198 = vmatprep.subr.bf16.mxu0 %v217_v0 }
  0x1a   :  { %199 = vmatpush3.bf16.msra.mxu0 %v214_v7 }
  0x1b   :  { %200 = vmatprep.subr.bf16.mxu0 %v217_v0 }
  0x1e   :  { %201 = vmatpush3.bf16.msra.mxu0 %v215_v8 }
  0x21   :  { %203 = vmatmul.mubr.bf16.vlgmr.msra.gmra.mrb[0].mxu0 %v216_v9 }
  0xf4   :  { %v132_v11 = vpop.f32.mrb[0].mxu0 }
  0xf5   :  { %v155_v13 = vadd.f32 %v176_v10, %v132_v11  ;;  %v204_v14 = vpop.f32.mrb[1].mxu0 }
  0xf6   :  { %v135_v15 = vpop.f32.mrb[2].mxu0 }
  0xf7   :  { %v159_v17 = vadd.f32 %v157_v12, %v155_v13  ;;  %v156_v18 = vadd.f32 %v176_v10, %v135_v15  ;;  %v205_v19 = vpop.f32.mrb[3].mxu0 }
  0xf9   :  { %161 = vst [vmem:[%s290_s4] sm:$0xff] %v159_v17  ;;  %v160_v20 = vadd.f32 %v158_v16, %v156_v18 }
  0xfb   :  { %162 = vst [vmem:[%s290_s4 + $0x8] sm:$0xff] %v160_v20 }

// kernel: conformer_vision_forward.47
= control target key start
LH: loop header
LB: loop body
LE: loop exit
PB: predicated region body
PF: predicated region fallthrough
CT: control target
= control target key end

     0   :  { %v295_v1 = vmov 0   ;;  %v191_v18 = vlaneseq  ;;  %s373_s1 = inlined_call_operand.vmem [shape: bf16[128,256], index: 1, kind: input, shape index: {}]   ;;  %s374_s0 = inlined_call_operand.vmem [shape: bf16[16,128], index: 0, kind: input, shape index: {}]   ;;  %s375_s2 = inlined_call_operand.vmem [shape: f32[1,256], index: 2, kind: input, shape index: {}]   ;;  %s376_s3 = inlined_call_operand.vmem [shape: bf16[16,128], index: 3, kind: output, shape index: {}]  }
   0x1   :  { %v262_v0 = vld [vmem:[%s373_s1 + $0x4] ss:$8 sps:$4 sm:$0xff]   ;;  %163 = vmatprep.mubr.bf16.mxu0 %v295_v1  ;;  %v264_v2 = vld [vmem:[%s373_s1] ss:$8 sps:$4 sm:$0xff]   ;;  %v265_v3 = vld [vmem:[%s373_s1 + $0x14] ss:$8 sps:$4 sm:$0xff]  }
   0x2   :  { %131 = vmatprep.subr.bf16.mxu0 %v262_v0  ;;  %v267_v4 = vld [vmem:[%s373_s1 + $0x10] ss:$8 sps:$4 sm:$0xff]   ;;  %v268_v5 = vld [vmem:[%s373_s1 + $0x24] ss:$8 sps:$4 sm:$0xff]   ;;  %v270_v6 = vld [vmem:[%s373_s1 + $0x20] ss:$8 sps:$4 sm:$0xff]  }
   0x3   :  { %132 = vmatpush1.bf16.msra.mxu0 %v264_v2  ;;  %v271_v7 = vld [vmem:[%s373_s1 + $0x34] ss:$8 sps:$4 sm:$0xff]   ;;  %v273_v8 = vld [vmem:[%s373_s1 + $0x30] ss:$8 sps:$4 sm:$0xff]   ;;  %v274_v9 = vld [vmem:[%s373_s1 + $0x44] ss:$8 sps:$4 sm:$0xff]  }
   0x4   :  { %133 = vmatprep.subr.bf16.mxu0 %v265_v3  ;;  %v276_v10 = vld [vmem:[%s373_s1 + $0x40] ss:$8 sps:$4 sm:$0xff]   ;;  %v277_v11 = vld [vmem:[%s373_s1 + $0x54] ss:$8 sps:$4 sm:$0xff]   ;;  %v279_v12 = vld [vmem:[%s373_s1 + $0x50] ss:$8 sps:$4 sm:$0xff]  }
   0x5   :  { %v280_v13 = vld [vmem:[%s373_s1 + $0x64] ss:$8 sps:$4 sm:$0xff]   ;;  %v282_v14 = vld [vmem:[%s373_s1 + $0x60] ss:$8 sps:$4 sm:$0xff]   ;;  %v283_v15 = vld [vmem:[%s373_s1 + $0x74] ss:$8 sps:$4 sm:$0xff]  }
   0x6   :  { %v285_v16 = vld [vmem:[%s373_s1 + $0x70] ss:$8 sps:$4 sm:$0xff]   ;;  %v286_v17 = vld [vmem:[%s374_s0] sm:$0xff]   ;;  %v192_v19 = vshrl.u32 %v191_v18, 7 }
   0x7   :  { %134 = vmatpush1.bf16.msra.mxu0 %v267_v4  ;;  %v189_v21 = vld [vmem:[%s375_s2] sm:$0x3] }
   0x8   :  { %135 = vmatprep.subr.bf16.mxu0 %v268_v5  ;;  %v197_v20 = vsub.s32 1, %v192_v19  ;;  %v193_v35 = vsub.s32 0, %v192_v19 }
   0xa   :  { %v198_v22 = vrot.slane %v189_v21, %v197_v20  ;;  %v194_v36 = vrot.slane %v189_v21, %v193_v35 }
   0xb   :  { %136 = vmatpush1.bf16.msra.mxu0 %v270_v6 }
   0xc   :  { %137 = vmatprep.subr.bf16.mxu0 %v271_v7 }
   0xf   :  { %138 = vmatpush1.bf16.msra.mxu0 %v273_v8 }
  0x10   :  { %139 = vmatprep.subr.bf16.mxu0 %v274_v9 }
  0x13   :  { %140 = vmatpush1.bf16.msra.mxu0 %v276_v10 }
  0x14   :  { %141 = vmatprep.subr.bf16.mxu0 %v277_v11 }
  0x17   :  { %142 = vmatpush1.bf16.msra.mxu0 %v279_v12 }
  0x18   :  { %143 = vmatprep.subr.bf16.mxu0 %v280_v13 }
  0x1b   :  { %144 = vmatpush1.bf16.msra.mxu0 %v282_v14 }
  0x1c   :  { %145 = vmatprep.subr.bf16.mxu0 %v283_v15 }
  0x1f   :  { %146 = vmatpush1.bf16.msra.mxu0 %v285_v16 }
  0x22   :  { %164 = vmatmul.mubr.bf16.vlgmr.msra.gmra.mrb[0].mxu0 %v286_v17 }
  0xf5   :  { %v165_v23 = vpop.f32.mrb[0].mxu0 }
  0xf6   :  { %v167_v24 = vpop.f32.mrb[1].mxu0  ;;  %v201_v37 = vadd.f32 %v194_v36, %v165_v23 }
  0xf7   :  { %v202_v25 = vadd.f32 %v198_v22, %v167_v24  ;;  %v169_v26 = vpop.f32.mrb[2].mxu0 }
  0xf8   :  { %v171_v27 = vpop.f32.mrb[3].mxu0  ;;  %v203_v40 = vadd.f32 %v194_v36, %v169_v26 }
  0xf9   :  { %v250_v28 = vmul.f32 -1.442695, %v202_v25  ;;  %v204_v29 = vadd.f32 %v198_v22, %v171_v27 }
  0xfb   :  { %287 = vpow2.f32 %v250_v28  ;;  %v251_v30 = vmul.f32 -1.442695, %v204_v29 }
  0xfd   :  { %289 = vpow2.f32 %v251_v30 }
 0x105   :  { %v288_v31 = vpop.eup %287 }
 0x106   :  { %v211_v32 = vadd.f32 1.0, %v288_v31 }
 0x107   :  { %v290_v33 = vpop.eup %289 }
 0x108   :  { %291 = vrcp.f32 %v211_v32  ;;  %v212_v34 = vadd.f32 1.0, %v290_v33 }
 0x10a   :  { %293 = vrcp.f32 %v212_v34 }
 0x112   :  { %v292_v38 = vpop.eup %291 }
 0x113   :  { %v217_v39 = vmul.f32 %v292_v38, %v201_v37 }
 0x114   :  { %v294_v41 = vpop.eup %293 }
 0x115   :  { %v218_v42 = vmul.f32 %v294_v41, %v203_v40 }
 0x117   :  { %v259_v43 = vpack.c.bf16 %v218_v42, %v217_v39 }
 0x119   :  { %260 = vst [vmem:[%s376_s3] sm:$0xff] %v259_v43  }

// kernel: conformer_vision_forward.44
= control target key start
LH: loop header
LB: loop body
LE: loop exit
PB: predicated region body
PF: predicated region fallthrough
CT: control target
= control target key end

     0   :  { %vm39_vm0 = vcmask 261120   ;;  %v1081_v0 = vmov 0.0   ;;  %vm1082_vm1 = vmmov 0   ;;  %vm416_vm2 = vcmask 64512   ;;  %s1335_s1 = inlined_call_operand.vmem [shape: bf16[8,8,32], index: 1, kind: input, shape index: {}]   ;;  %s1336_s0 = inlined_call_operand.vmem [shape: bf16[8,8,32], index: 0, kind: input, shape index: {}]   ;;  %s1337_s2 = inlined_call_operand.vmem [shape: bf16[8,8,32], index: 2, kind: input, shape index: {}]   ;;  %s1338_s3 = inlined_call_operand.vmem [shape: bf16[8,8,32], index: 3, kind: output, shape index: {}]  }
   0x1   :  { %951 = vmatprep.subr.bf16.mxu0 %v1081_v0  ;;  %957 = vmatprep.subr.bf16.mxu1 %v1081_v0  ;;  %v23_v1 = vld [vmem:[%s1335_s1] sm:$0xf]  ;;  %v24_v2 = vld [vmem:[%s1335_s1 + $0x4] sm:$0xf]  ;;  %v25_v5 = vld [vmem:[%s1335_s1 + $0x8] sm:$0xf] }
   0x2   :  { %v44_v3 = vsel %vm39_vm0, %v23_v1, 0  ;;  %v90_v4 = vsel %vm39_vm0, %v24_v2, 0  ;;  %953 = vmatprep.mubr.msk.bf16.mxu0 %vm1082_vm1, %v1081_v0  ;;  %959 = vmatprep.mubr.msk.bf16.mxu1 %vm1082_vm1, %v1081_v0  ;;  %v26_v6 = vld [vmem:[%s1335_s1 + $0xc] sm:$0xf]  ;;  %v15_v7 = vld [vmem:[%s1336_s0] sm:$0xf] }
   0x3   :  { %952 = vmatpush3.bf16.xpose.msra.mxu0 %v44_v3  ;;  %958 = vmatpush3.bf16.xpose.msra.mxu1 %v90_v4  ;;  %v16_v8 = vld [vmem:[%s1336_s0 + $0x4] sm:$0xf]  ;;  %v136_v9 = vsel %vm39_vm0, %v25_v5, 0  ;;  %v182_v10 = vsel %vm39_vm0, %v26_v6, 0  ;;  %v27_v11 = vld [vmem:[%s1335_s1 + $0x10] sm:$0xf] }
   0x4   :  { %963 = vmatprep.subr.bf16.mxu0 %v1081_v0  ;;  %969 = vmatprep.subr.bf16.mxu1 %v1081_v0  ;;  %v28_v12 = vld [vmem:[%s1335_s1 + $0x14] sm:$0xf]  ;;  %v17_v13 = vld [vmem:[%s1336_s0 + $0x8] sm:$0xf]  ;;  %v18_v14 = vld [vmem:[%s1336_s0 + $0xc] sm:$0xf] }
   0x5   :  { %v228_v15 = vsel %vm39_vm0, %v27_v11, 0  ;;  %v274_v16 = vsel %vm39_vm0, %v28_v12, 0  ;;  %v29_v17 = vld [vmem:[%s1335_s1 + $0x18] sm:$0xf]  ;;  %v30_v18 = vld [vmem:[%s1335_s1 + $0x1c] sm:$0xf] }
   0x6   :  { %v19_v19 = vld [vmem:[%s1336_s0 + $0x10] sm:$0xf]  ;;  %v20_v20 = vld [vmem:[%s1336_s0 + $0x14] sm:$0xf]  ;;  %v320_v21 = vsel %vm39_vm0, %v29_v17, 0  ;;  %v366_v22 = vsel %vm39_vm0, %v30_v18, 0 }
   0x7   :  { %v21_v23 = vld [vmem:[%s1336_s0 + $0x18] sm:$0xf]  ;;  %v22_v24 = vld [vmem:[%s1336_s0 + $0x1c] sm:$0xf]  ;;  %vm516_vm3 = vcmask 1043456   ;;  %vm890_vm4 = vcmask 257024  }
   0xa   :  { %954 = vmatmul.mubr.msk.bf16.vlgmr.msra.gmra.mrb[0].mxu0 %vm39_vm0, %v15_v7  ;;  %960 = vmatmul.mubr.msk.bf16.vlgmr.msra.gmra.mrb[0].mxu1 %vm39_vm0, %v16_v8 }
   0xb   :  { %964 = vmatpush3.bf16.xpose.msra.mxu0 %v136_v9  ;;  %970 = vmatpush3.bf16.xpose.msra.mxu1 %v182_v10 }
   0xc   :  { %965 = vmatprep.mubr.msk.bf16.mxu0 %vm1082_vm1, %v1081_v0  ;;  %971 = vmatprep.mubr.msk.bf16.mxu1 %vm1082_vm1, %v1081_v0 }
   0xd   :  { %975 = vmatprep.subr.bf16.mxu0 %v1081_v0  ;;  %981 = vmatprep.subr.bf16.mxu1 %v1081_v0 }
  0x12   :  { %966 = vmatmul.mubr.msk.bf16.vlgmr.msra.gmra.mrb[4].mxu0 %vm39_vm0, %v17_v13  ;;  %972 = vmatmul.mubr.msk.bf16.vlgmr.msra.gmra.mrb[4].mxu1 %vm39_vm0, %v18_v14 }
  0x13   :  { %976 = vmatpush3.bf16.xpose.msra.mxu0 %v228_v15  ;;  %982 = vmatpush3.bf16.xpose.msra.mxu1 %v274_v16 }
  0x14   :  { %977 = vmatprep.mubr.msk.bf16.mxu0 %vm1082_vm1, %v1081_v0  ;;  %983 = vmatprep.mubr.msk.bf16.mxu1 %vm1082_vm1, %v1081_v0 }
  0x15   :  { %987 = vmatprep.subr.bf16.mxu0 %v1081_v0  ;;  %993 = vmatprep.subr.bf16.mxu1 %v1081_v0 }
  0x1a   :  { %978 = vmatmul.mubr.msk.bf16.vlgmr.msra.gmra.mrb[8].mxu0 %vm39_vm0, %v19_v19  ;;  %984 = vmatmul.mubr.msk.bf16.vlgmr.msra.gmra.mrb[8].mxu1 %vm39_vm0, %v20_v20 }
  0x1b   :  { %988 = vmatpush3.bf16.xpose.msra.mxu0 %v320_v21  ;;  %994 = vmatpush3.bf16.xpose.msra.mxu1 %v366_v22 }
  0x1c   :  { %989 = vmatprep.mubr.msk.bf16.mxu0 %vm1082_vm1, %v1081_v0  ;;  %995 = vmatprep.mubr.msk.bf16.mxu1 %vm1082_vm1, %v1081_v0 }
  0x1d   :  { %999 = vmatprep.subr.bf16.mxu0 %v1081_v0  ;;  %1005 = vmatprep.subr.bf16.mxu1 %v1081_v0 }
  0x22   :  { %990 = vmatmul.mubr.msk.bf16.vlgmr.msra.gmra.mrb[12].mxu0 %vm39_vm0, %v21_v23  ;;  %996 = vmatmul.mubr.msk.bf16.vlgmr.msra.gmra.mrb[12].mxu1 %vm39_vm0, %v22_v24 }
  0x23   :  { %1001 = vmatprep.mubr.msk.bf16.mxu0 %vm1082_vm1, %v1081_v0  ;;  %1007 = vmatprep.mubr.msk.bf16.mxu1 %vm1082_vm1, %v1081_v0 }
  0xdd   :  { %v80_v25 = vpop.f32.mrb[0].mxu0  ;;  %v126_v26 = vpop.f32.mrb[0].mxu1 }
  0xde   :  { %v408_v27 = vmul.f32 0.17677669, %v80_v25  ;;  %v955_v28 = vpop.f32.mrb[1].mxu0  ;;  %v409_v29 = vmul.f32 0.17677669, %v126_v26  ;;  %v961_v30 = vpop.f32.mrb[1].mxu1 }
  0xdf   :  { %v83_v31 = vpop.f32.mrb[2].mxu0  ;;  %v129_v32 = vpop.f32.mrb[2].mxu1 }
  0xe0   :  { %v956_v33 = vpop.f32.mrb[3].mxu0  ;;  %v417_v34 = vsel %vm416_vm2, %v408_v27, -inf  ;;  %v962_v35 = vpop.f32.mrb[3].mxu1  ;;  %v420_v36 = vsel %vm416_vm2, %v409_v29, -inf }
  0xe1   :  { %418 = vmax.xlane.f32.xlu0 %v417_v34 }
  0xe5   :  { %421 = vmax.xlane.f32.xlu0 %v420_v36  ;;  %v172_v37 = vpop.f32.mrb[4].mxu0  ;;  %v218_v38 = vpop.f32.mrb[4].mxu1 }
  0xe6   :  { %v410_v39 = vmul.f32 0.17677669, %v172_v37  ;;  %v967_v40 = vpop.f32.mrb[5].mxu0  ;;  %v411_v41 = vmul.f32 0.17677669, %v218_v38  ;;  %v973_v42 = vpop.f32.mrb[5].mxu1 }
  0xe7   :  { %v175_v43 = vpop.f32.mrb[6].mxu0  ;;  %v221_v44 = vpop.f32.mrb[6].mxu1 }
  0xe8   :  { %v968_v45 = vpop.f32.mrb[7].mxu0  ;;  %v423_v46 = vsel %vm416_vm2, %v410_v39, -inf  ;;  %v974_v47 = vpop.f32.mrb[7].mxu1  ;;  %v426_v48 = vsel %vm416_vm2, %v411_v41, -inf }
  0xe9   :  { %424 = vmax.xlane.f32.xlu1 %v423_v46 }
  0xed   :  { %v310_v49 = vpop.f32.mrb[8].mxu1  ;;  %427 = vmax.xlane.f32.xlu1 %v426_v48  ;;  %v264_v50 = vpop.f32.mrb[8].mxu0 }
  0xee   :  { %v413_v51 = vmul.f32 0.17677669, %v310_v49  ;;  %v412_v52 = vmul.f32 0.17677669, %v264_v50  ;;  %v979_v53 = vpop.f32.mrb[9].mxu0  ;;  %v985_v54 = vpop.f32.mrb[9].mxu1 }
  0xef   :  { %v313_v55 = vpop.f32.mrb[10].mxu1  ;;  %v267_v56 = vpop.f32.mrb[10].mxu0  ;;  %v31_v50 = vld [vmem:[%s1337_s2] sm:$0xf]  ;;  %v33_v54 = vld [vmem:[%s1337_s2 + $0x8] sm:$0xf] }
  0xf0   :  { %v432_v57 = vsel %vm416_vm2, %v413_v51, -inf  ;;  %v429_v58 = vsel %vm416_vm2, %v412_v52, -inf  ;;  %v980_v59 = vpop.f32.mrb[11].mxu0  ;;  %v986_v60 = vpop.f32.mrb[11].mxu1  ;;  %v610_v55 = vsel %vm516_vm3, %v33_v54, 0 }
  0xf1   :  { %433 = vmax.xlane.f32.xlu1 %v432_v57  ;;  %430 = vmax.xlane.f32.xlu0 %v429_v58  ;;  %v34_v56 = vld [vmem:[%s1337_s2 + $0xc] sm:$0xf]  ;;  %v35_v58 = vld [vmem:[%s1337_s2 + $0x10] sm:$0xf]  ;;  %v36_v60 = vld [vmem:[%s1337_s2 + $0x14] sm:$0xf] }
  0xf2   :  { %v656_v57 = vsel %vm516_vm3, %v34_v56, 0  ;;  %v702_v59 = vsel %vm516_vm3, %v35_v58, 0 }
  0xf5   :  { %v356_v61 = vpop.f32.mrb[12].mxu0  ;;  %v402_v62 = vpop.f32.mrb[12].mxu1 }
  0xf6   :  { %v414_v63 = vmul.f32 0.17677669, %v356_v61  ;;  %v415_v1 = vmul.f32 0.17677669, %v402_v62  ;;  %v991_v2 = vpop.f32.mrb[13].mxu0  ;;  %v997_v3 = vpop.f32.mrb[13].mxu1 }
  0xf7   :  { %v405_v4 = vpop.f32.mrb[14].mxu1  ;;  %v359_v5 = vpop.f32.mrb[14].mxu0  ;;  %v748_v61 = vsel %vm516_vm3, %v36_v60, 0  ;;  %v37_v62 = vld [vmem:[%s1337_s2 + $0x18] sm:$0xf] }
  0xf8   :  { %v438_v6 = vsel %vm416_vm2, %v415_v1, -inf  ;;  %v435_v7 = vsel %vm416_vm2, %v414_v63, -inf  ;;  %v992_v8 = vpop.f32.mrb[15].mxu0  ;;  %v998_v9 = vpop.f32.mrb[15].mxu1 }
  0xf9   :  { %439 = vmax.xlane.f32.xlu1 %v438_v6  ;;  %436 = vmax.xlane.f32.xlu0 %v435_v7 }
 0x16e   :  { %v419_v10 = vpop.xlane.xlu0 %418 }
 0x16f   :  { %v441_v11 = vsub.f32 %v408_v27, %v419_v10 }
 0x171   :  { %v449_v12 = vmul.f32 1.442695, %v441_v11 }
 0x172   :  { %v422_v13 = vpop.xlane.xlu0 %421 }
 0x173   :  { %1049 = vpow2.f32 %v449_v12  ;;  %v442_v14 = vsub.f32 %v409_v29, %v422_v13 }
 0x175   :  { %v451_v15 = vmul.f32 1.442695, %v442_v14 }
 0x176   :  { %v425_v16 = vpop.xlane.xlu1 %424 }
 0x177   :  { %1051 = vpow2.f32 %v451_v15  ;;  %v443_v17 = vsub.f32 %v410_v39, %v425_v16 }
 0x179   :  { %v453_v18 = vmul.f32 1.442695, %v443_v17 }
 0x17a   :  { %v428_v19 = vpop.xlane.xlu1 %427 }
 0x17b   :  { %1053 = vpow2.f32 %v453_v18  ;;  %v444_v20 = vsub.f32 %v411_v41, %v428_v19 }
 0x17d   :  { %v1205_v21 = vpop.eup %1049  ;;  %v455_v22 = vmul.f32 1.442695, %v444_v20 }
 0x17e   :  { %v434_v23 = vpop.xlane.xlu1 %433  ;;  %v431_v24 = vpop.xlane.xlu0 %430  ;;  %v465_v25 = vsel %vm416_vm2, %v1205_v21, 0.0 }
 0x17f   :  { %1055 = vpow2.f32 %v455_v22  ;;  %v446_v26 = vsub.f32 %v413_v51, %v434_v23  ;;  %v445_v27 = vsub.f32 %v412_v52, %v431_v24  ;;  %466 = vadd.xlane.f32.xlu0 %v465_v25  ;;  %v518_v51 = vsel %vm516_vm3, %v31_v50, 0  ;;  %v32_v52 = vld [vmem:[%s1337_s2 + $0x4] sm:$0xf] }
 0x180   :  { %1000 = vmatpush3.bf16.msra.mxu0 %v518_v51  ;;  %v564_v53 = vsel %vm516_vm3, %v32_v52, 0 }
 0x181   :  { %v1209_v28 = vpop.eup %1051  ;;  %v459_v29 = vmul.f32 1.442695, %v446_v26  ;;  %v457_v30 = vmul.f32 1.442695, %v445_v27  ;;  %1011 = vmatprep.subr.bf16.mxu0 %v1081_v0  ;;  %1006 = vmatpush3.bf16.msra.mxu1 %v564_v53 }
 0x182   :  { %v468_v31 = vsel %vm416_vm2, %v1209_v28, 0.0  ;;  %1017 = vmatprep.subr.bf16.mxu1 %v1081_v0 }
 0x183   :  { %1057 = vpow2.f32 %v459_v29  ;;  %469 = vadd.xlane.f32.xlu1 %v468_v31 }
 0x184   :  { %1059 = vpow2.f32 %v457_v30 }
 0x185   :  { %v1213_v32 = vpop.eup %1053 }
 0x186   :  { %v440_v33 = vpop.xlane.xlu1 %439  ;;  %v437_v34 = vpop.xlane.xlu0 %436  ;;  %v471_v35 = vsel %vm416_vm2, %v1213_v32, 0.0 }
 0x187   :  { %v448_v36 = vsub.f32 %v415_v1, %v440_v33  ;;  %v447_v37 = vsub.f32 %v414_v63, %v437_v34  ;;  %472 = vadd.xlane.f32.xlu0 %v471_v35  ;;  %v794_v63 = vsel %vm516_vm3, %v37_v62, 0  ;;  %v38_v1 = vld [vmem:[%s1337_s2 + $0x1c] sm:$0xf] }
 0x188   :  { %v840_v2 = vsel %vm516_vm3, %v38_v1, 0 }
 0x189   :  { %v1217_v38 = vpop.eup %1055  ;;  %v463_v39 = vmul.f32 1.442695, %v448_v36  ;;  %v461_v40 = vmul.f32 1.442695, %v447_v37 }
 0x18a   :  { %v474_v41 = vsel %vm416_vm2, %v1217_v38, 0.0 }
 0x18b   :  { %1061 = vpow2.f32 %v463_v39  ;;  %475 = vadd.xlane.f32.xlu1 %v474_v41 }
 0x18c   :  { %1063 = vpow2.f32 %v461_v40 }
 0x18d   :  { %v1221_v42 = vpop.eup %1057 }
 0x18e   :  { %v1223_v43 = vpop.eup %1059  ;;  %v480_v44 = vsel %vm416_vm2, %v1221_v42, 0.0 }
 0x18f   :  { %481 = vadd.xlane.f32.xlu1 %v480_v44  ;;  %v477_v45 = vsel %vm416_vm2, %v1223_v43, 0.0 }
 0x190   :  { %478 = vadd.xlane.f32.xlu0 %v477_v45 }
 0x195   :  { %v1229_v46 = vpop.eup %1061 }
 0x196   :  { %v1231_v47 = vpop.eup %1063  ;;  %v486_v48 = vsel %vm416_vm2, %v1229_v46, 0.0 }
 0x197   :  { %487 = vadd.xlane.f32.xlu1 %v486_v48  ;;  %v483_v49 = vsel %vm416_vm2, %v1231_v47, 0.0 }
 0x198   :  { %484 = vadd.xlane.f32.xlu0 %v483_v49 }
 0x20c   :  { %v467_v3 = vpop.xlane.xlu0 %466 }
 0x20d   :  { %1065 = vrcp.f32 %v467_v3 }
 0x210   :  { %v470_v4 = vpop.xlane.xlu1 %469 }
 0x211   :  { %1067 = vrcp.f32 %v470_v4 }
 0x214   :  { %v473_v5 = vpop.xlane.xlu0 %472 }
 0x215   :  { %1069 = vrcp.f32 %v473_v5 }
 0x217   :  { %v1066_v6 = vpop.eup %1065 }
 0x218   :  { %v497_v7 = vmul.f32 %v1066_v6, %v1205_v21  ;;  %v476_v8 = vpop.xlane.xlu1 %475 }
 0x219   :  { %1071 = vrcp.f32 %v476_v8 }
 0x21a   :  { %v505_v9 = vpack.c.bf16 %v497_v7, %v497_v7 }
 0x21b   :  { %v1068_v10 = vpop.eup %1067 }
 0x21c   :  { %v498_v11 = vmul.f32 %v1068_v10, %v1209_v28  ;;  %v482_v12 = vpop.xlane.xlu1 %481  ;;  %1002 = vmatmul.mubr.msk.bf16.vlgmr.msra.gmra.mrb[16].mxu0 %vm416_vm2, %v505_v9 }
 0x21d   :  { %1073 = vrcp.f32 %v482_v12  ;;  %v479_v13 = vpop.xlane.xlu0 %478  ;;  %1012 = vmatpush3.bf16.msra.mxu0 %v610_v55  ;;  %1013 = vmatprep.mubr.msk.bf16.mxu0 %vm1082_vm1, %v1081_v0 }
 0x21e   :  { %1075 = vrcp.f32 %v479_v13  ;;  %v506_v14 = vpack.c.bf16 %v498_v11, %v498_v11  ;;  %1023 = vmatprep.subr.bf16.mxu0 %v1081_v0 }
 0x21f   :  { %v1070_v15 = vpop.eup %1069 }
 0x220   :  { %v499_v16 = vmul.f32 %v1070_v15, %v1213_v32  ;;  %1008 = vmatmul.mubr.msk.bf16.vlgmr.msra.gmra.mrb[16].mxu1 %vm416_vm2, %v506_v14 }
 0x221   :  { %1018 = vmatpush3.bf16.msra.mxu1 %v656_v57  ;;  %1019 = vmatprep.mubr.msk.bf16.mxu1 %vm1082_vm1, %v1081_v0 }
 0x222   :  { %v507_v17 = vpack.c.bf16 %v499_v16, %v499_v16  ;;  %1029 = vmatprep.subr.bf16.mxu1 %v1081_v0 }
 0x223   :  { %v1072_v18 = vpop.eup %1071 }
 0x224   :  { %v500_v19 = vmul.f32 %v1072_v18, %v1217_v38  ;;  %v488_v20 = vpop.xlane.xlu1 %487  ;;  %1014 = vmatmul.mubr.msk.bf16.vlgmr.msra.gmra.mrb[20].mxu0 %vm416_vm2, %v507_v17 }
 0x225   :  { %1077 = vrcp.f32 %v488_v20  ;;  %v485_v21 = vpop.xlane.xlu0 %484  ;;  %1024 = vmatpush3.bf16.msra.mxu0 %v702_v59  ;;  %1025 = vmatprep.mubr.msk.bf16.mxu0 %vm1082_vm1, %v1081_v0 }
 0x226   :  { %1079 = vrcp.f32 %v485_v21  ;;  %v508_v22 = vpack.c.bf16 %v500_v19, %v500_v19  ;;  %1035 = vmatprep.subr.bf16.mxu0 %v1081_v0 }
 0x227   :  { %v1074_v23 = vpop.eup %1073 }
 0x228   :  { %v1076_v24 = vpop.eup %1075  ;;  %1020 = vmatmul.mubr.msk.bf16.vlgmr.msra.gmra.mrb[20].mxu1 %vm416_vm2, %v508_v22  ;;  %v502_v26 = vmul.f32 %v1074_v23, %v1221_v42 }
 0x229   :  { %v501_v25 = vmul.f32 %v1076_v24, %v1223_v43  ;;  %1030 = vmatpush3.bf16.msra.mxu1 %v748_v61  ;;  %1031 = vmatprep.mubr.msk.bf16.mxu1 %vm1082_vm1, %v1081_v0 }
 0x22a   :  { %1041 = vmatprep.subr.bf16.mxu1 %v1081_v0  ;;  %v510_v28 = vpack.c.bf16 %v502_v26, %v502_v26 }
 0x22b   :  { %v509_v27 = vpack.c.bf16 %v501_v25, %v501_v25 }
 0x22d   :  { %1026 = vmatmul.mubr.msk.bf16.vlgmr.msra.gmra.mrb[24].mxu0 %vm416_vm2, %v509_v27 }
 0x22e   :  { %1036 = vmatpush3.bf16.msra.mxu0 %v794_v63  ;;  %1037 = vmatprep.mubr.msk.bf16.mxu0 %vm1082_vm1, %v1081_v0 }
 0x22f   :  { %v1078_v29 = vpop.eup %1077 }
 0x230   :  { %v1080_v30 = vpop.eup %1079  ;;  %1032 = vmatmul.mubr.msk.bf16.vlgmr.msra.gmra.mrb[24].mxu1 %vm416_vm2, %v510_v28  ;;  %v504_v32 = vmul.f32 %v1078_v29, %v1229_v46 }
 0x231   :  { %v503_v31 = vmul.f32 %v1080_v30, %v1231_v47  ;;  %1042 = vmatpush3.bf16.msra.mxu1 %v840_v2  ;;  %1043 = vmatprep.mubr.msk.bf16.mxu1 %vm1082_vm1, %v1081_v0 }
 0x232   :  { %v512_v34 = vpack.c.bf16 %v504_v32, %v504_v32 }
 0x233   :  { %v511_v33 = vpack.c.bf16 %v503_v31, %v503_v31 }
 0x235   :  { %1038 = vmatmul.mubr.msk.bf16.vlgmr.msra.gmra.mrb[28].mxu0 %vm416_vm2, %v511_v33 }
 0x238   :  { %1044 = vmatmul.mubr.msk.bf16.vlgmr.msra.gmra.mrb[28].mxu1 %vm416_vm2, %v512_v34 }
 0x2ef   :  { %v554_v35 = vpop.f32.mrb[16].mxu0 }
 0x2f0   :  { %v882_v36 = vpack.c.bf16 %v554_v35, %v554_v35  ;;  %v1003_v37 = vpop.f32.mrb[17].mxu0 }
 0x2f1   :  { %v557_v38 = vpop.f32.mrb[18].mxu0 }
 0x2f2   :  { %891 = vst.msk [vmem:[%s1338_s3] sm:$0xf] %vm890_vm4, %v882_v36  ;;  %v1004_v39 = vpop.f32.mrb[19].mxu0 }
 0x2f3   :  { %v600_v0 = vpop.f32.mrb[16].mxu1 }
 0x2f4   :  { %v883_v40 = vpack.c.bf16 %v600_v0, %v600_v0  ;;  %v1009_v41 = vpop.f32.mrb[17].mxu1 }
 0x2f5   :  { %v603_v42 = vpop.f32.mrb[18].mxu1 }
 0x2f6   :  { %892 = vst.msk [vmem:[%s1338_s3 + $0x4] sm:$0xf] %vm890_vm4, %v883_v40  ;;  %v1010_v43 = vpop.f32.mrb[19].mxu1 }
 0x2f7   :  { %v646_v44 = vpop.f32.mrb[20].mxu0 }
 0x2f8   :  { %v884_v45 = vpack.c.bf16 %v646_v44, %v646_v44  ;;  %v1015_v46 = vpop.f32.mrb[21].mxu0 }
 0x2f9   :  { %v649_v47 = vpop.f32.mrb[22].mxu0 }
 0x2fa   :  { %893 = vst.msk [vmem:[%s1338_s3 + $0x8] sm:$0xf] %vm890_vm4, %v884_v45  ;;  %v1016_v48 = vpop.f32.mrb[23].mxu0 }
 0x2fb   :  { %v692_v49 = vpop.f32.mrb[20].mxu1 }
 0x2fc   :  { %v885_v50 = vpack.c.bf16 %v692_v49, %v692_v49  ;;  %v1021_v51 = vpop.f32.mrb[21].mxu1 }
 0x2fd   :  { %v695_v52 = vpop.f32.mrb[22].mxu1 }
 0x2fe   :  { %894 = vst.msk [vmem:[%s1338_s3 + $0xc] sm:$0xf] %vm890_vm4, %v885_v50  ;;  %v1022_v53 = vpop.f32.mrb[23].mxu1 }
 0x300   :  { %v738_v54 = vpop.f32.mrb[24].mxu0 }
 0x301   :  { %v886_v55 = vpack.c.bf16 %v738_v54, %v738_v54  ;;  %v1027_v56 = vpop.f32.mrb[25].mxu0 }
 0x302   :  { %v741_v57 = vpop.f32.mrb[26].mxu0 }
 0x303   :  { %895 = vst.msk [vmem:[%s1338_s3 + $0x10] sm:$0xf] %vm890_vm4, %v886_v55  ;;  %v1028_v58 = vpop.f32.mrb[27].mxu0  ;;  %v784_v59 = vpop.f32.mrb[24].mxu1 }
 0x304   :  { %v887_v60 = vpack.c.bf16 %v784_v59, %v784_v59  ;;  %v1033_v61 = vpop.f32.mrb[25].mxu1 }
 0x305   :  { %v787_v62 = vpop.f32.mrb[26].mxu1 }
 0x306   :  { %896 = vst.msk [vmem:[%s1338_s3 + $0x14] sm:$0xf] %vm890_vm4, %v887_v60  ;;  %v1034_v63 = vpop.f32.mrb[27].mxu1 }
 0x308   :  { %v830_v1 = vpop.f32.mrb[28].mxu0 }
 0x309   :  { %v888_v2 = vpack.c.bf16 %v830_v1, %v830_v1  ;;  %v1039_v3 = vpop.f32.mrb[29].mxu0 }
 0x30a   :  { %v833_v4 = vpop.f32.mrb[30].mxu0 }
 0x30b   :  { %897 = vst.msk [vmem:[%s1338_s3 + $0x18] sm:$0xf] %vm890_vm4, %v888_v2  ;;  %v1040_v5 = vpop.f32.mrb[31].mxu0  ;;  %v876_v6 = vpop.f32.mrb[28].mxu1 }
 0x30c   :  { %v889_v7 = vpack.c.bf16 %v876_v6, %v876_v6  ;;  %v1045_v8 = vpop.f32.mrb[29].mxu1 }
 0x30d   :  { %v879_v9 = vpop.f32.mrb[30].mxu1 }
 0x30e   :  { %898 = vst.msk [vmem:[%s1338_s3 + $0x1c] sm:$0xf] %vm890_vm4, %v889_v7  ;;  %v1046_v10 = vpop.f32.mrb[31].mxu1 }

// kernel: conformer_vision_forward.48
= control target key start
LH: loop header
LB: loop body
LE: loop exit
PB: predicated region body
PF: predicated region fallthrough
CT: control target
= control target key end

     0   :  { %s468_s18 = smov 0   ;;  %s504_s0 = inlined_call_operand.vmem [shape: bf16[2,14,128], index: 0, kind: input, shape index: {}]   ;;  %s505_s1 = inlined_call_operand.vmem [shape: f32[7,128], index: 1, kind: input, shape index: {}]   ;;  %s506_s2 = inlined_call_operand.vmem [shape: f32[1,128], index: 2, kind: input, shape index: {}]   ;;  %s507_s3 = inlined_call_operand.vmem [shape: f32[1,128], index: 3, kind: input, shape index: {}]   ;;  %s508_s4 = inlined_call_operand.vmem [shape: f32[1,128], index: 4, kind: input, shape index: {}]   ;;  %s509_s5 = inlined_call_operand.vmem [shape: bf16[2,8,128], index: 5, kind: output, shape index: {}]  }
   0x1 LB: > { %s403_s19 = sadd.s32 4294967295, %s436_s18   ;;  %p407_p0 = scmp.ge.s32.totalorder %s436_s18, 1  ;;  %s436_s18 = sphi %s468_s18, %s15_s18  }
   0x2   : > { %p187_p1 = scmp.lt.s32.totalorder %s436_s18, 3 }
   0x4   : > { %p188_p2 = pnand %p407_p0, %p187_p1 }
   0x5   : > { %p214_p3 = scmp.lt.s32.totalorder (!%p188_p2), %s403_s19, 1  ;;  %v228_v0 = vlaneseq (!%p188_p2)  ;;  %v227_v2 = vld [vmem:[%s505_s1] sm:$0x7f] (!%p188_p2)  ;;  %vm241_vm0 = vcmask (!%p188_p2), 1046528   ;;  %vm255_vm1 = vcmask (!%p188_p2), 1045504   ;;  %vm269_vm2 = vcmask (!%p188_p2), 1044480  }
   0x6   : > { %191 = sbr.rel (%p188_p2) target bundleno = 73 (0x49), region = 40  ;;  %vm283_vm3 = vcmask (!%p188_p2), 1043456   ;;  %vm297_vm4 = vcmask (!%p188_p2), 1042432   ;;  %vm311_vm5 = vcmask (!%p188_p2), 1041408   ;;  %v411_v57 = vld [vmem:[%s506_s2] ss:$0 sm:$0xff] (!%p188_p2) }
   0x7   : > { %v229_v1 = vshrl.u32 (!%p188_p2), %v228_v0, 7  ;;  %v412_v59 = vld [vmem:[%s507_s3] ss:$0 sm:$0xff] (!%p188_p2) }
   0x8   : > { %v413_v61 = vld [vmem:[%s508_s4] ss:$0 sm:$0xff] (!%p188_p2) }
   0x9   : > { %v230_v3 = vsub.s32 (!%p188_p2), 0, %v229_v1  ;;  %v235_v4 = vsub.s32 (!%p188_p2), 1, %v229_v1  ;;  %v249_v5 = vsub.s32 (!%p188_p2), 2, %v229_v1  ;;  %v263_v6 = vsub.s32 (!%p188_p2), 3, %v229_v1 }
   0xa   : > { %v277_v7 = vsub.s32 (!%p188_p2), 4, %v229_v1  ;;  %v291_v8 = vsub.s32 (!%p188_p2), 5, %v229_v1  ;;  %v305_v9 = vsub.s32 (!%p188_p2), 6, %v229_v1 }
   0xb   : > { %v231_v12 = vrot.slane (!%p188_p2), %v227_v2, %v230_v3  ;;  %v236_v13 = vrot.slane (!%p188_p2), %v227_v2, %v235_v4  ;;  %v250_v14 = vrot.slane (!%p188_p2), %v227_v2, %v249_v5  ;;  %v264_v15 = vrot.slane (!%p188_p2), %v227_v2, %v263_v6 }
   0xc   : > { %v278_v18 = vrot.slane (!%p188_p2), %v227_v2, %v277_v7  ;;  %v292_v19 = vrot.slane (!%p188_p2), %v227_v2, %v291_v8  ;;  %v306_v20 = vrot.slane (!%p188_p2), %v227_v2, %v305_v9 }
   0xd   : > { %s511_s19 = smov (!%p214_p3, %s403_s19), 1 }
   0xe   : > { %s417_s22 = sshll.u32 %s511_s19, 3  ;;  %s410_s7 = sshll.u32 %s511_s19, 2 }
   0xf   : > { %s218_s25 = scalar_lea.vmem %s504_s0, %s417_s22  ;;  %s222_s10 = scalar_lea.vmem %s509_s5, %s410_s7 }
  0x10   : > { %v223_v10 = vld [vmem:[%s218_s25] sm:$0xf]  ;;  %v224_v11 = vld [vmem:[%s218_s25 + $0x4] sm:$0x7] }
  0x11   : > { %v225_v16 = vunpack.c.l.bf16 %v223_v10  ;;  %v226_v17 = vunpack.c.l.bf16 %v224_v11 }
  0x13   : > { %v232_v21 = vmul.f32 %v231_v12, %v225_v16  ;;  %v237_v22 = vmul.f32 %v236_v13, %v225_v16  ;;  %v238_v23 = vmul.f32 %v236_v13, %v226_v17  ;;  %v251_v24 = vmul.f32 %v250_v14, %v225_v16 }
  0x14   : > { %v252_v25 = vmul.f32 %v250_v14, %v226_v17  ;;  %v265_v26 = vmul.f32 %v264_v15, %v225_v16  ;;  %v266_v27 = vmul.f32 %v264_v15, %v226_v17  ;;  %v279_v28 = vmul.f32 %v278_v18, %v225_v16 }
  0x15   : > { %v242_v29 = vrot.slane %v237_v22, 1  ;;  %v243_v30 = vrot.slane %v238_v23, 1  ;;  %v256_v31 = vrot.slane %v251_v24, 2  ;;  %v280_v32 = vmul.f32 %v278_v18, %v226_v17 }
  0x16   : > { %v257_v33 = vrot.slane %v252_v25, 2  ;;  %v270_v34 = vrot.slane %v265_v26, 3  ;;  %v271_v35 = vrot.slane %v266_v27, 3  ;;  %v284_v36 = vrot.slane %v279_v28, 4 }
  0x17   : > { %v244_v37 = vsel %vm241_vm0, %v242_v29, %v243_v30  ;;  %v285_v38 = vrot.slane %v280_v32, 4  ;;  %v293_v39 = vmul.f32 %v292_v19, %v225_v16  ;;  %v294_v40 = vmul.f32 %v292_v19, %v226_v17 }
  0x18   : > { %v246_v41 = vadd.f32 %v244_v37, %v232_v21  ;;  %v258_v42 = vsel %vm255_vm1, %v256_v31, %v257_v33  ;;  %v307_v43 = vmul.f32 %v306_v20, %v225_v16  ;;  %v272_v44 = vsel %vm269_vm2, %v270_v34, %v271_v35 }
  0x19   : > { %v298_v45 = vrot.slane %v293_v39, 5  ;;  %v299_v46 = vrot.slane %v294_v40, 5  ;;  %v308_v47 = vmul.f32 %v306_v20, %v226_v17  ;;  %v286_v49 = vsel %vm283_vm3, %v284_v36, %v285_v38 }
  0x1a   : > { %v260_v48 = vadd.f32 %v258_v42, %v246_v41  ;;  %v312_v50 = vrot.slane %v307_v43, 6 }
  0x1b   : > { %v313_v51 = vrot.slane %v308_v47, 6  ;;  %v300_v53 = vsel %vm297_vm4, %v298_v45, %v299_v46 }
  0x1c   : > { %v274_v52 = vadd.f32 %v272_v44, %v260_v48 }
  0x1d   : > { %v314_v55 = vsel %vm311_vm5, %v312_v50, %v313_v51 }
  0x1e   : > { %v288_v54 = vadd.f32 %v286_v49, %v274_v52 }
  0x20   : > { %v302_v56 = vadd.f32 %v300_v53, %v288_v54 }
  0x22   : > { %v316_v58 = vadd.f32 %v314_v55, %v302_v56 }
  0x24   : > { %v324_v60 = vadd.f32 %v411_v57, %v316_v58 }
  0x26   : > { %v332_v62 = vmul.f32 %v412_v59, %v324_v60 }
  0x28   : > { %v340_v63 = vadd.f32 %v413_v61, %v332_v62 }
  0x2a   : > { %v414_v0 = vmul.f32 -1.442695, %v340_v63 }
  0x2c   : > { %426 = vpow2.f32 %v414_v0 }
  0x36   : > { %v427_v1 = vpop.eup %426 }
  0x37   : > { %v344_v2 = vadd.f32 1.0, %v427_v1 }
  0x39   : > { %428 = vrcp.f32 %v344_v2 }
  0x43   : > { %v429_v3 = vpop.eup %428 }
  0x44   : > { %v347_v4 = vmul.f32 %v429_v3, %v340_v63 }
  0x46   : > { %v348_v5 = vpack.c.bf16 %v347_v4, %v347_v4 }
  0x48   : > { %349 = vst [vmem:[%s222_s10] sm:$0xf] %v348_v5 }
  0x49 PF: > { %s15_s18 = sadd.s32 1, %s436_s18  }
  0x4a   : > { %p12_p4 = scmp.ge.s32.totalorder %s15_s18, 4  }
  0x4c   :  { %14 = sbr.rel (!%p12_p4) target bundleno = 1 (0x1), region = 70 }

// kernel: conformer_vision_forward.53
= control target key start
LH: loop header
LB: loop body
LE: loop exit
PB: predicated region body
PF: predicated region fallthrough
CT: control target
= control target key end

     0   :  { %s107_s0 = inlined_call_operand.vmem [shape: f32[16,128], index: 0, kind: input, shape index: {}]   ;;  %s108_s1 = inlined_call_operand.vmem [shape: f32[1,128], index: 1, kind: input, shape index: {}]   ;;  %s109_s2 = inlined_call_operand.vmem [shape: f32[1,128], index: 2, kind: input, shape index: {}]   ;;  %s110_s3 = inlined_call_operand.vmem [shape: f32[16,128], index: 3, kind: output, shape index: {}]  }
   0x1   :  { %v14_v0 = vld [vmem:[%s107_s0] sm:$0xff]  ;;  %v15_v1 = vld [vmem:[%s107_s0 + $0x8] sm:$0xff] }
   0x2   :  { %16 = vadd.xlane.f32.xlu0 %v14_v0  ;;  %v63_v17 = vld [vmem:[%s108_s1] ss:$0 sm:$0xff] }
   0x3   :  { %v64_v19 = vld [vmem:[%s109_s2] ss:$0 sm:$0xff] }
   0x6   :  { %18 = vadd.xlane.f32.xlu0 %v15_v1 }
  0x8f   :  { %v17_v2 = vpop.xlane.xlu0 %16 }
  0x90   :  { %v21_v3 = vmul.f32 0.0078125, %v17_v2 }
  0x92   :  { %v23_v4 = vsub.f32 %v14_v0, %v21_v3 }
  0x93   :  { %v19_v5 = vpop.xlane.xlu0 %18 }
  0x94   :  { %v22_v6 = vmul.f32 0.0078125, %v19_v5  ;;  %v25_v7 = vmul.f32 %v23_v4, %v23_v4 }
  0x96   :  { %v24_v8 = vsub.f32 %v15_v1, %v22_v6  ;;  %27 = vadd.xlane.f32.xlu1 %v25_v7 }
  0x98   :  { %v26_v9 = vmul.f32 %v24_v8, %v24_v8 }
  0x9a   :  { %29 = vadd.xlane.f32.xlu1 %v26_v9 }
 0x123   :  { %v28_v10 = vpop.xlane.xlu1 %27 }
 0x124   :  { %v31_v11 = vmul.f32 0.0078125, %v28_v10 }
 0x126   :  { %v33_v12 = vadd.f32 1e-05, %v31_v11 }
 0x127   :  { %v30_v13 = vpop.xlane.xlu1 %29 }
 0x128   :  { %65 = vrsqrt.f32 %v33_v12  ;;  %v32_v14 = vmul.f32 0.0078125, %v30_v13 }
 0x12a   :  { %v34_v15 = vadd.f32 1e-05, %v32_v14 }
 0x12c   :  { %67 = vrsqrt.f32 %v34_v15 }
 0x132   :  { %v66_v16 = vpop.eup %65 }
 0x133   :  { %v37_v18 = vmul.f32 %v66_v16, %v23_v4 }
 0x135   :  { %v46_v20 = vmul.f32 %v63_v17, %v37_v18 }
 0x136   :  { %v68_v21 = vpop.eup %67 }
 0x137   :  { %v55_v22 = vadd.f32 %v64_v19, %v46_v20  ;;  %v38_v23 = vmul.f32 %v68_v21, %v24_v8 }
 0x139   :  { %57 = vst [vmem:[%s110_s3] sm:$0xff] %v55_v22  ;;  %v47_v24 = vmul.f32 %v63_v17, %v38_v23 }
 0x13b   :  { %v56_v25 = vadd.f32 %v64_v19, %v47_v24 }
 0x13d   :  { %58 = vst [vmem:[%s110_s3 + $0x8] sm:$0xff] %v56_v25 }

// kernel: conformer_vision_forward.69
= control target key start
LH: loop header
LB: loop body
LE: loop exit
PB: predicated region body
PF: predicated region fallthrough
CT: control target
= control target key end

     0   :  { %v229_v1 = vmov 0.0   ;;  %vm230_vm0 = vmmov 0   ;;  %s294_s0 = inlined_call_operand.vmem [shape: bf16[2,128], index: 0, kind: input, shape index: {}]   ;;  %s295_s1 = inlined_call_operand.vmem [shape: bf16[128,128], index: 1, kind: input, shape index: {}]   ;;  %s296_s2 = inlined_call_operand.vmem [shape: f32[1,128], index: 2, kind: input, shape index: {}]   ;;  %s297_s3 = inlined_call_operand.hbm [shape: f32[2,128], index: 3, kind: output, shape index: {}]  }
   0x1   :  { %v197_v0 = vld [vmem:[%s295_s1] sm:$0xff]   ;;  %174 = vmatprep.subr.bf16.mxu0 %v229_v1  ;;  %20 = vst [vmem:[#allocation2] sm:$0x3] %v229_v1  ;;  %v198_v2 = vld [vmem:[%s295_s1 + $0x8] sm:$0xff]   ;;  %190 = vmatprep.mubr.msk.bf16.mxu0 %vm230_vm0, %v229_v1  ;;  %v199_v3 = vld [vmem:[%s295_s1 + $0x10] sm:$0xff]  }
   0x2   :  { %175 = vmatpush3.bf16.msra.mxu0 %v197_v0 }
   0x3   :  { %176 = vmatprep.subr.bf16.mxu0 %v229_v1 }
   0x6   :  { %177 = vmatpush3.bf16.msra.mxu0 %v198_v2 }
   0x7   :  { %178 = vmatprep.subr.bf16.mxu0 %v229_v1 }
   0x8   :  { %8 = vsyncpa [#allocation4], 0  ;;  %v200_v4 = vld [vmem:[%s295_s1 + $0x18] sm:$0xff]   ;;  %v201_v5 = vld [vmem:[%s295_s1 + $0x20] sm:$0xff]   ;;  %s231_s5 = smov [#allocation3]  }
   0x9   :  { %v202_v6 = vld [vmem:[%s295_s1 + $0x28] sm:$0xff]   ;;  %v203_v7 = vld [vmem:[%s295_s1 + $0x30] sm:$0xff]   ;;  %v204_v8 = vld [vmem:[%s295_s1 + $0x38] sm:$0xff]   ;;  %s148_s1 = sshll.u32 %s231_s5, 4  ;;  %s149_s1 = int_to_ptr.vmem [resolvable:$true] %s148_s1 }
   0xa   :  { %179 = vmatpush3.bf16.msra.mxu0 %v199_v3  ;;  %v22_v9 = vld [vmem:[%s294_s0] sm:$0x1]  ;;  %s205_s6 = scalar_lea.vmem %s149_s1, 32  ;;  %p210_p1 = scmp.lt.s32.totalorder %s149_s1, %s149_s1 }
   0xb   :  { %180 = vmatprep.subr.bf16.mxu0 %v229_v1  ;;  %v21_v10 = vld [vmem:[#allocation2] sm:$0x3]  ;;  %p206_p0 = scmp.ne.s32.totalorder %s149_s1, %s205_s6  ;;  %p211_p2 = scmp.lt.s32.totalorder %s205_s6, %s205_s6 }
   0xc   :  { %v164_v16 = vld [vmem:[%s296_s2] ss:$0 sm:$0xff] }
   0xd   :  { %p212_p3 = por %p211_p2, %p210_p1 }
   0xe   :  { %181 = vmatpush3.bf16.msra.mxu0 %v200_v4 }
   0xf   :  { %182 = vmatprep.subr.bf16.mxu0 %v229_v1  ;;  %p213_p4 = pnand %p212_p3, %p206_p0 }
  0x12   :  { %183 = vmatpush3.bf16.msra.mxu0 %v201_v5 }
  0x13   :  { %184 = vmatprep.subr.bf16.mxu0 %v229_v1 }
  0x16   :  { %185 = vmatpush3.bf16.msra.mxu0 %v202_v6 }
  0x17   :  { %186 = vmatprep.subr.bf16.mxu0 %v229_v1 }
  0x1a   :  { %187 = vmatpush3.bf16.msra.mxu0 %v203_v7 }
  0x1b   :  { %188 = vmatprep.subr.bf16.mxu0 %v229_v1 }
  0x1e   :  { %189 = vmatpush3.bf16.msra.mxu0 %v204_v8 }
  0x21   :  { %191 = vmatmul.mubr.bf16.vlgmr.msra.gmra.mrb[0].mxu0 %v22_v9 }
  0xf4   :  { %v121_v11 = vpop.f32.mrb[0].mxu0 }
  0xf5   :  { %v127_v12 = vadd.f32 %v121_v11, %v21_v10  ;;  %v192_v13 = vpop.f32.mrb[1].mxu0 }
  0xf6   :  { %v124_v14 = vpop.f32.mrb[2].mxu0 }
  0xf7   :  { %128 = vst [vmem:[#allocation2] sm:$0x3] %v127_v12  ;;  %v193_v15 = vpop.f32.mrb[3].mxu0 }
  0xfe   :  { %v132_v17 = vld [vmem:[#allocation2] sm:$0x3] }
  0xff   :  { %v140_v18 = vadd.f32 %v164_v16, %v132_v17 }
 0x101   :  { %141 = vst [vmem:[#allocation3] sm:$0x3] %v140_v18 }
 0x102   :  { %216 = shalt.err (!%p213_p4)
}
 0x103   :  { %s217_s8 = scalar_lea.hbm %s297_s3, 32 }
 0x104   :  { %p218_p5 = scmp.ne.s32.totalorder %s297_s3, %s217_s8  ;;  %p221_p6 = scmp.lt.u32.totalorder %s217_s8, %s297_s3 }
 0x106   :  { %p223_p7 = pnand %p221_p6, %p218_p5 }
 0x108   :  { %226 = shalt.err (!%p223_p7)
}
 0x109   :  { %151 = dma.vmem_to_hbm [thread:$0]  %s149_s1, 32, %s297_s3, [#allocation4]  }
 0x10a   :  { %227 = dma.done.wait [#allocation4], 32  }
 0x10b   :  { %228 = vsyncadd [#allocation4], 4294967264 }
 0x10c   :  { %155 = vsyncpa [#allocation4], 1 }

</bundles_post_ra>
